<compile_context>
chip_gen: v7x
topology: tpu7x:2x2x1
jax: 0.10.0
libtpu: 0.0.40
codegen_flags: <defaults>
</compile_context>

<pallas_src>
import jax
import jax.numpy as jnp
from jax.experimental import pallas as pl
from jax.experimental.pallas import tpu as pltpu

EPS = 1e-5
LANES = 128


# ------------------------------- small helpers --------------------------------

def _round_up(x, m):
    return (x + m - 1) // m * m


def _pad_to(a, size, axis):
    pad = size - a.shape[axis]
    if pad <= 0:
        return a
    widths = [(0, 0)] * a.ndim
    widths[axis] = (0, pad)
    return jnp.pad(a, widths)


def _pick_th(h, w, target_rows=2048):
    # Largest divisor of h such that a tile has <= target_rows output rows.
    best = 1
    for th in range(1, h + 1):
        if h % th == 0 and th * w <= target_rows:
            best = th
    return best


def _halo_blocks(x_nhwc, th):
    # (N, H, W, C) -> (N * H//th, th+2, W+2, C): row blocks with a 1-pixel halo for a
    # same-padded 3x3 conv.  Replication is only (th+2)/th (vs 9x for im2col).
    n, h, w, c = x_nhwc.shape
    xp = jnp.pad(x_nhwc, ((0, 0), (1, 1), (1, 1), (0, 0)))
    nh = h // th
    idx = jnp.arange(nh)[:, None] * th + jnp.arange(th + 2)[None, :]   # (nh, th+2)
    xb = xp[:, idx]                                                    # (n, nh, th+2, w+2, c)
    return xb.reshape(n * nh, th + 2, w + 2, c)


def _bilinear_matrix(n_in, n_out):
    # nn.Upsample(scale_factor=2, mode='bilinear', align_corners=True), separable 1-D weights.
    i = jnp.arange(n_out, dtype=jnp.float32)
    src = i * (n_in - 1) / (n_out - 1)
    lo = jnp.clip(jnp.floor(src).astype(jnp.int32), 0, n_in - 2)
    frac = src - lo.astype(jnp.float32)
    m = jnp.zeros((n_out, n_in), jnp.float32)
    m = m.at[jnp.arange(n_out), lo].add(1.0 - frac)
    m = m.at[jnp.arange(n_out), lo + 1].add(frac)
    return m


# ------------------------------- Pallas kernels -------------------------------

def _conv3x3_stage1(xb, w, th, w_sp, cp):
    """conv3x3 (bias=False) on halo row-blocks + per-tile channel sum / sum-of-squares."""
    g, thp2, wp2, cin = xb.shape
    rows = th * w_sp

    def kernel(x_ref, w_ref, y_ref, s_ref, q_ref):
        xv = x_ref[0]                                        # (th+2, W+2, cin) bf16
        acc = jnp.zeros((rows, cp), jnp.float32)
        for k in range(9):                                   # 9 shifted MXU matmuls
            dy, dx = k // 3, k % 3
            patch = xv[dy:dy + th, dx:dx + w_sp, :].reshape(rows, cin)
            acc = acc + jnp.dot(patch, w_ref[k], preferred_element_type=jnp.float32)
        y_ref[...] = acc[None]
        s_ref[...] = jnp.sum(acc, axis=0, keepdims=True)[None]
        q_ref[...] = jnp.sum(acc * acc, axis=0, keepdims=True)[None]

    return pl.pallas_call(
        kernel,
        grid=(g,),
        in_specs=(
            pl.BlockSpec((1, thp2, wp2, cin), lambda i: (i, 0, 0, 0)),
            pl.BlockSpec((9, cin, cp), lambda i: (0, 0, 0)),          # weights resident
        ),
        out_specs=(
            pl.BlockSpec((1, rows, cp), lambda i: (i, 0, 0)),
            pl.BlockSpec((1, 1, cp), lambda i: (i, 0, 0)),
            pl.BlockSpec((1, 1, cp), lambda i: (i, 0, 0)),
        ),
        out_shape=(
            jax.ShapeDtypeStruct((g, rows, cp), jnp.float32),
            jax.ShapeDtypeStruct((g, 1, cp), jnp.float32),
            jax.ShapeDtypeStruct((g, 1, cp), jnp.float32),
        ),
        compiler_params=pltpu.CompilerParams(dimension_semantics=("parallel",)),
    )(xb, w)


def _conv3x3_res_stage2(ab, w, rw1, rb1, rw2, rb2, th, w_sp, cp):
    """conv3x3 (bias=False) + ResBlock (two 1x1 convs + bias, residual add) + per-tile stats."""
    g, thp2, wp2, cin = ab.shape
    rows = th * w_sp

    def kernel(a_ref, w_ref, rw1_ref, rb1_ref, rw2_ref, rb2_ref, y_ref, s_ref, q_ref):
        av = a_ref[0]                                        # (th+2, W+2, cp) bf16
        h = jnp.zeros((rows, cp), jnp.float32)
        for k in range(9):
            dy, dx = k // 3, k % 3
            patch = av[dy:dy + th, dx:dx + w_sp, :].reshape(rows, cin)
            h = h + jnp.dot(patch, w_ref[k], preferred_element_type=jnp.float32)
        # ResBlock on the conv output: r = (h @ rw1 + b1) @ rw2 + b2 ; h = h + r
        r = jnp.dot(h.astype(jnp.bfloat16), rw1_ref[...],
                    preferred_element_type=jnp.float32) + rb1_ref[...]
        r = jnp.dot(r.astype(jnp.bfloat16), rw2_ref[...],
                    preferred_element_type=jnp.float32) + rb2_ref[...]
        h = h + r
        y_ref[...] = h[None]
        s_ref[...] = jnp.sum(h, axis=0, keepdims=True)[None]
        q_ref[...] = jnp.sum(h * h, axis=0, keepdims=True)[None]

    return pl.pallas_call(
        kernel,
        grid=(g,),
        in_specs=(
            pl.BlockSpec((1, thp2, wp2, cin), lambda i: (i, 0, 0, 0)),
            pl.BlockSpec((9, cin, cp), lambda i: (0, 0, 0)),
            pl.BlockSpec((cp, cp), lambda i: (0, 0)),
            pl.BlockSpec((1, cp), lambda i: (0, 0)),
            pl.BlockSpec((cp, cp), lambda i: (0, 0)),
            pl.BlockSpec((1, cp), lambda i: (0, 0)),
        ),
        out_specs=(
            pl.BlockSpec((1, rows, cp), lambda i: (i, 0, 0)),
            pl.BlockSpec((1, 1, cp), lambda i: (i, 0, 0)),
            pl.BlockSpec((1, 1, cp), lambda i: (i, 0, 0)),
        ),
        out_shape=(
            jax.ShapeDtypeStruct((g, rows, cp), jnp.float32),
            jax.ShapeDtypeStruct((g, 1, cp), jnp.float32),
            jax.ShapeDtypeStruct((g, 1, cp), jnp.float32),
        ),
        compiler_params=pltpu.CompilerParams(dimension_semantics=("parallel",)),
    )(ab, w, rw1, rb1, rw2, rb2)


def _bn_relu_apply(y, scale, shift, out_dtype):
    """Second BN pass: per-tile x*scale + shift, ReLU.  scale/shift are (1,1,Cp) f32."""
    g, rows, cp = y.shape

    def kernel(y_ref, sc_ref, sh_ref, o_ref):
        v = y_ref[...] * sc_ref[...] + sh_ref[...]
        o_ref[...] = jnp.maximum(v, 0.0).astype(o_ref.dtype)

    return pl.pallas_call(
        kernel,
        grid=(g,),
        in_specs=(
            pl.BlockSpec((1, rows, cp), lambda i: (i, 0, 0)),
            pl.BlockSpec((1, 1, cp), lambda i: (0, 0, 0)),
            pl.BlockSpec((1, 1, cp), lambda i: (0, 0, 0)),
        ),
        out_specs=pl.BlockSpec((1, rows, cp), lambda i: (i, 0, 0)),
        out_shape=jax.ShapeDtypeStruct((g, rows, cp), out_dtype),
        compiler_params=pltpu.CompilerParams(dimension_semantics=("parallel",)),
    )(y, scale, shift)


def _bn_scale_shift(psum, pssq, m, gamma, beta):
    # Global (full N*H*W batch) mean / biased variance from per-tile partials, PyTorch training BN.
    mean = jnp.sum(psum, axis=(0, 1)) / m
    var = jnp.maximum(jnp.sum(pssq, axis=(0, 1)) / m - mean * mean, 0.0)
    scale = gamma * jax.lax.rsqrt(var + EPS)
    shift = beta - mean * scale
    cp = scale.shape[0]
    return scale.reshape(1, 1, cp), shift.reshape(1, 1, cp)


# ------------------------------- params & forward ------------------------------

def init_params(key, in_channels, out_channels):
    ks = jax.random.split(key, 6)
    return {
        # DoubleConv 3x3 convs (bias=False), PyTorch OIHW layout
        "w1": 0.1 * jax.random.normal(ks[0], (out_channels, in_channels, 3, 3), jnp.float32),
        "w2": 0.1 * jax.random.normal(ks[1], (out_channels, out_channels, 3, 3), jnp.float32),
        # ResBlock 1x1 convs (bias=True)
        "rw1": 0.1 * jax.random.normal(ks[2], (out_channels, out_channels, 1, 1), jnp.float32),
        "rb1": 0.1 * jax.random.normal(ks[3], (out_channels,), jnp.float32),
        "rw2": 0.1 * jax.random.normal(ks[4], (out_channels, out_channels, 1, 1), jnp.float32),
        "rb2": 0.1 * jax.random.normal(ks[5], (out_channels,), jnp.float32),
        # BatchNorm affine params (PyTorch default init)
        "bn1_g": jnp.ones((out_channels,), jnp.float32),
        "bn1_b": jnp.zeros((out_channels,), jnp.float32),
        "bn2_g": jnp.ones((out_channels,), jnp.float32),
        "bn2_b": jnp.zeros((out_channels,), jnp.float32),
    }


def up_forward(params, x1_nchw, x2_nchw):
    hp = jax.lax.Precision.HIGHEST
    x1 = jnp.transpose(x1_nchw, (0, 2, 3, 1))   # -> NHWC
    x2 = jnp.transpose(x2_nchw, (0, 2, 3, 1))

    # Bilinear 2x upsample (align_corners=True) as separable interpolation matrices (JAX glue).
    mh = _bilinear_matrix(x1.shape[1], 2 * x1.shape[1])
    mw = _bilinear_matrix(x1.shape[2], 2 * x1.shape[2])
    x1u = jnp.einsum('Hh,nhwc,Ww->nHWc', mh, x1, mw, precision=hp)

    dy = x2.shape[1] - x1u.shape[1]
    dx = x2.shape[2] - x1u.shape[2]
    # TODO(synk): negative diffs (F.pad cropping) not handled; UNet skip shapes give >= 0.
    x1u = jnp.pad(x1u, ((0, 0), (dy // 2, dy - dy // 2), (dx // 2, dx - dx // 2), (0, 0)))

    x = jnp.concatenate([x2, x1u], axis=-1)     # == torch.cat([x2, x1], dim=1) in NCHW
    n, H, W, cin = x.shape
    cout = params["w1"].shape[0]
    cp = _round_up(cout, LANES)                 # lane-dense channel dim
    m = n * H * W
    th = _pick_th(H, W)

    # Weight layout: OIHW -> (ky,kx,in,out); pad out (and in where needed) channels to cp; bf16.
    w1 = jnp.transpose(params["w1"], (2, 3, 1, 0))
    w1 = _pad_to(w1, cp, 3).reshape(9, cin, cp).astype(jnp.bfloat16)
    w2 = jnp.transpose(params["w2"], (2, 3, 1, 0))
    w2 = _pad_to(_pad_to(w2, cp, 3), cp, 2).reshape(9, cp, cp).astype(jnp.bfloat16)
    rw1 = _pad_to(_pad_to(params["rw1"][:, :, 0, 0].T, cp, 1), cp, 0).astype(jnp.bfloat16)
    rw2 = _pad_to(_pad_to(params["rw2"][:, :, 0, 0].T, cp, 1), cp, 0).astype(jnp.bfloat16)
    rb1 = _pad_to(params["rb1"], cp, 0).reshape(1, cp)
    rb2 = _pad_to(params["rb2"], cp, 0).reshape(1, cp)
    g1 = _pad_to(params["bn1_g"], cp, 0)
    b1 = _pad_to(params["bn1_b"], cp, 0)
    g2 = _pad_to(params["bn2_g"], cp, 0)
    b2 = _pad_to(params["bn2_b"], cp, 0)

    # Stage 1: conv3x3 (in-kernel, halo blocks) + per-tile BN stats; then BN1+ReLU apply.
    xb = _halo_blocks(x.astype(jnp.bfloat16), th)
    y1, s1, q1 = _conv3x3_stage1(xb, w1, th, W, cp)
    sc1, sh1 = _bn_scale_shift(s1, q1, m, g1, b1)
    a1 = _bn_relu_apply(y1, sc1, sh1, jnp.bfloat16)          # bf16 activations for next matmuls

    # Stage 2: conv3x3 + ResBlock (fused) + per-tile BN stats; then BN2+ReLU apply.
    ab = _halo_blocks(a1.reshape(n, H, W, cp), th)
    y2, s2, q2 = _conv3x3_res_stage2(ab, w2, rw1, rb1, rw2, rb2, th, W, cp)
    sc2, sh2 = _bn_scale_shift(s2, q2, m, g2, b2)
    out = _bn_relu_apply(y2, sc2, sh2, jnp.float32)

    out = out.reshape(n, H, W, cp)[..., :cout]
    return jnp.transpose(out, (0, 3, 1, 2))                  # back to NCHW


# ------------------------------- pure-JAX reference ----------------------------

def up_forward_ref(params, x1_nchw, x2_nchw):
    hp = jax.lax.Precision.HIGHEST
    x1 = jnp.transpose(x1_nchw, (0, 2, 3, 1))
    x2 = jnp.transpose(x2_nchw, (0, 2, 3, 1))
    mh = _bilinear_matrix(x1.shape[1], 2 * x1.shape[1])
    mw = _bilinear_matrix(x1.shape[2], 2 * x1.shape[2])
    x1u = jnp.einsum('Hh,nhwc,Ww->nHWc', mh, x1, mw, precision=hp)
    dy = x2.shape[1] - x1u.shape[1]
    dx = x2.shape[2] - x1u.shape[2]
    x1u = jnp.pad(x1u, ((0, 0), (dy // 2, dy - dy // 2), (dx // 2, dx - dx // 2), (0, 0)))
    x = jnp.concatenate([x2, x1u], axis=-1)

    def conv3x3(z, w_oihw):
        w = jnp.transpose(w_oihw, (2, 3, 1, 0))
        return jax.lax.conv_general_dilated(
            z, w, (1, 1), 'SAME', dimension_numbers=('NHWC', 'HWIO', 'NHWC'), precision=hp)

    def bn_relu(z, g, b):
        mean = jnp.mean(z, axis=(0, 1, 2), keepdims=True)
        var = jnp.mean((z - mean) ** 2, axis=(0, 1, 2), keepdims=True)
        return jnp.maximum((z - mean) * jax.lax.rsqrt(var + EPS) * g + b, 0.0)

    h = bn_relu(conv3x3(x, params["w1"]), params["bn1_g"], params["bn1_b"])
    h = conv3x3(h, params["w2"])
    r = jnp.einsum('nhwc,co->nhwo', h, params["rw1"][:, :, 0, 0].T, precision=hp) + params["rb1"]
    r = jnp.einsum('nhwc,co->nhwo', r, params["rw2"][:, :, 0, 0].T, precision=hp) + params["rb2"]
    h = bn_relu(h + r, params["bn2_g"], params["bn2_b"])
    return jnp.transpose(h, (0, 3, 1, 2))


if __name__ == "__main__":
    key = jax.random.PRNGKey(0)
    k1, k2, kp = jax.random.split(key, 3)

    # Up(in_channels=16, out_channels=8): x1 is the low-res feature map, x2 is the skip.
    x1 = jax.random.normal(k1, (2, 8, 8, 8), jnp.float32)     # NCHW
    x2 = jax.random.normal(k2, (2, 8, 16, 16), jnp.float32)   # NCHW
    params = init_params(kp, in_channels=16, out_channels=8)

    out = jax.jit(up_forward)(params, x1, x2)
    out = jax.block_until_ready(out)
    assert out.shape == (2, 8, 16, 16), out.shape

    ref = up_forward_ref(params, x1, x2)
    err = float(jnp.max(jnp.abs(out - ref)))
    rel = float(jnp.linalg.norm(out - ref) / (jnp.linalg.norm(ref) + 1e-12))
    # bf16 matmul operands => looser tolerance than the old all-f32 path.
    tol = 5e-2 + 2e-2 * float(jnp.max(jnp.abs(ref)))
    assert err < tol, f"max abs err {err} (tol {tol})"
    assert rel < 3e-2, f"relative L2 err {rel}"

    print("KERNEL_OK")
</pallas_src>

<mosaic_0001>
module attributes {stable_mosaic.version = 11 : i64} {
  func.func private @main(%arg0: i32) attributes {dimension_semantics = [#tpu.dimension_semantics<core_parallel>], iteration_bounds = array<i64: 2>, tpu.core_type = #tpu.core_type<sc_scalar_subcore>, window_params = []} {
    return
  }
}

module attributes {stable_mosaic.version = 11 : i64} {
  func.func private @main(%arg0: i32) attributes {dimension_semantics = [#tpu.dimension_semantics<core_parallel>], iteration_bounds = array<i64: 2>, tpu.core_type = #tpu.core_type<sc_scalar_subcore>, window_params = []} {
    return
  }
}

module attributes {stable_mosaic.version = 11 : i64} {
  func.func @kernel(%arg0: i32, %arg1: memref<1x18x18x16xbf16, #tpu.memory_space<vmem>>, %arg2: memref<9x16x128xbf16, #tpu.memory_space<vmem>>, %arg3: memref<1x256x128xf32, #tpu.memory_space<vmem>>, %arg4: memref<1x1x128xf32, #tpu.memory_space<vmem>>, %arg5: memref<1x1x128xf32, #tpu.memory_space<vmem>>) attributes {dimension_semantics = [#tpu.dimension_semantics<parallel>], iteration_bounds = array<i64: 2>, scalar_prefetch = 0 : i64, scratch_operands = 0 : i64, tpu.core_type = #tpu.core_type<tc>, window_params = [{transform_indices = @transform_0, window_bounds = array<i64: 1, 18, 18, 16>}, {pipeline_mode = #tpu.pipeline_mode<synchronous>, transform_indices = @transform_1, window_bounds = array<i64: 9, 16, 128>}, {transform_indices = @transform_2, window_bounds = array<i64: 1, 256, 128>}, {transform_indices = @transform_3, window_bounds = array<i64: 1, 1, 128>}, {transform_indices = @transform_4, window_bounds = array<i64: 1, 1, 128>}]} {
    %c0 = arith.constant 0 : index
    %c0_0 = arith.constant 0 : index
    %c0_1 = arith.constant 0 : index
    %c0_2 = arith.constant 0 : index
    %0 = vector.load %arg1[%c0, %c0_0, %c0_1, %c0_2] : memref<1x18x18x16xbf16, #tpu.memory_space<vmem>>, vector<1x18x18x16xbf16>
    %1 = vector.shape_cast %0 : vector<1x18x18x16xbf16> to vector<18x18x16xbf16>
    %cst = arith.constant 0.000000e+00 : f32
    %2 = vector.broadcast %cst : f32 to vector<256x128xf32>
    %3 = vector.extract_strided_slice %1 {offsets = [0, 0, 0], sizes = [16, 16, 16], strides = [1, 1, 1]} : vector<18x18x16xbf16> to vector<16x16x16xbf16>
    %4 = vector.shape_cast %3 : vector<16x16x16xbf16> to vector<256x16xbf16>
    %c0_3 = arith.constant 0 : index
    %c0_4 = arith.constant 0 : index
    %c0_5 = arith.constant 0 : index
    %5 = vector.load %arg2[%c0_3, %c0_4, %c0_5] : memref<9x16x128xbf16, #tpu.memory_space<vmem>>, vector<1x16x128xbf16>
    %6 = vector.shape_cast %5 : vector<1x16x128xbf16> to vector<16x128xbf16>
    %cst_6 = arith.constant dense<0.000000e+00> : vector<256x128xf32>
    %7 = tpu.matmul %4, %6, %cst_6 {dimension_numbers = #tpu.dot_dimension_numbers<[1], [0], [0], [1], [0, 0, 1, 1], [], []>} : vector<256x16xbf16>, vector<16x128xbf16>, vector<256x128xf32> -> vector<256x128xf32>
    %8 = arith.addf %2, %7 : vector<256x128xf32>
    %9 = vector.extract_strided_slice %1 {offsets = [0, 1, 0], sizes = [16, 16, 16], strides = [1, 1, 1]} : vector<18x18x16xbf16> to vector<16x16x16xbf16>
    %10 = vector.shape_cast %9 : vector<16x16x16xbf16> to vector<256x16xbf16>
    %c1 = arith.constant 1 : index
    %c0_7 = arith.constant 0 : index
    %c0_8 = arith.constant 0 : index
    %11 = vector.load %arg2[%c1, %c0_7, %c0_8] : memref<9x16x128xbf16, #tpu.memory_space<vmem>>, vector<1x16x128xbf16>
    %12 = vector.shape_cast %11 : vector<1x16x128xbf16> to vector<16x128xbf16>
    %cst_9 = arith.constant dense<0.000000e+00> : vector<256x128xf32>
    %13 = tpu.matmul %10, %12, %cst_9 {dimension_numbers = #tpu.dot_dimension_numbers<[1], [0], [0], [1], [0, 0, 1, 1], [], []>} : vector<256x16xbf16>, vector<16x128xbf16>, vector<256x128xf32> -> vector<256x128xf32>
    %14 = arith.addf %8, %13 : vector<256x128xf32>
    %15 = vector.extract_strided_slice %1 {offsets = [0, 2, 0], sizes = [16, 16, 16], strides = [1, 1, 1]} : vector<18x18x16xbf16> to vector<16x16x16xbf16>
    %16 = vector.shape_cast %15 : vector<16x16x16xbf16> to vector<256x16xbf16>
    %c2 = arith.constant 2 : index
    %c0_10 = arith.constant 0 : index
    %c0_11 = arith.constant 0 : index
    %17 = vector.load %arg2[%c2, %c0_10, %c0_11] : memref<9x16x128xbf16, #tpu.memory_space<vmem>>, vector<1x16x128xbf16>
    %18 = vector.shape_cast %17 : vector<1x16x128xbf16> to vector<16x128xbf16>
    %cst_12 = arith.constant dense<0.000000e+00> : vector<256x128xf32>
    %19 = tpu.matmul %16, %18, %cst_12 {dimension_numbers = #tpu.dot_dimension_numbers<[1], [0], [0], [1], [0, 0, 1, 1], [], []>} : vector<256x16xbf16>, vector<16x128xbf16>, vector<256x128xf32> -> vector<256x128xf32>
    %20 = arith.addf %14, %19 : vector<256x128xf32>
    %21 = vector.extract_strided_slice %1 {offsets = [1, 0, 0], sizes = [16, 16, 16], strides = [1, 1, 1]} : vector<18x18x16xbf16> to vector<16x16x16xbf16>
    %22 = vector.shape_cast %21 : vector<16x16x16xbf16> to vector<256x16xbf16>
    %c3 = arith.constant 3 : index
    %c0_13 = arith.constant 0 : index
    %c0_14 = arith.constant 0 : index
    %23 = vector.load %arg2[%c3, %c0_13, %c0_14] : memref<9x16x128xbf16, #tpu.memory_space<vmem>>, vector<1x16x128xbf16>
    %24 = vector.shape_cast %23 : vector<1x16x128xbf16> to vector<16x128xbf16>
    %cst_15 = arith.constant dense<0.000000e+00> : vector<256x128xf32>
    %25 = tpu.matmul %22, %24, %cst_15 {dimension_numbers = #tpu.dot_dimension_numbers<[1], [0], [0], [1], [0, 0, 1, 1], [], []>} : vector<256x16xbf16>, vector<16x128xbf16>, vector<256x128xf32> -> vector<256x128xf32>
    %26 = arith.addf %20, %25 : vector<256x128xf32>
    %27 = vector.extract_strided_slice %1 {offsets = [1, 1, 0], sizes = [16, 16, 16], strides = [1, 1, 1]} : vector<18x18x16xbf16> to vector<16x16x16xbf16>
    %28 = vector.shape_cast %27 : vector<16x16x16xbf16> to vector<256x16xbf16>
    %c4 = arith.constant 4 : index
    %c0_16 = arith.constant 0 : index
    %c0_17 = arith.constant 0 : index
    %29 = vector.load %arg2[%c4, %c0_16, %c0_17] : memref<9x16x128xbf16, #tpu.memory_space<vmem>>, vector<1x16x128xbf16>
    %30 = vector.shape_cast %29 : vector<1x16x128xbf16> to vector<16x128xbf16>
    %cst_18 = arith.constant dense<0.000000e+00> : vector<256x128xf32>
    %31 = tpu.matmul %28, %30, %cst_18 {dimension_numbers = #tpu.dot_dimension_numbers<[1], [0], [0], [1], [0, 0, 1, 1], [], []>} : vector<256x16xbf16>, vector<16x128xbf16>, vector<256x128xf32> -> vector<256x128xf32>
    %32 = arith.addf %26, %31 : vector<256x128xf32>
    %33 = vector.extract_strided_slice %1 {offsets = [1, 2, 0], sizes = [16, 16, 16], strides = [1, 1, 1]} : vector<18x18x16xbf16> to vector<16x16x16xbf16>
    %34 = vector.shape_cast %33 : vector<16x16x16xbf16> to vector<256x16xbf16>
    %c5 = arith.constant 5 : index
    %c0_19 = arith.constant 0 : index
    %c0_20 = arith.constant 0 : index
    %35 = vector.load %arg2[%c5, %c0_19, %c0_20] : memref<9x16x128xbf16, #tpu.memory_space<vmem>>, vector<1x16x128xbf16>
    %36 = vector.shape_cast %35 : vector<1x16x128xbf16> to vector<16x128xbf16>
    %cst_21 = arith.constant dense<0.000000e+00> : vector<256x128xf32>
    %37 = tpu.matmul %34, %36, %cst_21 {dimension_numbers = #tpu.dot_dimension_numbers<[1], [0], [0], [1], [0, 0, 1, 1], [], []>} : vector<256x16xbf16>, vector<16x128xbf16>, vector<256x128xf32> -> vector<256x128xf32>
    %38 = arith.addf %32, %37 : vector<256x128xf32>
    %39 = vector.extract_strided_slice %1 {offsets = [2, 0, 0], sizes = [16, 16, 16], strides = [1, 1, 1]} : vector<18x18x16xbf16> to vector<16x16x16xbf16>
    %40 = vector.shape_cast %39 : vector<16x16x16xbf16> to vector<256x16xbf16>
    %c6 = arith.constant 6 : index
    %c0_22 = arith.constant 0 : index
    %c0_23 = arith.constant 0 : index
    %41 = vector.load %arg2[%c6, %c0_22, %c0_23] : memref<9x16x128xbf16, #tpu.memory_space<vmem>>, vector<1x16x128xbf16>
    %42 = vector.shape_cast %41 : vector<1x16x128xbf16> to vector<16x128xbf16>
    %cst_24 = arith.constant dense<0.000000e+00> : vector<256x128xf32>
    %43 = tpu.matmul %40, %42, %cst_24 {dimension_numbers = #tpu.dot_dimension_numbers<[1], [0], [0], [1], [0, 0, 1, 1], [], []>} : vector<256x16xbf16>, vector<16x128xbf16>, vector<256x128xf32> -> vector<256x128xf32>
    %44 = arith.addf %38, %43 : vector<256x128xf32>
    %45 = vector.extract_strided_slice %1 {offsets = [2, 1, 0], sizes = [16, 16, 16], strides = [1, 1, 1]} : vector<18x18x16xbf16> to vector<16x16x16xbf16>
    %46 = vector.shape_cast %45 : vector<16x16x16xbf16> to vector<256x16xbf16>
    %c7 = arith.constant 7 : index
    %c0_25 = arith.constant 0 : index
    %c0_26 = arith.constant 0 : index
    %47 = vector.load %arg2[%c7, %c0_25, %c0_26] : memref<9x16x128xbf16, #tpu.memory_space<vmem>>, vector<1x16x128xbf16>
    %48 = vector.shape_cast %47 : vector<1x16x128xbf16> to vector<16x128xbf16>
    %cst_27 = arith.constant dense<0.000000e+00> : vector<256x128xf32>
    %49 = tpu.matmul %46, %48, %cst_27 {dimension_numbers = #tpu.dot_dimension_numbers<[1], [0], [0], [1], [0, 0, 1, 1], [], []>} : vector<256x16xbf16>, vector<16x128xbf16>, vector<256x128xf32> -> vector<256x128xf32>
    %50 = arith.addf %44, %49 : vector<256x128xf32>
    %51 = vector.extract_strided_slice %1 {offsets = [2, 2, 0], sizes = [16, 16, 16], strides = [1, 1, 1]} : vector<18x18x16xbf16> to vector<16x16x16xbf16>
    %52 = vector.shape_cast %51 : vector<16x16x16xbf16> to vector<256x16xbf16>
    %c8 = arith.constant 8 : index
    %c0_28 = arith.constant 0 : index
    %c0_29 = arith.constant 0 : index
    %53 = vector.load %arg2[%c8, %c0_28, %c0_29] : memref<9x16x128xbf16, #tpu.memory_space<vmem>>, vector<1x16x128xbf16>
    %54 = vector.shape_cast %53 : vector<1x16x128xbf16> to vector<16x128xbf16>
    %cst_30 = arith.constant dense<0.000000e+00> : vector<256x128xf32>
    %55 = tpu.matmul %52, %54, %cst_30 {dimension_numbers = #tpu.dot_dimension_numbers<[1], [0], [0], [1], [0, 0, 1, 1], [], []>} : vector<256x16xbf16>, vector<16x128xbf16>, vector<256x128xf32> -> vector<256x128xf32>
    %56 = arith.addf %50, %55 : vector<256x128xf32>
    %57 = vector.shape_cast %56 : vector<256x128xf32> to vector<1x256x128xf32>
    %c0_31 = arith.constant 0 : index
    %c0_32 = arith.constant 0 : index
    %c0_33 = arith.constant 0 : index
    %58 = vector.load %arg3[%c0_31, %c0_32, %c0_33] : memref<1x256x128xf32, #tpu.memory_space<vmem>>, vector<1x256x128xf32>
    tpu.vector_store %arg3[%c0_31, %c0_32, %c0_33], %57 {strides = array<i32>} : memref<1x256x128xf32, #tpu.memory_space<vmem>>, vector<1x256x128xf32>,
    %cst_34 = arith.constant dense<0.000000e+00> : vector<128xf32>
    %59 = vector.multi_reduction <add>, %56, %cst_34 [0] : vector<256x128xf32> to vector<128xf32>
    %60 = vector.shape_cast %59 : vector<128xf32> to vector<1x128xf32>
    %61 = vector.shape_cast %60 : vector<1x128xf32> to vector<1x1x128xf32>
    %c0_35 = arith.constant 0 : index
    %c0_36 = arith.constant 0 : index
    %c0_37 = arith.constant 0 : index
    %62 = vector.load %arg4[%c0_35, %c0_36, %c0_37] : memref<1x1x128xf32, #tpu.memory_space<vmem>>, vector<1x1x128xf32>
    tpu.vector_store %arg4[%c0_35, %c0_36, %c0_37], %61 {strides = array<i32>} : memref<1x1x128xf32, #tpu.memory_space<vmem>>, vector<1x1x128xf32>,
    %63 = arith.mulf %56, %56 : vector<256x128xf32>
    %cst_38 = arith.constant dense<0.000000e+00> : vector<128xf32>
    %64 = vector.multi_reduction <add>, %63, %cst_38 [0] : vector<256x128xf32> to vector<128xf32>
    %65 = vector.shape_cast %64 : vector<128xf32> to vector<1x128xf32>
    %66 = vector.shape_cast %65 : vector<1x128xf32> to vector<1x1x128xf32>
    %c0_39 = arith.constant 0 : index
    %c0_40 = arith.constant 0 : index
    %c0_41 = arith.constant 0 : index
    %67 = vector.load %arg5[%c0_39, %c0_40, %c0_41] : memref<1x1x128xf32, #tpu.memory_space<vmem>>, vector<1x1x128xf32>
    tpu.vector_store %arg5[%c0_39, %c0_40, %c0_41], %66 {strides = array<i32>} : memref<1x1x128xf32, #tpu.memory_space<vmem>>, vector<1x1x128xf32>,
    return
  }
  func.func @transform_0(%arg0: i32) -> (i32, i32, i32, i32) {
    %c0_i32 = arith.constant 0 : i32
    %c0_i32_0 = arith.constant 0 : i32
    %c0_i32_1 = arith.constant 0 : i32
    %c0_i32_2 = arith.constant 0 : i32
    return %arg0, %c0_i32, %c0_i32_0, %c0_i32_1 : i32, i32, i32, i32
  }
  func.func @transform_1(%arg0: i32) -> (i32, i32, i32) {
    %c0_i32 = arith.constant 0 : i32
    %c0_i32_0 = arith.constant 0 : i32
    %c0_i32_1 = arith.constant 0 : i32
    %c0_i32_2 = arith.constant 0 : i32
    return %c0_i32, %c0_i32_0, %c0_i32_1 : i32, i32, i32
  }
  func.func @transform_2(%arg0: i32) -> (i32, i32, i32) {
    %c0_i32 = arith.constant 0 : i32
    %c0_i32_0 = arith.constant 0 : i32
    %c0_i32_1 = arith.constant 0 : i32
    return %arg0, %c0_i32, %c0_i32_0 : i32, i32, i32
  }
  func.func @transform_3(%arg0: i32) -> (i32, i32, i32) {
    %c0_i32 = arith.constant 0 : i32
    %c0_i32_0 = arith.constant 0 : i32
    %c0_i32_1 = arith.constant 0 : i32
    return %arg0, %c0_i32, %c0_i32_0 : i32, i32, i32
  }
  func.func @transform_4(%arg0: i32) -> (i32, i32, i32) {
    %c0_i32 = arith.constant 0 : i32
    %c0_i32_0 = arith.constant 0 : i32
    %c0_i32_1 = arith.constant 0 : i32
    return %arg0, %c0_i32, %c0_i32_0 : i32, i32, i32
  }
}

module attributes {stable_mosaic.version = 11 : i64} {
  func.func @kernel(%arg0: i32, %arg1: memref<1x256x128xf32, #tpu.memory_space<vmem>>, %arg2: memref<1x1x128xf32, #tpu.memory_space<vmem>>, %arg3: memref<1x1x128xf32, #tpu.memory_space<vmem>>, %arg4: memref<1x256x128xbf16, #tpu.memory_space<vmem>>) attributes {dimension_semantics = [#tpu.dimension_semantics<parallel>], iteration_bounds = array<i64: 2>, scalar_prefetch = 0 : i64, scratch_operands = 0 : i64, tpu.core_type = #tpu.core_type<tc>, window_params = [{transform_indices = @transform_0, window_bounds = array<i64: 1, 256, 128>}, {pipeline_mode = #tpu.pipeline_mode<synchronous>, transform_indices = @transform_1, window_bounds = array<i64: 1, 1, 128>}, {pipeline_mode = #tpu.pipeline_mode<synchronous>, transform_indices = @transform_2, window_bounds = array<i64: 1, 1, 128>}, {transform_indices = @transform_3, window_bounds = array<i64: 1, 256, 128>}]} {
    %c0 = arith.constant 0 : index
    %c0_0 = arith.constant 0 : index
    %c0_1 = arith.constant 0 : index
    %0 = vector.load %arg1[%c0, %c0_0, %c0_1] : memref<1x256x128xf32, #tpu.memory_space<vmem>>, vector<1x256x128xf32>
    %c0_2 = arith.constant 0 : index
    %c0_3 = arith.constant 0 : index
    %c0_4 = arith.constant 0 : index
    %1 = vector.load %arg2[%c0_2, %c0_3, %c0_4] : memref<1x1x128xf32, #tpu.memory_space<vmem>>, vector<1x1x128xf32>
    %2 = vector.broadcast %1 : vector<1x1x128xf32> to vector<1x256x128xf32>
    %3 = arith.mulf %0, %2 : vector<1x256x128xf32>
    %c0_5 = arith.constant 0 : index
    %c0_6 = arith.constant 0 : index
    %c0_7 = arith.constant 0 : index
    %4 = vector.load %arg3[%c0_5, %c0_6, %c0_7] : memref<1x1x128xf32, #tpu.memory_space<vmem>>, vector<1x1x128xf32>
    %5 = vector.broadcast %4 : vector<1x1x128xf32> to vector<1x256x128xf32>
    %6 = arith.addf %3, %5 : vector<1x256x128xf32>
    %cst = arith.constant 0.000000e+00 : f32
    %7 = vector.broadcast %cst : f32 to vector<1x256x128xf32>
    %8 = arith.maximumf %6, %7 : vector<1x256x128xf32>
    %9 = arith.truncf %8 : vector<1x256x128xf32> to vector<1x256x128xbf16>
    %c0_8 = arith.constant 0 : index
    %c0_9 = arith.constant 0 : index
    %c0_10 = arith.constant 0 : index
    %10 = vector.load %arg4[%c0_8, %c0_9, %c0_10] : memref<1x256x128xbf16, #tpu.memory_space<vmem>>, vector<1x256x128xbf16>
    tpu.vector_store %arg4[%c0_8, %c0_9, %c0_10], %9 {strides = array<i32>} : memref<1x256x128xbf16, #tpu.memory_space<vmem>>, vector<1x256x128xbf16>,
    return
  }
  func.func @transform_0(%arg0: i32) -> (i32, i32, i32) {
    %c0_i32 = arith.constant 0 : i32
    %c0_i32_0 = arith.constant 0 : i32
    %c0_i32_1 = arith.constant 0 : i32
    return %arg0, %c0_i32, %c0_i32_0 : i32, i32, i32
  }
  func.func @transform_1(%arg0: i32) -> (i32, i32, i32) {
    %c0_i32 = arith.constant 0 : i32
    %c0_i32_0 = arith.constant 0 : i32
    %c0_i32_1 = arith.constant 0 : i32
    %c0_i32_2 = arith.constant 0 : i32
    return %c0_i32, %c0_i32_0, %c0_i32_1 : i32, i32, i32
  }
  func.func @transform_2(%arg0: i32) -> (i32, i32, i32) {
    %c0_i32 = arith.constant 0 : i32
    %c0_i32_0 = arith.constant 0 : i32
    %c0_i32_1 = arith.constant 0 : i32
    %c0_i32_2 = arith.constant 0 : i32
    return %c0_i32, %c0_i32_0, %c0_i32_1 : i32, i32, i32
  }
  func.func @transform_3(%arg0: i32) -> (i32, i32, i32) {
    %c0_i32 = arith.constant 0 : i32
    %c0_i32_0 = arith.constant 0 : i32
    %c0_i32_1 = arith.constant 0 : i32
    return %arg0, %c0_i32, %c0_i32_0 : i32, i32, i32
  }
}

module attributes {stable_mosaic.version = 11 : i64} {
  func.func @kernel(%arg0: i32, %arg1: memref<1x18x18x128xbf16, #tpu.memory_space<vmem>>, %arg2: memref<9x128x128xbf16, #tpu.memory_space<vmem>>, %arg3: memref<128x128xbf16, #tpu.memory_space<vmem>>, %arg4: memref<1x128xf32, #tpu.memory_space<vmem>>, %arg5: memref<128x128xbf16, #tpu.memory_space<vmem>>, %arg6: memref<1x128xf32, #tpu.memory_space<vmem>>, %arg7: memref<1x256x128xf32, #tpu.memory_space<vmem>>, %arg8: memref<1x1x128xf32, #tpu.memory_space<vmem>>, %arg9: memref<1x1x128xf32, #tpu.memory_space<vmem>>) attributes {dimension_semantics = [#tpu.dimension_semantics<parallel>], iteration_bounds = array<i64: 2>, scalar_prefetch = 0 : i64, scratch_operands = 0 : i64, tpu.core_type = #tpu.core_type<tc>, window_params = [{transform_indices = @transform_0, window_bounds = array<i64: 1, 18, 18, 128>}, {pipeline_mode = #tpu.pipeline_mode<synchronous>, transform_indices = @transform_1, window_bounds = array<i64: 9, 128, 128>}, {pipeline_mode = #tpu.pipeline_mode<synchronous>, transform_indices = @transform_2, window_bounds = array<i64: 128, 128>}, {pipeline_mode = #tpu.pipeline_mode<synchronous>, transform_indices = @transform_3, window_bounds = array<i64: 1, 128>}, {pipeline_mode = #tpu.pipeline_mode<synchronous>, transform_indices = @transform_4, window_bounds = array<i64: 128, 128>}, {pipeline_mode = #tpu.pipeline_mode<synchronous>, transform_indices = @transform_5, window_bounds = array<i64: 1, 128>}, {transform_indices = @transform_6, window_bounds = array<i64: 1, 256, 128>}, {transform_indices = @transform_7, window_bounds = array<i64: 1, 1, 128>}, {transform_indices = @transform_8, window_bounds = array<i64: 1, 1, 128>}]} {
    %c0 = arith.constant 0 : index
    %c0_0 = arith.constant 0 : index
    %c0_1 = arith.constant 0 : index
    %c0_2 = arith.constant 0 : index
    %0 = vector.load %arg1[%c0, %c0_0, %c0_1, %c0_2] : memref<1x18x18x128xbf16, #tpu.memory_space<vmem>>, vector<1x18x18x128xbf16>
    %1 = vector.shape_cast %0 : vector<1x18x18x128xbf16> to vector<18x18x128xbf16>
    %cst = arith.constant 0.000000e+00 : f32
    %2 = vector.broadcast %cst : f32 to vector<256x128xf32>
    %3 = vector.extract_strided_slice %1 {offsets = [0, 0, 0], sizes = [16, 16, 128], strides = [1, 1, 1]} : vector<18x18x128xbf16> to vector<16x16x128xbf16>
    %4 = vector.shape_cast %3 : vector<16x16x128xbf16> to vector<256x128xbf16>
    %c0_3 = arith.constant 0 : index
    %c0_4 = arith.constant 0 : index
    %c0_5 = arith.constant 0 : index
    %5 = vector.load %arg2[%c0_3, %c0_4, %c0_5] : memref<9x128x128xbf16, #tpu.memory_space<vmem>>, vector<1x128x128xbf16>
    %6 = vector.shape_cast %5 : vector<1x128x128xbf16> to vector<128x128xbf16>
    %cst_6 = arith.constant dense<0.000000e+00> : vector<256x128xf32>
    %7 = tpu.matmul %4, %6, %cst_6 {dimension_numbers = #tpu.dot_dimension_numbers<[1], [0], [0], [1], [0, 0, 1, 1], [], []>} : vector<256x128xbf16>, vector<128x128xbf16>, vector<256x128xf32> -> vector<256x128xf32>
    %8 = arith.addf %2, %7 : vector<256x128xf32>
    %9 = vector.extract_strided_slice %1 {offsets = [0, 1, 0], sizes = [16, 16, 128], strides = [1, 1, 1]} : vector<18x18x128xbf16> to vector<16x16x128xbf16>
    %10 = vector.shape_cast %9 : vector<16x16x128xbf16> to vector<256x128xbf16>
    %c1 = arith.constant 1 : index
    %c0_7 = arith.constant 0 : index
    %c0_8 = arith.constant 0 : index
    %11 = vector.load %arg2[%c1, %c0_7, %c0_8] : memref<9x128x128xbf16, #tpu.memory_space<vmem>>, vector<1x128x128xbf16>
    %12 = vector.shape_cast %11 : vector<1x128x128xbf16> to vector<128x128xbf16>
    %cst_9 = arith.constant dense<0.000000e+00> : vector<256x128xf32>
    %13 = tpu.matmul %10, %12, %cst_9 {dimension_numbers = #tpu.dot_dimension_numbers<[1], [0], [0], [1], [0, 0, 1, 1], [], []>} : vector<256x128xbf16>, vector<128x128xbf16>, vector<256x128xf32> -> vector<256x128xf32>
    %14 = arith.addf %8, %13 : vector<256x128xf32>
    %15 = vector.extract_strided_slice %1 {offsets = [0, 2, 0], sizes = [16, 16, 128], strides = [1, 1, 1]} : vector<18x18x128xbf16> to vector<16x16x128xbf16>
    %16 = vector.shape_cast %15 : vector<16x16x128xbf16> to vector<256x128xbf16>
    %c2 = arith.constant 2 : index
    %c0_10 = arith.constant 0 : index
    %c0_11 = arith.constant 0 : index
    %17 = vector.load %arg2[%c2, %c0_10, %c0_11] : memref<9x128x128xbf16, #tpu.memory_space<vmem>>, vector<1x128x128xbf16>
    %18 = vector.shape_cast %17 : vector<1x128x128xbf16> to vector<128x128xbf16>
    %cst_12 = arith.constant dense<0.000000e+00> : vector<256x128xf32>
    %19 = tpu.matmul %16, %18, %cst_12 {dimension_numbers = #tpu.dot_dimension_numbers<[1], [0], [0], [1], [0, 0, 1, 1], [], []>} : vector<256x128xbf16>, vector<128x128xbf16>, vector<256x128xf32> -> vector<256x128xf32>
    %20 = arith.addf %14, %19 : vector<256x128xf32>
    %21 = vector.extract_strided_slice %1 {offsets = [1, 0, 0], sizes = [16, 16, 128], strides = [1, 1, 1]} : vector<18x18x128xbf16> to vector<16x16x128xbf16>
    %22 = vector.shape_cast %21 : vector<16x16x128xbf16> to vector<256x128xbf16>
    %c3 = arith.constant 3 : index
    %c0_13 = arith.constant 0 : index
    %c0_14 = arith.constant 0 : index
    %23 = vector.load %arg2[%c3, %c0_13, %c0_14] : memref<9x128x128xbf16, #tpu.memory_space<vmem>>, vector<1x128x128xbf16>
    %24 = vector.shape_cast %23 : vector<1x128x128xbf16> to vector<128x128xbf16>
    %cst_15 = arith.constant dense<0.000000e+00> : vector<256x128xf32>
    %25 = tpu.matmul %22, %24, %cst_15 {dimension_numbers = #tpu.dot_dimension_numbers<[1], [0], [0], [1], [0, 0, 1, 1], [], []>} : vector<256x128xbf16>, vector<128x128xbf16>, vector<256x128xf32> -> vector<256x128xf32>
    %26 = arith.addf %20, %25 : vector<256x128xf32>
    %27 = vector.extract_strided_slice %1 {offsets = [1, 1, 0], sizes = [16, 16, 128], strides = [1, 1, 1]} : vector<18x18x128xbf16> to vector<16x16x128xbf16>
    %28 = vector.shape_cast %27 : vector<16x16x128xbf16> to vector<256x128xbf16>
    %c4 = arith.constant 4 : index
    %c0_16 = arith.constant 0 : index
    %c0_17 = arith.constant 0 : index
    %29 = vector.load %arg2[%c4, %c0_16, %c0_17] : memref<9x128x128xbf16, #tpu.memory_space<vmem>>, vector<1x128x128xbf16>
    %30 = vector.shape_cast %29 : vector<1x128x128xbf16> to vector<128x128xbf16>
    %cst_18 = arith.constant dense<0.000000e+00> : vector<256x128xf32>
    %31 = tpu.matmul %28, %30, %cst_18 {dimension_numbers = #tpu.dot_dimension_numbers<[1], [0], [0], [1], [0, 0, 1, 1], [], []>} : vector<256x128xbf16>, vector<128x128xbf16>, vector<256x128xf32> -> vector<256x128xf32>
    %32 = arith.addf %26, %31 : vector<256x128xf32>
    %33 = vector.extract_strided_slice %1 {offsets = [1, 2, 0], sizes = [16, 16, 128], strides = [1, 1, 1]} : vector<18x18x128xbf16> to vector<16x16x128xbf16>
    %34 = vector.shape_cast %33 : vector<16x16x128xbf16> to vector<256x128xbf16>
    %c5 = arith.constant 5 : index
    %c0_19 = arith.constant 0 : index
    %c0_20 = arith.constant 0 : index
    %35 = vector.load %arg2[%c5, %c0_19, %c0_20] : memref<9x128x128xbf16, #tpu.memory_space<vmem>>, vector<1x128x128xbf16>
    %36 = vector.shape_cast %35 : vector<1x128x128xbf16> to vector<128x128xbf16>
    %cst_21 = arith.constant dense<0.000000e+00> : vector<256x128xf32>
    %37 = tpu.matmul %34, %36, %cst_21 {dimension_numbers = #tpu.dot_dimension_numbers<[1], [0], [0], [1], [0, 0, 1, 1], [], []>} : vector<256x128xbf16>, vector<128x128xbf16>, vector<256x128xf32> -> vector<256x128xf32>
    %38 = arith.addf %32, %37 : vector<256x128xf32>
    %39 = vector.extract_strided_slice %1 {offsets = [2, 0, 0], sizes = [16, 16, 128], strides = [1, 1, 1]} : vector<18x18x128xbf16> to vector<16x16x128xbf16>
    %40 = vector.shape_cast %39 : vector<16x16x128xbf16> to vector<256x128xbf16>
    %c6 = arith.constant 6 : index
    %c0_22 = arith.constant 0 : index
    %c0_23 = arith.constant 0 : index
    %41 = vector.load %arg2[%c6, %c0_22, %c0_23] : memref<9x128x128xbf16, #tpu.memory_space<vmem>>, vector<1x128x128xbf16>
    %42 = vector.shape_cast %41 : vector<1x128x128xbf16> to vector<128x128xbf16>
    %cst_24 = arith.constant dense<0.000000e+00> : vector<256x128xf32>
    %43 = tpu.matmul %40, %42, %cst_24 {dimension_numbers = #tpu.dot_dimension_numbers<[1], [0], [0], [1], [0, 0, 1, 1], [], []>} : vector<256x128xbf16>, vector<128x128xbf16>, vector<256x128xf32> -> vector<256x128xf32>
    %44 = arith.addf %38, %43 : vector<256x128xf32>
    %45 = vector.extract_strided_slice %1 {offsets = [2, 1, 0], sizes = [16, 16, 128], strides = [1, 1, 1]} : vector<18x18x128xbf16> to vector<16x16x128xbf16>
    %46 = vector.shape_cast %45 : vector<16x16x128xbf16> to vector<256x128xbf16>
    %c7 = arith.constant 7 : index
    %c0_25 = arith.constant 0 : index
    %c0_26 = arith.constant 0 : index
    %47 = vector.load %arg2[%c7, %c0_25, %c0_26] : memref<9x128x128xbf16, #tpu.memory_space<vmem>>, vector<1x128x128xbf16>
    %48 = vector.shape_cast %47 : vector<1x128x128xbf16> to vector<128x128xbf16>
    %cst_27 = arith.constant dense<0.000000e+00> : vector<256x128xf32>
    %49 = tpu.matmul %46, %48, %cst_27 {dimension_numbers = #tpu.dot_dimension_numbers<[1], [0], [0], [1], [0, 0, 1, 1], [], []>} : vector<256x128xbf16>, vector<128x128xbf16>, vector<256x128xf32> -> vector<256x128xf32>
    %50 = arith.addf %44, %49 : vector<256x128xf32>
    %51 = vector.extract_strided_slice %1 {offsets = [2, 2, 0], sizes = [16, 16, 128], strides = [1, 1, 1]} : vector<18x18x128xbf16> to vector<16x16x128xbf16>
    %52 = vector.shape_cast %51 : vector<16x16x128xbf16> to vector<256x128xbf16>
    %c8 = arith.constant 8 : index
    %c0_28 = arith.constant 0 : index
    %c0_29 = arith.constant 0 : index
    %53 = vector.load %arg2[%c8, %c0_28, %c0_29] : memref<9x128x128xbf16, #tpu.memory_space<vmem>>, vector<1x128x128xbf16>
    %54 = vector.shape_cast %53 : vector<1x128x128xbf16> to vector<128x128xbf16>
    %cst_30 = arith.constant dense<0.000000e+00> : vector<256x128xf32>
    %55 = tpu.matmul %52, %54, %cst_30 {dimension_numbers = #tpu.dot_dimension_numbers<[1], [0], [0], [1], [0, 0, 1, 1], [], []>} : vector<256x128xbf16>, vector<128x128xbf16>, vector<256x128xf32> -> vector<256x128xf32>
    %56 = arith.addf %50, %55 : vector<256x128xf32>
    %57 = arith.truncf %56 : vector<256x128xf32> to vector<256x128xbf16>
    %c0_31 = arith.constant 0 : index
    %c0_32 = arith.constant 0 : index
    %58 = vector.load %arg3[%c0_31, %c0_32] : memref<128x128xbf16, #tpu.memory_space<vmem>>, vector<128x128xbf16>
    %cst_33 = arith.constant dense<0.000000e+00> : vector<256x128xf32>
    %59 = tpu.matmul %57, %58, %cst_33 {dimension_numbers = #tpu.dot_dimension_numbers<[1], [0], [0], [1], [0, 0, 1, 1], [], []>} : vector<256x128xbf16>, vector<128x128xbf16>, vector<256x128xf32> -> vector<256x128xf32>
    %c0_34 = arith.constant 0 : index
    %c0_35 = arith.constant 0 : index
    %60 = vector.load %arg4[%c0_34, %c0_35] : memref<1x128xf32, #tpu.memory_space<vmem>>, vector<1x128xf32>
    %61 = vector.broadcast %60 : vector<1x128xf32> to vector<256x128xf32>
    %62 = arith.addf %59, %61 : vector<256x128xf32>
    %63 = arith.truncf %62 : vector<256x128xf32> to vector<256x128xbf16>
    %c0_36 = arith.constant 0 : index
    %c0_37 = arith.constant 0 : index
    %64 = vector.load %arg5[%c0_36, %c0_37] : memref<128x128xbf16, #tpu.memory_space<vmem>>, vector<128x128xbf16>
    %cst_38 = arith.constant dense<0.000000e+00> : vector<256x128xf32>
    %65 = tpu.matmul %63, %64, %cst_38 {dimension_numbers = #tpu.dot_dimension_numbers<[1], [0], [0], [1], [0, 0, 1, 1], [], []>} : vector<256x128xbf16>, vector<128x128xbf16>, vector<256x128xf32> -> vector<256x128xf32>
    %c0_39 = arith.constant 0 : index
    %c0_40 = arith.constant 0 : index
    %66 = vector.load %arg6[%c0_39, %c0_40] : memref<1x128xf32, #tpu.memory_space<vmem>>, vector<1x128xf32>
    %67 = vector.broadcast %66 : vector<1x128xf32> to vector<256x128xf32>
    %68 = arith.addf %65, %67 : vector<256x128xf32>
    %69 = arith.addf %56, %68 : vector<256x128xf32>
    %70 = vector.shape_cast %69 : vector<256x128xf32> to vector<1x256x128xf32>
    %c0_41 = arith.constant 0 : index
    %c0_42 = arith.constant 0 : index
    %c0_43 = arith.constant 0 : index
    %71 = vector.load %arg7[%c0_41, %c0_42, %c0_43] : memref<1x256x128xf32, #tpu.memory_space<vmem>>, vector<1x256x128xf32>
    tpu.vector_store %arg7[%c0_41, %c0_42, %c0_43], %70 {strides = array<i32>} : memref<1x256x128xf32, #tpu.memory_space<vmem>>, vector<1x256x128xf32>,
    %cst_44 = arith.constant dense<0.000000e+00> : vector<128xf32>
    %72 = vector.multi_reduction <add>, %69, %cst_44 [0] : vector<256x128xf32> to vector<128xf32>
    %73 = vector.shape_cast %72 : vector<128xf32> to vector<1x128xf32>
    %74 = vector.shape_cast %73 : vector<1x128xf32> to vector<1x1x128xf32>
    %c0_45 = arith.constant 0 : index
    %c0_46 = arith.constant 0 : index
    %c0_47 = arith.constant 0 : index
    %75 = vector.load %arg8[%c0_45, %c0_46, %c0_47] : memref<1x1x128xf32, #tpu.memory_space<vmem>>, vector<1x1x128xf32>
    tpu.vector_store %arg8[%c0_45, %c0_46, %c0_47], %74 {strides = array<i32>} : memref<1x1x128xf32, #tpu.memory_space<vmem>>, vector<1x1x128xf32>,
    %76 = arith.mulf %69, %69 : vector<256x128xf32>
    %cst_48 = arith.constant dense<0.000000e+00> : vector<128xf32>
    %77 = vector.multi_reduction <add>, %76, %cst_48 [0] : vector<256x128xf32> to vector<128xf32>
    %78 = vector.shape_cast %77 : vector<128xf32> to vector<1x128xf32>
    %79 = vector.shape_cast %78 : vector<1x128xf32> to vector<1x1x128xf32>
    %c0_49 = arith.constant 0 : index
    %c0_50 = arith.constant 0 : index
    %c0_51 = arith.constant 0 : index
    %80 = vector.load %arg9[%c0_49, %c0_50, %c0_51] : memref<1x1x128xf32, #tpu.memory_space<vmem>>, vector<1x1x128xf32>
    tpu.vector_store %arg9[%c0_49, %c0_50, %c0_51], %79 {strides = array<i32>} : memref<1x1x128xf32, #tpu.memory_space<vmem>>, vector<1x1x128xf32>,
    return
  }
  func.func @transform_0(%arg0: i32) -> (i32, i32, i32, i32) {
    %c0_i32 = arith.constant 0 : i32
    %c0_i32_0 = arith.constant 0 : i32
    %c0_i32_1 = arith.constant 0 : i32
    %c0_i32_2 = arith.constant 0 : i32
    return %arg0, %c0_i32, %c0_i32_0, %c0_i32_1 : i32, i32, i32, i32
  }
  func.func @transform_1(%arg0: i32) -> (i32, i32, i32) {
    %c0_i32 = arith.constant 0 : i32
    %c0_i32_0 = arith.constant 0 : i32
    %c0_i32_1 = arith.constant 0 : i32
    %c0_i32_2 = arith.constant 0 : i32
    return %c0_i32, %c0_i32_0, %c0_i32_1 : i32, i32, i32
  }
  func.func @transform_2(%arg0: i32) -> (i32, i32) {
    %c0_i32 = arith.constant 0 : i32
    %c0_i32_0 = arith.constant 0 : i32
    %c0_i32_1 = arith.constant 0 : i32
    return %c0_i32, %c0_i32_0 : i32, i32
  }
  func.func @transform_3(%arg0: i32) -> (i32, i32) {
    %c0_i32 = arith.constant 0 : i32
    %c0_i32_0 = arith.constant 0 : i32
    %c0_i32_1 = arith.constant 0 : i32
    return %c0_i32, %c0_i32_0 : i32, i32
  }
  func.func @transform_4(%arg0: i32) -> (i32, i32) {
    %c0_i32 = arith.constant 0 : i32
    %c0_i32_0 = arith.constant 0 : i32
    %c0_i32_1 = arith.constant 0 : i32
    return %c0_i32, %c0_i32_0 : i32, i32
  }
  func.func @transform_5(%arg0: i32) -> (i32, i32) {
    %c0_i32 = arith.constant 0 : i32
    %c0_i32_0 = arith.constant 0 : i32
    %c0_i32_1 = arith.constant 0 : i32
    return %c0_i32, %c0_i32_0 : i32, i32
  }
  func.func @transform_6(%arg0: i32) -> (i32, i32, i32) {
    %c0_i32 = arith.constant 0 : i32
    %c0_i32_0 = arith.constant 0 : i32
    %c0_i32_1 = arith.constant 0 : i32
    return %arg0, %c0_i32, %c0_i32_0 : i32, i32, i32
  }
  func.func @transform_7(%arg0: i32) -> (i32, i32, i32) {
    %c0_i32 = arith.constant 0 : i32
    %c0_i32_0 = arith.constant 0 : i32
    %c0_i32_1 = arith.constant 0 : i32
    return %arg0, %c0_i32, %c0_i32_0 : i32, i32, i32
  }
  func.func @transform_8(%arg0: i32) -> (i32, i32, i32) {
    %c0_i32 = arith.constant 0 : i32
    %c0_i32_0 = arith.constant 0 : i32
    %c0_i32_1 = arith.constant 0 : i32
    return %arg0, %c0_i32, %c0_i32_0 : i32, i32, i32
  }
}

module attributes {stable_mosaic.version = 11 : i64} {
  func.func @kernel(%arg0: i32, %arg1: memref<1x256x128xf32, #tpu.memory_space<vmem>>, %arg2: memref<1x1x128xf32, #tpu.memory_space<vmem>>, %arg3: memref<1x1x128xf32, #tpu.memory_space<vmem>>, %arg4: memref<1x256x128xf32, #tpu.memory_space<vmem>>) attributes {dimension_semantics = [#tpu.dimension_semantics<parallel>], iteration_bounds = array<i64: 2>, scalar_prefetch = 0 : i64, scratch_operands = 0 : i64, tpu.core_type = #tpu.core_type<tc>, window_params = [{transform_indices = @transform_0, window_bounds = array<i64: 1, 256, 128>}, {pipeline_mode = #tpu.pipeline_mode<synchronous>, transform_indices = @transform_1, window_bounds = array<i64: 1, 1, 128>}, {pipeline_mode = #tpu.pipeline_mode<synchronous>, transform_indices = @transform_2, window_bounds = array<i64: 1, 1, 128>}, {transform_indices = @transform_3, window_bounds = array<i64: 1, 256, 128>}]} {
    %c0 = arith.constant 0 : index
    %c0_0 = arith.constant 0 : index
    %c0_1 = arith.constant 0 : index
    %0 = vector.load %arg1[%c0, %c0_0, %c0_1] : memref<1x256x128xf32, #tpu.memory_space<vmem>>, vector<1x256x128xf32>
    %c0_2 = arith.constant 0 : index
    %c0_3 = arith.constant 0 : index
    %c0_4 = arith.constant 0 : index
    %1 = vector.load %arg2[%c0_2, %c0_3, %c0_4] : memref<1x1x128xf32, #tpu.memory_space<vmem>>, vector<1x1x128xf32>
    %2 = vector.broadcast %1 : vector<1x1x128xf32> to vector<1x256x128xf32>
    %3 = arith.mulf %0, %2 : vector<1x256x128xf32>
    %c0_5 = arith.constant 0 : index
    %c0_6 = arith.constant 0 : index
    %c0_7 = arith.constant 0 : index
    %4 = vector.load %arg3[%c0_5, %c0_6, %c0_7] : memref<1x1x128xf32, #tpu.memory_space<vmem>>, vector<1x1x128xf32>
    %5 = vector.broadcast %4 : vector<1x1x128xf32> to vector<1x256x128xf32>
    %6 = arith.addf %3, %5 : vector<1x256x128xf32>
    %cst = arith.constant 0.000000e+00 : f32
    %7 = vector.broadcast %cst : f32 to vector<1x256x128xf32>
    %8 = arith.maximumf %6, %7 : vector<1x256x128xf32>
    %c0_8 = arith.constant 0 : index
    %c0_9 = arith.constant 0 : index
    %c0_10 = arith.constant 0 : index
    %9 = vector.load %arg4[%c0_8, %c0_9, %c0_10] : memref<1x256x128xf32, #tpu.memory_space<vmem>>, vector<1x256x128xf32>
    tpu.vector_store %arg4[%c0_8, %c0_9, %c0_10], %8 {strides = array<i32>} : memref<1x256x128xf32, #tpu.memory_space<vmem>>, vector<1x256x128xf32>,
    return
  }
  func.func @transform_0(%arg0: i32) -> (i32, i32, i32) {
    %c0_i32 = arith.constant 0 : i32
    %c0_i32_0 = arith.constant 0 : i32
    %c0_i32_1 = arith.constant 0 : i32
    return %arg0, %c0_i32, %c0_i32_0 : i32, i32, i32
  }
  func.func @transform_1(%arg0: i32) -> (i32, i32, i32) {
    %c0_i32 = arith.constant 0 : i32
    %c0_i32_0 = arith.constant 0 : i32
    %c0_i32_1 = arith.constant 0 : i32
    %c0_i32_2 = arith.constant 0 : i32
    return %c0_i32, %c0_i32_0, %c0_i32_1 : i32, i32, i32
  }
  func.func @transform_2(%arg0: i32) -> (i32, i32, i32) {
    %c0_i32 = arith.constant 0 : i32
    %c0_i32_0 = arith.constant 0 : i32
    %c0_i32_1 = arith.constant 0 : i32
    %c0_i32_2 = arith.constant 0 : i32
    return %c0_i32, %c0_i32_0, %c0_i32_1 : i32, i32, i32
  }
  func.func @transform_3(%arg0: i32) -> (i32, i32, i32) {
    %c0_i32 = arith.constant 0 : i32
    %c0_i32_0 = arith.constant 0 : i32
    %c0_i32_1 = arith.constant 0 : i32
    return %arg0, %c0_i32, %c0_i32_0 : i32, i32, i32
  }
}

</mosaic_0001>

<bundles_post_ra>
// kernel: up_forward.5
= control target key start
LH: loop header
LB: loop body
LE: loop exit
PB: predicated region body
PF: predicated region fallthrough
CT: control target
= control target key end

     0   :  { %s738_s12 = smov 0   ;;  %s885_s0 = inlined_call_operand.vmem [shape: f32[2,256,128], index: 0, kind: input, shape index: {}]   ;;  %s886_s1 = inlined_call_operand.vmem [shape: f32[1,1,128], index: 1, kind: input, shape index: {}]   ;;  %s887_s2 = inlined_call_operand.vmem [shape: f32[1,1,128], index: 2, kind: input, shape index: {}]   ;;  %s888_s3 = inlined_call_operand.vmem [shape: bf16[2,256,128], index: 3, kind: output, shape index: {}]  }
   0x1 LB: > { %s528_s13 = sadd.s32 4294967295, %s716_s12   ;;  %p532_p0 = scmp.ge.s32.totalorder %s716_s12, 1  ;;  %s716_s12 = sphi %s738_s12, %s13_s12  }
   0x2   : > { %p137_p1 = scmp.lt.s32.totalorder %s716_s12, 3 }
   0x4   : > { %p138_p2 = pnand %p532_p0, %p137_p1 }
   0x5   : > { %p161_p3 = scmp.lt.s32.totalorder (!%p138_p2), %s528_s13, 1  ;;  %v752_v0 = vld [vmem:[%s886_s1] ss:$0 sm:$0xff] (!%p138_p2) }
   0x6   : > { %141 = sbr.rel (%p138_p2) target bundleno = 51 (0x33), region = 32  ;;  %v762_v1 = vld [vmem:[%s887_s2] ss:$0 sm:$0xff] (!%p138_p2) }
   0xd   : > { %s890_s13 = smov (!%p161_p3, %s528_s13), 1 }
   0xe   : > { %s573_s14 = sshll.u32 %s890_s13, 8  ;;  %s574_s22 = sshll.u32 %s890_s13, 7 }
   0xf   : > { %s757_s19 = scalar_lea.vmem %s885_s0, %s573_s14  ;;  %s794_s25 = scalar_lea.vmem %s888_s3, %s574_s22 }
  0x10   : > { %v171_v2 = vld [vmem:[%s757_s19] sm:$0xff]  ;;  %v172_v3 = vld [vmem:[%s757_s19 + $0x8] sm:$0xff]  ;;  %v173_v4 = vld [vmem:[%s757_s19 + $0x10] sm:$0xff] }
  0x11   : > { %v210_v5 = vmul.f32 %v752_v0, %v171_v2  ;;  %v211_v6 = vmul.f32 %v752_v0, %v172_v3  ;;  %v174_v7 = vld [vmem:[%s757_s19 + $0x18] sm:$0xff]  ;;  %v212_v8 = vmul.f32 %v752_v0, %v173_v4  ;;  %v175_v9 = vld [vmem:[%s757_s19 + $0x20] sm:$0xff]  ;;  %v176_v10 = vld [vmem:[%s757_s19 + $0x28] sm:$0xff] }
  0x12   : > { %v213_v11 = vmul.f32 %v752_v0, %v174_v7  ;;  %v214_v12 = vmul.f32 %v752_v0, %v175_v9  ;;  %v215_v13 = vmul.f32 %v752_v0, %v176_v10  ;;  %v177_v14 = vld [vmem:[%s757_s19 + $0x30] sm:$0xff]  ;;  %v178_v15 = vld [vmem:[%s757_s19 + $0x38] sm:$0xff]  ;;  %v179_v24 = vld [vmem:[%s757_s19 + $0x40] sm:$0xff] }
  0x13   : > { %v249_v16 = vadd.f32 %v762_v1, %v210_v5  ;;  %v250_v17 = vadd.f32 %v762_v1, %v211_v6  ;;  %v251_v18 = vadd.f32 %v762_v1, %v212_v8  ;;  %v216_v19 = vmul.f32 %v752_v0, %v177_v14  ;;  %v180_v25 = vld [vmem:[%s757_s19 + $0x48] sm:$0xff]  ;;  %v181_v30 = vld [vmem:[%s757_s19 + $0x50] sm:$0xff]  ;;  %v182_v35 = vld [vmem:[%s757_s19 + $0x58] sm:$0xff] }
  0x14   : > { %v252_v20 = vadd.f32 %v762_v1, %v213_v11  ;;  %v253_v21 = vadd.f32 %v762_v1, %v214_v12  ;;  %v254_v22 = vadd.f32 %v762_v1, %v215_v13  ;;  %v217_v23 = vmul.f32 %v752_v0, %v178_v15  ;;  %v183_v36 = vld [vmem:[%s757_s19 + $0x60] sm:$0xff]  ;;  %v184_v41 = vld [vmem:[%s757_s19 + $0x68] sm:$0xff]  ;;  %v185_v42 = vld [vmem:[%s757_s19 + $0x70] sm:$0xff] }
  0x15   : > { %v281_v26 = vmax.f32 %v249_v16, 0.0  ;;  %v282_v27 = vmax.f32 %v250_v17, 0.0  ;;  %v283_v28 = vmax.f32 %v251_v18, 0.0  ;;  %v255_v29 = vadd.f32 %v762_v1, %v216_v19  ;;  %v186_v51 = vld [vmem:[%s757_s19 + $0x78] sm:$0xff]  ;;  %v187_v56 = vld [vmem:[%s757_s19 + $0x80] sm:$0xff]  ;;  %v188_v61 = vld [vmem:[%s757_s19 + $0x88] sm:$0xff] }
  0x16   : > { %v284_v31 = vmax.f32 %v252_v20, 0.0  ;;  %v285_v32 = vmax.f32 %v253_v21, 0.0  ;;  %v286_v33 = vmax.f32 %v254_v22, 0.0  ;;  %v256_v34 = vadd.f32 %v762_v1, %v217_v23  ;;  %v189_v4 = vld [vmem:[%s757_s19 + $0x90] sm:$0xff]  ;;  %v190_v5 = vld [vmem:[%s757_s19 + $0x98] sm:$0xff]  ;;  %v191_v10 = vld [vmem:[%s757_s19 + $0xa0] sm:$0xff] }
  0x17   : > { %v610_v37 = vpack.c.bf16 %v282_v27, %v281_v26  ;;  %v287_v38 = vmax.f32 %v255_v29, 0.0  ;;  %v218_v39 = vmul.f32 %v752_v0, %v179_v24  ;;  %v219_v40 = vmul.f32 %v752_v0, %v180_v25  ;;  %v192_v15 = vld [vmem:[%s757_s19 + $0xa8] sm:$0xff]  ;;  %v193_v20 = vld [vmem:[%s757_s19 + $0xb0] sm:$0xff]  ;;  %v194_v25 = vld [vmem:[%s757_s19 + $0xb8] sm:$0xff] }
  0x18   : > { %v615_v43 = vpack.c.bf16 %v284_v31, %v283_v28  ;;  %v620_v44 = vpack.c.bf16 %v286_v33, %v285_v32  ;;  %v288_v45 = vmax.f32 %v256_v34, 0.0  ;;  %v220_v46 = vmul.f32 %v752_v0, %v181_v30  ;;  %v195_v30 = vld [vmem:[%s757_s19 + $0xc0] sm:$0xff] }
  0x19   : > { %611 = vst [vmem:[%s794_s25] sm:$0xff] %v610_v37   ;;  %v257_v47 = vadd.f32 %v762_v1, %v218_v39  ;;  %v258_v48 = vadd.f32 %v762_v1, %v219_v40  ;;  %v221_v49 = vmul.f32 %v752_v0, %v182_v35  ;;  %v222_v50 = vmul.f32 %v752_v0, %v183_v36  ;;  %v196_v35 = vld [vmem:[%s757_s19 + $0xc8] sm:$0xff]  ;;  %v197_v40 = vld [vmem:[%s757_s19 + $0xd0] sm:$0xff] }
  0x1a   : > { %687 = vst [vmem:[%s794_s25 + $0x8] sm:$0xff] %v615_v43   ;;  %688 = vst [vmem:[%s794_s25 + $0x10] sm:$0xff] %v620_v44   ;;  %v625_v52 = vpack.c.bf16 %v288_v45, %v287_v38  ;;  %v259_v53 = vadd.f32 %v762_v1, %v220_v46  ;;  %v223_v54 = vmul.f32 %v752_v0, %v184_v41  ;;  %v198_v41 = vld [vmem:[%s757_s19 + $0xd8] sm:$0xff]  ;;  %v199_v46 = vld [vmem:[%s757_s19 + $0xe0] sm:$0xff] }
  0x1b   : > { %v224_v55 = vmul.f32 %v752_v0, %v185_v42  ;;  %v289_v57 = vmax.f32 %v257_v47, 0.0  ;;  %v290_v58 = vmax.f32 %v258_v48, 0.0  ;;  %v260_v59 = vadd.f32 %v762_v1, %v221_v49 }
  0x1c   : > { %v261_v60 = vadd.f32 %v762_v1, %v222_v50  ;;  %689 = vst [vmem:[%s794_s25 + $0x18] sm:$0xff] %v625_v52   ;;  %v291_v62 = vmax.f32 %v259_v53, 0.0  ;;  %v262_v63 = vadd.f32 %v762_v1, %v223_v54  ;;  %v225_v2 = vmul.f32 %v752_v0, %v186_v51  ;;  %v200_v51 = vld [vmem:[%s757_s19 + $0xe8] sm:$0xff] }
  0x1d   : > { %v263_v3 = vadd.f32 %v762_v1, %v224_v55  ;;  %v630_v6 = vpack.c.bf16 %v290_v58, %v289_v57  ;;  %v292_v7 = vmax.f32 %v260_v59, 0.0  ;;  %v226_v9 = vmul.f32 %v752_v0, %v187_v56  ;;  %v201_v56 = vld [vmem:[%s757_s19 + $0xf0] sm:$0xff] }
  0x1e   : > { %v293_v8 = vmax.f32 %v261_v60, 0.0  ;;  %v294_v11 = vmax.f32 %v262_v63, 0.0  ;;  %v264_v12 = vadd.f32 %v762_v1, %v225_v2  ;;  %v227_v14 = vmul.f32 %v752_v0, %v188_v61  ;;  %v202_v61 = vld [vmem:[%s757_s19 + $0xf8] sm:$0xff] }
  0x1f   : > { %v295_v13 = vmax.f32 %v263_v3, 0.0  ;;  %690 = vst [vmem:[%s794_s25 + $0x20] sm:$0xff] %v630_v6   ;;  %v635_v16 = vpack.c.bf16 %v292_v7, %v291_v62  ;;  %v265_v17 = vadd.f32 %v762_v1, %v226_v9  ;;  %v228_v18 = vmul.f32 %v752_v0, %v189_v4 }
  0x20   : > { %v229_v19 = vmul.f32 %v752_v0, %v190_v5  ;;  %v640_v21 = vpack.c.bf16 %v294_v11, %v293_v8  ;;  %v296_v22 = vmax.f32 %v264_v12, 0.0  ;;  %v266_v23 = vadd.f32 %v762_v1, %v227_v14 }
  0x21   : > { %v230_v24 = vmul.f32 %v752_v0, %v191_v10  ;;  %691 = vst [vmem:[%s794_s25 + $0x28] sm:$0xff] %v635_v16   ;;  %v297_v26 = vmax.f32 %v265_v17, 0.0  ;;  %v267_v27 = vadd.f32 %v762_v1, %v228_v18  ;;  %v231_v29 = vmul.f32 %v752_v0, %v192_v15 }
  0x22   : > { %v268_v28 = vadd.f32 %v762_v1, %v229_v19  ;;  %692 = vst [vmem:[%s794_s25 + $0x30] sm:$0xff] %v640_v21   ;;  %v645_v31 = vpack.c.bf16 %v296_v22, %v295_v13  ;;  %v298_v32 = vmax.f32 %v266_v23, 0.0  ;;  %v232_v34 = vmul.f32 %v752_v0, %v193_v20 }
  0x23   : > { %v269_v33 = vadd.f32 %v762_v1, %v230_v24  ;;  %v299_v36 = vmax.f32 %v267_v27, 0.0  ;;  %v270_v38 = vadd.f32 %v762_v1, %v231_v29  ;;  %v233_v39 = vmul.f32 %v752_v0, %v194_v25 }
  0x24   : > { %v300_v37 = vmax.f32 %v268_v28, 0.0  ;;  %693 = vst [vmem:[%s794_s25 + $0x38] sm:$0xff] %v645_v31   ;;  %v650_v42 = vpack.c.bf16 %v298_v32, %v297_v26  ;;  %v271_v44 = vadd.f32 %v762_v1, %v232_v34  ;;  %v234_v45 = vmul.f32 %v752_v0, %v195_v30 }
  0x25   : > { %v301_v43 = vmax.f32 %v269_v33, 0.0  ;;  %v302_v48 = vmax.f32 %v270_v38, 0.0  ;;  %v272_v49 = vadd.f32 %v762_v1, %v233_v39  ;;  %v235_v50 = vmul.f32 %v752_v0, %v196_v35 }
  0x26   : > { %v655_v47 = vpack.c.bf16 %v300_v37, %v299_v36  ;;  %694 = vst [vmem:[%s794_s25 + $0x40] sm:$0xff] %v650_v42   ;;  %v303_v52 = vmax.f32 %v271_v44, 0.0  ;;  %v273_v53 = vadd.f32 %v762_v1, %v234_v45  ;;  %v236_v54 = vmul.f32 %v752_v0, %v197_v40 }
  0x27   : > { %v237_v55 = vmul.f32 %v752_v0, %v198_v41  ;;  %v660_v57 = vpack.c.bf16 %v302_v48, %v301_v43  ;;  %v304_v58 = vmax.f32 %v272_v49, 0.0  ;;  %v274_v59 = vadd.f32 %v762_v1, %v235_v50 }
  0x28   : > { %695 = vst [vmem:[%s794_s25 + $0x48] sm:$0xff] %v655_v47   ;;  %v238_v60 = vmul.f32 %v752_v0, %v199_v46  ;;  %v305_v62 = vmax.f32 %v273_v53, 0.0  ;;  %v275_v63 = vadd.f32 %v762_v1, %v236_v54  ;;  %v239_v3 = vmul.f32 %v752_v0, %v200_v51 }
  0x29   : > { %v276_v2 = vadd.f32 %v762_v1, %v237_v55  ;;  %696 = vst [vmem:[%s794_s25 + $0x50] sm:$0xff] %v660_v57   ;;  %v665_v4 = vpack.c.bf16 %v304_v58, %v303_v52  ;;  %v306_v5 = vmax.f32 %v274_v59, 0.0  ;;  %v240_v7 = vmul.f32 %v752_v0, %v201_v56 }
  0x2a   : > { %v277_v6 = vadd.f32 %v762_v1, %v238_v60  ;;  %v307_v8 = vmax.f32 %v275_v63, 0.0  ;;  %v278_v10 = vadd.f32 %v762_v1, %v239_v3  ;;  %v241_v11 = vmul.f32 %v752_v0, %v202_v61 }
  0x2b   : > { %v308_v9 = vmax.f32 %v276_v2, 0.0  ;;  %697 = vst [vmem:[%s794_s25 + $0x58] sm:$0xff] %v665_v4   ;;  %v670_v12 = vpack.c.bf16 %v306_v5, %v305_v62  ;;  %v279_v14 = vadd.f32 %v762_v1, %v240_v7 }
  0x2c   : > { %v309_v13 = vmax.f32 %v277_v6, 0.0  ;;  %v310_v16 = vmax.f32 %v278_v10, 0.0  ;;  %v280_v17 = vadd.f32 %v762_v1, %v241_v11 }
  0x2d   : > { %v675_v15 = vpack.c.bf16 %v308_v9, %v307_v8  ;;  %698 = vst [vmem:[%s794_s25 + $0x60] sm:$0xff] %v670_v12   ;;  %v311_v18 = vmax.f32 %v279_v14, 0.0 }
  0x2e   : > { %v680_v19 = vpack.c.bf16 %v310_v16, %v309_v13  ;;  %v312_v20 = vmax.f32 %v280_v17, 0.0 }
  0x2f   : > { %699 = vst [vmem:[%s794_s25 + $0x68] sm:$0xff] %v675_v15  }
  0x30   : > { %700 = vst [vmem:[%s794_s25 + $0x70] sm:$0xff] %v680_v19   ;;  %v685_v21 = vpack.c.bf16 %v312_v20, %v311_v18 }
  0x32   : > { %701 = vst [vmem:[%s794_s25 + $0x78] sm:$0xff] %v685_v21  }
  0x33 PF: > { %s13_s12 = sadd.s32 1, %s716_s12  }
  0x34   : > { %p10_p4 = scmp.ge.s32.totalorder %s13_s12, 4  }
  0x36   :  { %12 = sbr.rel (!%p10_p4) target bundleno = 1 (0x1), region = 62 }

// kernel: up_forward.4
= control target key start
LH: loop header
LB: loop body
LE: loop exit
PB: predicated region body
PF: predicated region fallthrough
CT: control target
= control target key end

     0   :  { %s4253_s15 = smov 0   ;;  %s5256_s0 = inlined_call_operand.vmem [shape: bf16[2,18,18,16], index: 0, kind: input, shape index: {}]   ;;  %s5257_s1 = inlined_call_operand.vmem [shape: bf16[9,16,128], index: 1, kind: input, shape index: {}]   ;;  %s5258_s2 = inlined_call_operand.vmem [shape: f32[2,256,128], index: 2, kind: output, shape index: {0}]   ;;  %s5259_s3 = inlined_call_operand.vmem [shape: f32[2,1,128], index: 3, kind: output, shape index: {1}]   ;;  %s5260_s4 = inlined_call_operand.vmem [shape: f32[2,1,128], index: 4, kind: output, shape index: {2}]  }
   0x1 LB: > { %s3211_s16 = sadd.s32 4294967295, %s4226_s15   ;;  %p3215_p0 = scmp.ge.s32.totalorder %s4226_s15, 1  ;;  %s4226_s15 = sphi %s4253_s15, %s15_s15  }
   0x2   : > { %p167_p1 = scmp.lt.s32.totalorder %s4226_s15, 3 }
   0x4   : > { %p168_p2 = pnand %p3215_p0, %p167_p1 }
   0x6   : > { %171 = sbr.rel (%p168_p2) target bundleno = 569 (0x239), region = 28 }
   0xd   : > { %v4189_v0 = vld [vmem:[%s5257_s1 + $0x8] sm:$0xff]   ;;  %p199_p3 = scmp.lt.s32.totalorder %s3211_s16, 1  ;;  %v4190_v1 = vld [vmem:[%s5257_s1 + $0x20] sm:$0xff]   ;;  %vm272_vm0 = vsmask.f32 3328  ;;  %vm716_vm2 = vcmask 130048  }
   0xe   : > { %3616 = vmatprep.subr.bf16.mxu1 %v4189_v0  ;;  %v4272_v2 = vld [vmem:[%s5257_s1] sm:$0xff]   ;;  %3752 = vmatprep.subr.bf16.mxu0 %v4190_v1  ;;  %v4279_v3 = vld [vmem:[%s5257_s1 + $0x28] sm:$0xff]   ;;  %vm273_vm1 = vsmask.f32 7440  ;;  %vm1237_vm4 = vcmask 1042432   ;;  %vm1238_vm5 = vcmask 1046532  }
   0xf   : > { %s5336_s16 = smov (!%p199_p3, %s3211_s16), 1  ;;  %3617 = vmatpush3.bf16.msra.mxu1 %v4189_v0  ;;  %3753 = vmatpush3.bf16.msra.mxu0 %v4190_v1  ;;  %vm4317_vm3 = vmor %vm272_vm0, %vm273_vm1 }
  0x10   : > { %s4180_s23 = smul.u32 216, %s5336_s16  ;;  %3650 = vmatprep.subr.bf16.mxu1 %v4272_v2  ;;  %3786 = vmatprep.subr.bf16.mxu0 %v4279_v3  ;;  %vm4501_vm6 = vmor %vm1237_vm4, %vm1238_vm5  ;;  %s3462_s17 = sshll.u32 %s5336_s16, 8 }
  0x11   : > { %s5206_s20 = scalar_lea.vmem %s5258_s2, %s3462_s17  ;;  %s214_s26 = scalar_lea.vmem %s5260_s4, %s5336_s16 }
  0x12   : > { %s4284_s28 = scalar_lea.vmem %s5256_s0, %s4180_s23  ;;  %s211_s23 = scalar_lea.vmem %s5259_s3, %s5336_s16 }
  0x13   : > { %v4288_v4 = vld [vmem:[%s4284_s28] sm:$0xf]  ;;  %v4291_v5 = vld [vmem:[%s4284_s28 + $0x4] sm:$0xf]  ;;  %v218_v6 = vld [vmem:[%s4284_s28 + $0x8] sm:$0x1] }
  0x14   : > { %v276_v7 = vshrl.u32 %v4288_v4, 16  ;;  %v279_v8 = vshll.u32 %v4288_v4, 16  ;;  %v285_v9 = vshll.u32 %v4291_v5, 16  ;;  %v289_v10 = vshrl.u32 %v4291_v5, 16  ;;  %v4299_v11 = vld [vmem:[%s4284_s28 + $0xc] sm:$0xf] }
  0x15   : > { %v295_v12 = vshll.u32 %v218_v6, 16  ;;  %v4302_v13 = vld [vmem:[%s4284_s28 + $0x10] sm:$0xf]  ;;  %v4305_v14 = vld [vmem:[%s4284_s28 + $0x14] sm:$0x1]  ;;  %v300_v20 = vshrl.u32 %v4299_v11, 16 }
  0x16   : > { %v278_v15 = vrot.slane %v276_v7, 4  ;;  %v281_v16 = vrot.slane %v279_v8, 5  ;;  %v287_v17 = vrot.slane %v285_v9, 5  ;;  %v291_v18 = vrot.slane %v289_v10, 4  ;;  %v4313_v27 = vld [vmem:[%s4284_s28 + $0x18] sm:$0xf] }
  0x17   : > { %v297_v19 = vrot.slane %v295_v12, 5  ;;  %v303_v21 = vshll.u32 %v4299_v11, 16  ;;  %v309_v22 = vshll.u32 %v4302_v13, 16  ;;  %v313_v25 = vshrl.u32 %v4302_v13, 16  ;;  %v4326_v33 = vld [vmem:[%s4284_s28 + $0x1c] sm:$0xf] }
  0x18   : > { %v282_v23 = vor.u32 %v281_v16, %v278_v15  ;;  %v292_v24 = vor.u32 %v291_v18, %v287_v17  ;;  %v319_v26 = vshll.u32 %v4305_v14, 16  ;;  %v302_v29 = vrot.slane %v300_v20, 4  ;;  %v4330_v40 = vld [vmem:[%s4284_s28 + $0x20] sm:$0x1]  ;;  %v4340_v51 = vld [vmem:[%s4284_s28 + $0x24] sm:$0xf] }
  0x19   : > { %v305_v30 = vrot.slane %v303_v21, 5  ;;  %v311_v31 = vrot.slane %v309_v22, 5  ;;  %v4323_v32 = vcombine.low %v4299_v11, %v4302_v13  ;;  %v315_v36 = vrot.slane %v313_v25, 4  ;;  %v4345_v56 = vld [vmem:[%s4284_s28 + $0x28] sm:$0xf]  ;;  %v4366_v12 = vld [vmem:[%s5257_s1 + $0x10] sm:$0xff]  }
  0x1a   : > { %v283_v34 = vrot.slane %v282_v23, 4  ;;  %v293_v35 = vrot.slane %v292_v24, 4  ;;  %v321_v37 = vrot.slane %v319_v26, 5  ;;  %v1252_v39 = vrot.slane %v4305_v14, 5  ;;  %v4353_v61 = vld [vmem:[%s4284_s28 + $0x2c] sm:$0x1] }
  0x1b   : > { %v306_v38 = vor.u32 %v305_v30, %v302_v29  ;;  %v324_v41 = vshrl.u32 %v4313_v27, 16  ;;  %v327_v42 = vshll.u32 %v4313_v27, 16  ;;  %v316_v45 = vor.u32 %v315_v36, %v311_v31  ;;  %v4359_v6 = vld [vmem:[%s4284_s28 + $0x30] sm:$0xf]  ;;  %v4378_v23 = vld [vmem:[%s4284_s28 + $0x38] sm:$0x1] }
  0x1c   : > { %v288_v43 = vsel %vm4317_vm3, %v283_v34, %v287_v17  ;;  %v298_v44 = vsel %vm4317_vm3, %v293_v35, %v297_v19  ;;  %v333_v46 = vshll.u32 %v4326_v33, 16  ;;  %v337_v54 = vshrl.u32 %v4326_v33, 16  ;;  %v4371_v19 = vld [vmem:[%s4284_s28 + $0x34] sm:$0xf] }
  0x1d   : > { %v3221_v47 = vcombine.low %v288_v43, %v298_v44  ;;  %v307_v48 = vrot.slane %v306_v38, 4  ;;  %v326_v49 = vrot.slane %v324_v41, 4  ;;  %v329_v50 = vrot.slane %v327_v42, 5  ;;  %v4393_v43 = vld [vmem:[%s4284_s28 + $0x40] sm:$0xf] }
  0x1e   : > { %v317_v52 = vrot.slane %v316_v45, 4  ;;  %v335_v53 = vrot.slane %v333_v46, 5  ;;  %v343_v55 = vshll.u32 %v4330_v40, 16  ;;  %v1256_v59 = vrot.slane %v4326_v33, 5 }
  0x1f   : > { %3618 = vmatprep.mubr.msk.bf16.mxu1 %vm716_vm2, %v3221_v47  ;;  %v312_v57 = vsel %vm4317_vm3, %v307_v48, %v311_v31  ;;  %v330_v58 = vor.u32 %v329_v50, %v326_v49  ;;  %v1259_v60 = vrot.slane %v4330_v40, 5  ;;  %v339_v63 = vrot.slane %v337_v54, 4  ;;  %v4400_v48 = vld [vmem:[%s5257_s1 + $0x30] sm:$0xff]  }
  0x20   : > { %v322_v62 = vsel %vm4317_vm3, %v317_v52, %v321_v37  ;;  %v345_v0 = vrot.slane %v343_v55, 5  ;;  %v348_v1 = vshrl.u32 %v4340_v51, 16  ;;  %v351_v9 = vshll.u32 %v4340_v51, 16  ;;  %v4386_v37 = vld [vmem:[%s4284_s28 + $0x3c] sm:$0xf] }
  0x21   : > { %v3222_v7 = vcombine.low %v312_v57, %v322_v62  ;;  %v331_v8 = vrot.slane %v330_v58, 4  ;;  %v357_v10 = vshll.u32 %v4345_v56, 16  ;;  %v340_v15 = vor.u32 %v339_v63, %v335_v53  ;;  %v4410_v57 = vld [vmem:[%s4284_s28 + $0x44] sm:$0x1]  ;;  %v4415_v63 = vld [vmem:[%s4284_s28 + $0x48] sm:$0xf] }
  0x22   : > { %v350_v16 = vrot.slane %v348_v1, 4  ;;  %v361_v17 = vshrl.u32 %v4345_v56, 16  ;;  %v367_v18 = vshll.u32 %v4353_v61, 16  ;;  %v353_v21 = vrot.slane %v351_v9, 5  ;;  %v4422_v9 = vld [vmem:[%s4284_s28 + $0x4c] sm:$0xf] }
  0x23   : > { %3754 = vmatprep.mubr.msk.bf16.mxu0 %vm716_vm2, %v3222_v7  ;;  %3619 = vmatmul.mubr.msk.bf16.vlgmr.msra.gmra.mrb[0].mxu1 %vm716_vm2, %v3222_v7  ;;  %v336_v20 = vsel %vm4317_vm3, %v331_v8, %v335_v53  ;;  %v359_v22 = vrot.slane %v357_v10, 5  ;;  %v372_v24 = vshrl.u32 %v4359_v6, 16  ;;  %v341_v25 = vrot.slane %v340_v15, 4 }
  0x24   : > { %3651 = vmatpush3.bf16.msra.mxu1 %v4272_v2  ;;  %v363_v26 = vrot.slane %v361_v17, 4  ;;  %v369_v29 = vrot.slane %v367_v18, 5  ;;  %v375_v30 = vshll.u32 %v4359_v6, 16  ;;  %v354_v31 = vor.u32 %v353_v21, %v350_v16 }
  0x25   : > { %v374_v34 = vrot.slane %v372_v24, 4  ;;  %v381_v35 = vshll.u32 %v4371_v19, 16  ;;  %v385_v36 = vshrl.u32 %v4371_v19, 16  ;;  %3684 = vmatprep.subr.bf16.mxu1 %v4366_v12  ;;  %v346_v38 = vsel %vm4317_vm3, %v341_v25, %v345_v0  ;;  %v4438_v25 = vld [vmem:[%s4284_s28 + $0x50] sm:$0x1] }
  0x26   : > { %v364_v41 = vor.u32 %v363_v26, %v359_v22  ;;  %v377_v2 = vrot.slane %v375_v30, 5  ;;  %v391_v42 = vshll.u32 %v4378_v23, 16  ;;  %v4395_v44 = vcombine.low %v336_v20, %v346_v38  ;;  %v4443_v30 = vld [vmem:[%s4284_s28 + $0x54] sm:$0xf]  ;;  %v4448_v38 = vld [vmem:[%s4284_s28 + $0x58] sm:$0xf] }
  0x27   : > { %v355_v45 = vrot.slane %v354_v31, 4  ;;  %v383_v46 = vrot.slane %v381_v35, 5  ;;  %v387_v47 = vrot.slane %v385_v36, 4  ;;  %v396_v53 = vshrl.u32 %v4386_v37, 16  ;;  %5295 = vst [vmem:[#allocation4_spill] sm:$0xff] %v4443_v30 }
  0x28   : > { %5293 = vst [vmem:[#allocation2_spill] sm:$0xff] %v4395_v44  ;;  %v365_v49 = vrot.slane %v364_v41, 4  ;;  %v378_v50 = vor.u32 %v377_v2, %v374_v34  ;;  %v393_v52 = vrot.slane %v391_v42, 5  ;;  %3755 = vmatmul.mubr.msk.bf16.vlgmr.msra.gmra.mrb[0].mxu0 %vm716_vm2, %v4395_v44  ;;  %3622 = vmatprep.mubr.msk.bf16.mxu1 %vm716_vm2, %v4395_v44  ;;  %v399_v58 = vshll.u32 %v4386_v37, 16 }
  0x29   : > { %v360_v54 = vsel %vm4317_vm3, %v355_v45, %v359_v22  ;;  %v388_v55 = vor.u32 %v387_v47, %v383_v46  ;;  %v405_v62 = vshll.u32 %v4393_v43, 16  ;;  %3787 = vmatpush3.bf16.msra.mxu0 %v4279_v3  ;;  %v398_v7 = vrot.slane %v396_v53, 4 }
  0x2a   : > { %v370_v0 = vsel %vm4317_vm3, %v365_v49, %v369_v29  ;;  %v379_v1 = vrot.slane %v378_v50, 4  ;;  %v409_v8 = vshrl.u32 %v4393_v43, 16  ;;  %v401_v16 = vrot.slane %v399_v58, 5  ;;  %3820 = vmatprep.subr.bf16.mxu0 %v4400_v48 }
  0x2b   : > { %v4424_v10 = vcombine.low %v360_v54, %v370_v0  ;;  %v389_v15 = vrot.slane %v388_v55, 4  ;;  %v407_v17 = vrot.slane %v405_v62, 5  ;;  %v415_v20 = vshll.u32 %v4410_v57, 16  ;;  %v4461_v55 = vld [vmem:[%s4284_s28 + $0x5c] sm:$0x1] }
  0x2c   : > { %v384_v3 = vsel %vm4317_vm3, %v379_v1, %v383_v46  ;;  %v411_v18 = vrot.slane %v409_v8, 4  ;;  %v420_v21 = vshrl.u32 %v4415_v63, 16  ;;  %v402_v24 = vor.u32 %v401_v16, %v398_v7  ;;  %v4465_v62 = vld [vmem:[%s4284_s28 + $0x60] sm:$0xf] }
  0x2d   : > { %5294 = vst [vmem:[#allocation3_spill] sm:$0xff] %v4424_v10  ;;  %3758 = vmatprep.mubr.msk.bf16.mxu0 %vm716_vm2, %v4424_v10  ;;  %3623 = vmatmul.mubr.msk.bf16.gmra.mrb[4].mxu1 %vm716_vm2, %v4424_v10  ;;  %v394_v22 = vsel %vm4317_vm3, %v389_v15, %v393_v52  ;;  %v423_v26 = vshll.u32 %v4415_v63, 16  ;;  %v429_v29 = vshll.u32 %v4422_v9, 16  ;;  %v417_v35 = vrot.slane %v415_v20, 5  ;;  %v4470_v15 = vld [vmem:[%s4284_s28 + $0x64] sm:$0xf] }
  0x2e   : > { %v4445_v31 = vcombine.low %v384_v3, %v394_v22  ;;  %v412_v34 = vor.u32 %v411_v18, %v407_v17  ;;  %v422_v36 = vrot.slane %v420_v21, 4  ;;  %v403_v41 = vrot.slane %v402_v24, 4  ;;  %v4681_v10 = vld [vmem:[%s4284_s28 + $0xa8] sm:$0xf] }
  0x2f   : > { %v425_v2 = vrot.slane %v423_v26, 5  ;;  %v431_v42 = vrot.slane %v429_v29, 5  ;;  %v433_v45 = vshrl.u32 %v4422_v9, 16  ;;  %v439_v47 = vshll.u32 %v4438_v25, 16 }
  0x30   : > { %5296 = vst [vmem:[#allocation5_spill] sm:$0xff] %v4445_v31  ;;  %3626 = vmatprep.mubr.msk.bf16.mxu1 %vm716_vm2, %v4445_v31  ;;  %v413_v46 = vrot.slane %v412_v34, 4  ;;  %v444_v49 = vshrl.u32 %v4443_v30, 16  ;;  %v447_v50 = vshll.u32 %v4443_v30, 16  ;;  %3759 = vmatmul.mubr.msk.bf16.gmra.mrb[4].mxu0 %vm716_vm2, %v4445_v31  ;;  %v408_v52 = vsel %vm4317_vm3, %v403_v41, %v407_v17  ;;  %v4484_v34 = vld [vmem:[%s4284_s28 + $0x68] sm:$0x1] }
  0x31   : > { %v426_v53 = vor.u32 %v425_v2, %v422_v36  ;;  %v435_v54 = vrot.slane %v433_v45, 4  ;;  %v453_v58 = vshll.u32 %v4448_v38, 16  ;;  %v441_v1 = vrot.slane %v439_v47, 5 }
  0x32   : > { %v418_v0 = vsel %vm4317_vm3, %v413_v46, %v417_v35  ;;  %v446_v7 = vrot.slane %v444_v49, 4  ;;  %v449_v8 = vrot.slane %v447_v50, 5  ;;  %v457_v21 = vshrl.u32 %v4448_v38, 16 }
  0x33   : > { %v4472_v16 = vcombine.low %v408_v52, %v418_v0  ;;  %v427_v17 = vrot.slane %v426_v53, 4  ;;  %v436_v3 = vor.u32 %v435_v54, %v431_v42  ;;  %v455_v18 = vrot.slane %v453_v58, 5 }
  0x34   : > { %v450_v20 = vor.u32 %v449_v8, %v446_v7  ;;  %v463_v22 = vshll.u32 %v4461_v55, 16  ;;  %v468_v24 = vshrl.u32 %v4465_v62, 16  ;;  %v471_v35 = vshll.u32 %v4465_v62, 16 }
  0x35   : > { %5297 = vst [vmem:[#allocation6_spill] sm:$0xff] %v4472_v16  ;;  %3762 = vmatprep.mubr.msk.bf16.mxu0 %vm716_vm2, %v4472_v16  ;;  %3627 = vmatmul.mubr.msk.bf16.gmra.mrb[8].mxu1 %vm716_vm2, %v4472_v16  ;;  %v432_v26 = vsel %vm4317_vm3, %v427_v17, %v431_v42  ;;  %v437_v29 = vrot.slane %v436_v3, 4  ;;  %v477_v36 = vshll.u32 %v4470_v15, 16  ;;  %v459_v2 = vrot.slane %v457_v21, 4  ;;  %v4492_v42 = vld [vmem:[%s4284_s28 + $0x6c] sm:$0xf] }
  0x36   : > { %v451_v41 = vrot.slane %v450_v20, 4  ;;  %v465_v45 = vrot.slane %v463_v22, 5  ;;  %v470_v46 = vrot.slane %v468_v24, 4  ;;  %v473_v49 = vrot.slane %v471_v35, 5  ;;  %v4515_v22 = vld [vmem:[%s4284_s28 + $0x74] sm:$0x1] }
  0x37   : > { %v442_v47 = vsel %vm4317_vm3, %v437_v29, %v441_v1  ;;  %v479_v50 = vrot.slane %v477_v36, 5  ;;  %v481_v52 = vshrl.u32 %v4470_v15, 16  ;;  %v460_v58 = vor.u32 %v459_v2, %v455_v18  ;;  %v4506_v1 = vld [vmem:[%s4284_s28 + $0x70] sm:$0xf]  ;;  %v4658_v16 = vld [vmem:[%s4284_s28 + $0xa0] sm:$0xf] }
  0x38   : > { %v4494_v53 = vcombine.low %v432_v26, %v442_v47  ;;  %v456_v54 = vsel %vm4317_vm3, %v451_v41, %v455_v18  ;;  %v487_v0 = vshll.u32 %v4484_v34, 16  ;;  %v474_v8 = vor.u32 %v473_v49, %v470_v46 }
  0x39   : > { %v483_v17 = vrot.slane %v481_v52, 4  ;;  %v3288_v3 = vrot.slane %v4299_v11, 9  ;;  %v1249_v20 = vrot.slane %v4302_v13, 5  ;;  %v461_v18 = vrot.slane %v460_v58, 4 }
  0x3a   : > { %5298 = vst [vmem:[#allocation7_spill] sm:$0xff] %v4494_v53  ;;  %3763 = vmatmul.mubr.msk.bf16.gmra.mrb[8].mxu0 %vm716_vm2, %v4494_v53  ;;  %3630 = vmatprep.mubr.msk.bf16.mxu1 %vm716_vm2, %v4494_v53  ;;  %v489_v21 = vrot.slane %v487_v0, 5  ;;  %v492_v24 = vshrl.u32 %v4492_v42, 16  ;;  %v495_v26 = vshll.u32 %v4492_v42, 16  ;;  %v475_v29 = vrot.slane %v474_v8, 4 }
  0x3b   : > { %v484_v35 = vor.u32 %v483_v17, %v479_v50  ;;  %v1250_v11 = vsel %vm4501_vm6, %v3288_v3, %v1249_v20  ;;  %v1251_v13 = vrot.slane %v1249_v20, 4  ;;  %v466_v36 = vsel %vm4317_vm3, %v461_v18, %v465_v45  ;;  %v4533_v0 = vld [vmem:[%s4284_s28 + $0x78] sm:$0xf]  ;;  %v4549_v20 = vld [vmem:[%s4284_s28 + $0x7c] sm:$0xf] }
  0x3c   : > { %v494_v41 = vrot.slane %v492_v24, 4  ;;  %v497_v2 = vrot.slane %v495_v26, 5  ;;  %v501_v46 = vshll.u32 %v4506_v1, 16  ;;  %v4524_v47 = vcombine.low %v456_v54, %v466_v36 }
  0x3d   : > { %v480_v49 = vsel %vm4317_vm3, %v475_v29, %v479_v50  ;;  %v485_v52 = vrot.slane %v484_v35, 4  ;;  %v1253_v58 = vsel %vm4501_vm6, %v1251_v13, %v1252_v39  ;;  %v505_v3 = vshrl.u32 %v4506_v1, 16  ;;  %v4554_v29 = vld [vmem:[%s4284_s28 + $0x80] sm:$0x1] }
  0x3e   : > { %5301 = vst [vmem:[#allocation8_spill] sm:$0xff] %v4524_v47  ;;  %v4535_v45 = vcombine.low %v1250_v11, %v1253_v58  ;;  %v498_v8 = vor.u32 %v497_v2, %v494_v41  ;;  %v503_v17 = vrot.slane %v501_v46, 5  ;;  %3766 = vmatprep.mubr.msk.bf16.mxu0 %vm716_vm2, %v4524_v47  ;;  %3631 = vmatmul.mubr.msk.bf16.gmra.mrb[12].mxu1 %vm716_vm2, %v4524_v47  ;;  %v511_v39 = vshll.u32 %v4515_v22, 16  ;;  %v4580_v58 = vld [vmem:[%s4284_s28 + $0x84] sm:$0xf] }
  0x3f   : > { %v490_v14 = vsel %vm4317_vm3, %v485_v52, %v489_v21  ;;  %v3289_v50 = vrot.slane %v4313_v27, 9  ;;  %v1258_v54 = vrot.slane %v1256_v59, 4  ;;  %v507_v26 = vrot.slane %v505_v3, 4  ;;  %v4651_v47 = vld [vmem:[%s4284_s28 + $0x9c] sm:$0xf] }
  0x40   : > { %5302 = vst [vmem:[#allocation9_spill] sm:$0xff] %v4535_v45  ;;  %v4551_v18 = vcombine.low %v480_v49, %v490_v14  ;;  %v499_v24 = vrot.slane %v498_v8, 4  ;;  %v516_v35 = vshrl.u32 %v4533_v0, 16  ;;  %v513_v11 = vrot.slane %v511_v39, 5 }
  0x41   : > { %v1257_v21 = vsel %vm4501_vm6, %v3289_v50, %v1256_v59  ;;  %v1260_v13 = vsel %vm4501_vm6, %v1258_v54, %v1259_v60  ;;  %v519_v36 = vshll.u32 %v4533_v0, 16  ;;  %v508_v2 = vor.u32 %v507_v26, %v503_v17  ;;  %v4586_v26 = vld [vmem:[%s4284_s28 + $0x88] sm:$0xf] }
  0x42   : > { %5303 = vst [vmem:[#allocation10_spill] sm:$0xff] %v4551_v18  ;;  %3767 = vmatmul.mubr.msk.bf16.gmra.mrb[12].mxu0 %vm716_vm2, %v4551_v18  ;;  %3634 = vmatprep.mubr.msk.bf16.mxu1 %vm716_vm2, %v4551_v18  ;;  %v504_v41 = vsel %vm4317_vm3, %v499_v24, %v503_v17  ;;  %v4572_v46 = vcombine.low %v1257_v21, %v1260_v13  ;;  %v518_v59 = vrot.slane %v516_v35, 4  ;;  %v525_v60 = vshll.u32 %v4549_v20, 16 }
  0x43   : > { %3788 = vmatprep.mubr.msk.bf16.mxu0 %vm716_vm2, %v4535_v45  ;;  %v521_v40 = vrot.slane %v519_v36, 5  ;;  %v529_v49 = vshrl.u32 %v4549_v20, 16  ;;  %v535_v52 = vshll.u32 %v4554_v29, 16  ;;  %v509_v8 = vrot.slane %v508_v2, 4 }
  0x44   : > { %5304 = vst [vmem:[#allocation11_spill] sm:$0xff] %v4572_v46  ;;  %v3290_v17 = vrot.slane %v4340_v51, 9  ;;  %v1263_v3 = vrot.slane %v4345_v56, 5  ;;  %v1266_v14 = vrot.slane %v4353_v61, 5  ;;  %v527_v50 = vrot.slane %v525_v60, 5 }
  0x45   : > { %v522_v39 = vor.u32 %v521_v40, %v518_v59  ;;  %v531_v54 = vrot.slane %v529_v49, 4  ;;  %v537_v24 = vrot.slane %v535_v52, 5  ;;  %v514_v35 = vsel %vm4317_vm3, %v509_v8, %v513_v11  ;;  %v4596_v59 = vld [vmem:[%s4284_s28 + $0x8c] sm:$0x1]  ;;  %v4606_v8 = vld [vmem:[%s5257_s1 + $0x38] sm:$0xff]  }
  0x46   : > { %v1264_v21 = vsel %vm4501_vm6, %v3290_v17, %v1263_v3  ;;  %v1265_v13 = vrot.slane %v1263_v3, 4  ;;  %v540_v36 = vshrl.u32 %v4580_v58, 16  ;;  %v4593_v2 = vcombine.low %v504_v41, %v514_v35  ;;  %5306 = vst [vmem:[#allocation13_spill] sm:$0xff] %v4606_v8 }
  0x47   : > { %v523_v18 = vrot.slane %v522_v39, 4  ;;  %v532_v61 = vor.u32 %v531_v54, %v527_v50  ;;  %v543_v40 = vshll.u32 %v4580_v58, 16  ;;  %v549_v11 = vshll.u32 %v4586_v26, 16  ;;  %v4615_v39 = vld [vmem:[%s4284_s28 + $0x90] sm:$0xf] }
  0x48   : > { %5305 = vst [vmem:[#allocation12_spill] sm:$0xff] %v4593_v2  ;;  %v1267_v60 = vsel %vm4501_vm6, %v1265_v13, %v1266_v14  ;;  %v542_v49 = vrot.slane %v540_v36, 4  ;;  %v553_v52 = vshrl.u32 %v4586_v26, 16  ;;  %3635 = vmatmul.mubr.msk.bf16.gmra.mrb[16].mxu1 %vm716_vm2, %v4593_v2  ;;  %v559_v13 = vshll.u32 %v4596_v59, 16  ;;  %v4634_v2 = vld [vmem:[%s4284_s28 + $0x98] sm:$0x1] }
  0x49   : > { %v528_v41 = vsel %vm4317_vm3, %v523_v18, %v527_v50  ;;  %v533_v17 = vrot.slane %v532_v61, 4  ;;  %v4612_v3 = vcombine.low %v1264_v21, %v1267_v60  ;;  %v545_v14 = vrot.slane %v543_v40, 5  ;;  %v4629_v40 = vld [vmem:[%s4284_s28 + $0x94] sm:$0xf] }
  0x4a   : > { %3789 = vmatmul.mubr.msk.bf16.vlgmr.msra.gmra.mrb[0].mxu0 %vm716_vm2, %v4572_v46  ;;  %v551_v54 = vrot.slane %v549_v11, 5  ;;  %v555_v35 = vrot.slane %v553_v52, 4  ;;  %v3291_v36 = vrot.slane %v4359_v6, 9  ;;  %v1270_v21 = vrot.slane %v4371_v19, 5 }
  0x4b   : > { %5307 = vst [vmem:[#allocation14_spill] sm:$0xff] %v4612_v3  ;;  %3821 = vmatpush3.bf16.msra.mxu0 %v4400_v48  ;;  %v538_v18 = vsel %vm4317_vm3, %v533_v17, %v537_v24  ;;  %3792 = vmatprep.mubr.msk.bf16.mxu0 %vm716_vm2, %v4612_v3  ;;  %v546_v50 = vor.u32 %v545_v14, %v542_v49  ;;  %v1273_v61 = vrot.slane %v4378_v23, 5  ;;  %v561_v52 = vrot.slane %v559_v13, 5 }
  0x4c   : > { %v4631_v60 = vcombine.low %v528_v41, %v538_v18  ;;  %v556_v11 = vor.u32 %v555_v35, %v551_v54  ;;  %v564_v48 = vshrl.u32 %v4615_v39, 16  ;;  %3854 = vmatprep.subr.bf16.mxu0 %v4606_v8  ;;  %v1271_v49 = vsel %vm4501_vm6, %v3291_v36, %v1270_v21 }
  0x4d   : > { %v547_v24 = vrot.slane %v546_v50, 4  ;;  %v1272_v17 = vrot.slane %v1270_v21, 4  ;;  %v567_v23 = vshll.u32 %v4615_v39, 16  ;;  %v573_v35 = vshll.u32 %v4629_v40, 16 }
  0x4e   : > { %5308 = vst [vmem:[#allocation15_spill] sm:$0xff] %v4631_v60  ;;  %3638 = vmatprep.mubr.msk.bf16.mxu1 %vm716_vm2, %v4631_v60  ;;  %v557_v41 = vrot.slane %v556_v11, 4  ;;  %v566_v14 = vrot.slane %v564_v48, 4  ;;  %v577_v13 = vshrl.u32 %v4629_v40, 16  ;;  %v583_v21 = vshll.u32 %v4634_v2, 16 }
  0x4f   : > { %v552_v18 = vsel %vm4317_vm3, %v547_v24, %v551_v54  ;;  %v1274_v50 = vsel %vm4501_vm6, %v1272_v17, %v1273_v61  ;;  %v569_v36 = vrot.slane %v567_v23, 5  ;;  %v575_v48 = vrot.slane %v573_v35, 5 }
  0x50   : > { %v562_v60 = vsel %vm4317_vm3, %v557_v41, %v561_v52  ;;  %v4655_v11 = vcombine.low %v1271_v49, %v1274_v50  ;;  %v579_v53 = vrot.slane %v577_v13, 4  ;;  %v585_v24 = vrot.slane %v583_v21, 5  ;;  %v4671_v41 = vld [vmem:[%s4284_s28 + $0xa4] sm:$0x1] }
  0x51   : > { %v4660_v31 = vcombine.low %v552_v18, %v562_v60  ;;  %v570_v54 = vor.u32 %v569_v36, %v566_v14  ;;  %v3292_v61 = vrot.slane %v4386_v37, 9  ;;  %v1277_v23 = vrot.slane %v4393_v43, 5 }
  0x52   : > { %5309 = vst [vmem:[#allocation16_spill] sm:$0xff] %v4655_v11  ;;  %3793 = vmatmul.mubr.msk.bf16.gmra.mrb[4].mxu0 %vm716_vm2, %v4655_v11  ;;  %v580_v17 = vor.u32 %v579_v53, %v575_v48  ;;  %v1280_v52 = vrot.slane %v4410_v57, 5  ;;  %v588_v49 = vshrl.u32 %v4651_v47, 16  ;;  %v591_v14 = vshll.u32 %v4651_v47, 16 }
  0x53   : > { %5310 = vst [vmem:[#allocation17_spill] sm:$0xff] %v4660_v31  ;;  %3639 = vmatmul.mubr.msk.bf16.gmra.mrb[20].mxu1 %vm716_vm2, %v4660_v31  ;;  %v571_v60 = vrot.slane %v570_v54, 4  ;;  %v597_v35 = vshll.u32 %v4658_v16, 16  ;;  %v601_v53 = vshrl.u32 %v4658_v16, 16  ;;  %v1278_v57 = vsel %vm4501_vm6, %v3292_v61, %v1277_v23 }
  0x54   : > { %v581_v13 = vrot.slane %v580_v17, 4  ;;  %v1279_v18 = vrot.slane %v1277_v23, 4  ;;  %v590_v50 = vrot.slane %v588_v49, 4  ;;  %v593_v21 = vrot.slane %v591_v14, 5  ;;  %v4690_v23 = vld [vmem:[%s4284_s28 + $0xac] sm:$0xf] }
  0x55   : > { %v576_v36 = vsel %vm4317_vm3, %v571_v60, %v575_v48  ;;  %v599_v54 = vrot.slane %v597_v35, 5  ;;  %v603_v31 = vrot.slane %v601_v53, 4  ;;  %v607_v17 = vshll.u32 %v4671_v41, 16 }
  0x56   : > { %v586_v44 = vsel %vm4317_vm3, %v581_v13, %v585_v24  ;;  %v1281_v11 = vsel %vm4501_vm6, %v1279_v18, %v1280_v52  ;;  %v3293_v61 = vrot.slane %v4415_v63, 9  ;;  %v594_v60 = vor.u32 %v593_v21, %v590_v50 }
  0x57   : > { %v4692_v49 = vcombine.low %v576_v36, %v586_v44  ;;  %v4694_v48 = vcombine.low %v1278_v57, %v1281_v11  ;;  %v604_v14 = vor.u32 %v603_v31, %v599_v54  ;;  %v609_v35 = vrot.slane %v607_v17, 5  ;;  %v4704_v11 = vld [vmem:[%s4284_s28 + $0xb0] sm:$0x1] }
  0x58   : > { %v1284_v53 = vrot.slane %v4422_v9, 5  ;;  %v1287_v24 = vrot.slane %v4438_v25, 5  ;;  %v612_v52 = vshrl.u32 %v4681_v10, 16  ;;  %v595_v44 = vrot.slane %v594_v60, 4 }
  0x59   : > { %5311 = vst [vmem:[#allocation18_spill] sm:$0xff] %v4692_v49  ;;  %5312 = vst [vmem:[#allocation19_spill] sm:$0xff] %v4694_v48  ;;  %3642 = vmatprep.mubr.msk.bf16.mxu1 %vm716_vm2, %v4692_v49  ;;  %3796 = vmatprep.mubr.msk.bf16.mxu0 %vm716_vm2, %v4694_v48  ;;  %v605_v13 = vrot.slane %v604_v14, 4  ;;  %v615_v31 = vshll.u32 %v4681_v10, 16  ;;  %v621_v57 = vshll.u32 %v4690_v23, 16  ;;  %v625_v36 = vshrl.u32 %v4690_v23, 16 }
  0x5a   : > { %v1285_v25 = vsel %vm4501_vm6, %v3293_v61, %v1284_v53  ;;  %v1286_v18 = vrot.slane %v1284_v53, 4  ;;  %v614_v50 = vrot.slane %v612_v52, 4  ;;  %v600_v21 = vsel %vm4317_vm3, %v595_v44, %v599_v54  ;;  %v4716_v49 = vld [vmem:[%s4284_s28 + $0xb4] sm:$0xf]  ;;  %v4728_v44 = vld [vmem:[%s4284_s28 + $0xb8] sm:$0xf] }
  0x5b   : > { %v610_v17 = vsel %vm4317_vm3, %v605_v13, %v609_v35  ;;  %v617_v60 = vrot.slane %v615_v31, 5  ;;  %v623_v14 = vrot.slane %v621_v57, 5  ;;  %v627_v53 = vrot.slane %v625_v36, 4 }
  0x5c   : > { %v4718_v48 = vcombine.low %v600_v21, %v610_v17  ;;  %v1288_v61 = vsel %vm4501_vm6, %v1286_v18, %v1287_v24  ;;  %v631_v52 = vshll.u32 %v4704_v11, 16  ;;  %v3294_v54 = vrot.slane %v4443_v30, 9  ;;  %v4734_v24 = vld [vmem:[%s4284_s28 + $0xbc] sm:$0x1] }
  0x5d   : > { %v4723_v3 = vcombine.low %v1285_v25, %v1288_v61  ;;  %v618_v46 = vor.u32 %v617_v60, %v614_v50  ;;  %v1291_v35 = vrot.slane %v4448_v38, 5  ;;  %v628_v13 = vor.u32 %v627_v53, %v623_v14 }
  0x5e   : > { %5313 = vst [vmem:[#allocation20_spill] sm:$0xff] %v4718_v48  ;;  %3643 = vmatmul.mubr.msk.bf16.gmra.mrb[24].mxu1 %vm716_vm2, %v4718_v48  ;;  %v633_v31 = vrot.slane %v631_v52, 5  ;;  %v1294_v57 = vrot.slane %v4461_v55, 5  ;;  %v636_v18 = vshrl.u32 %v4716_v49, 16  ;;  %v639_v21 = vshll.u32 %v4716_v49, 16 }
  0x5f   : > { %5314 = vst [vmem:[#allocation21_spill] sm:$0xff] %v4723_v3  ;;  %3797 = vmatmul.mubr.msk.bf16.gmra.mrb[8].mxu0 %vm716_vm2, %v4723_v3  ;;  %v619_v25 = vrot.slane %v618_v46, 4  ;;  %v1292_v50 = vsel %vm4501_vm6, %v3294_v54, %v1291_v35  ;;  %v1293_v36 = vrot.slane %v1291_v35, 4  ;;  %v629_v17 = vrot.slane %v628_v13, 4 }
  0x60   : > { %v638_v60 = vrot.slane %v636_v18, 4  ;;  %v645_v61 = vshll.u32 %v4728_v44, 16  ;;  %v649_v55 = vshrl.u32 %v4728_v44, 16  ;;  %v641_v48 = vrot.slane %v639_v21, 5 }
  0x61   : > { %v624_v53 = vsel %vm4317_vm3, %v619_v25, %v623_v14  ;;  %v1295_v52 = vsel %vm4501_vm6, %v1293_v36, %v1294_v57  ;;  %v655_v46 = vshll.u32 %v4734_v24, 16  ;;  %v634_v54 = vsel %vm4317_vm3, %v629_v17, %v633_v31 }
  0x62   : > { %v4751_v35 = vcombine.low %v1292_v50, %v1295_v52  ;;  %v647_v13 = vrot.slane %v645_v61, 5  ;;  %v651_v18 = vrot.slane %v649_v55, 4  ;;  %v4753_v3 = vcombine.low %v624_v53, %v634_v54 }
  0x63   : > { %v642_v45 = vor.u32 %v641_v48, %v638_v60  ;;  %v657_v8 = vrot.slane %v655_v46, 5  ;;  %v3295_v30 = vrot.slane %v4465_v62, 9  ;;  %v1298_v57 = vrot.slane %v4470_v15, 5 }
  0x64   : > { %3800 = vmatprep.mubr.msk.bf16.mxu0 %vm716_vm2, %v4751_v35  ;;  %v652_v14 = vor.u32 %v651_v18, %v647_v13  ;;  %v1301_v25 = vrot.slane %v4484_v34, 5  ;;  %v3296_v31 = vrot.slane %v4492_v42, 9  ;;  %3646 = vmatprep.mubr.msk.bf16.mxu1 %vm716_vm2, %v4753_v3  ;;  %v3254_v48 = vcombine.low %v4288_v4, %v4291_v5 }
  0x65   : > { %v643_v50 = vrot.slane %v642_v45, 4  ;;  %v1305_v36 = vrot.slane %v4506_v1, 5  ;;  %v1308_v21 = vrot.slane %v4515_v22, 5  ;;  %v1299_v60 = vsel %vm4501_vm6, %v3295_v30, %v1298_v57 }
  0x66   : > { %v653_v17 = vrot.slane %v652_v14, 4  ;;  %v1300_v61 = vrot.slane %v1298_v57, 4  ;;  %v1312_v34 = vrot.slane %v4549_v20, 5  ;;  %v3297_v4 = vrot.slane %v4533_v0, 9 }
  0x67   : > { %v648_v55 = vsel %vm4317_vm3, %v643_v50, %v647_v13  ;;  %v1306_v45 = vsel %vm4501_vm6, %v3296_v31, %v1305_v36  ;;  %v1307_v53 = vrot.slane %v1305_v36, 4  ;;  %v1315_v30 = vrot.slane %v4554_v29, 5 }
  0x68   : > { %v658_v5 = vsel %vm4317_vm3, %v653_v17, %v657_v8  ;;  %v1302_v22 = vsel %vm4501_vm6, %v1300_v61, %v1301_v25  ;;  %v1314_v52 = vrot.slane %v1312_v34, 4  ;;  %v3298_v14 = vrot.slane %v4580_v58, 9 }
  0x69   : > { %v4780_v46 = vcombine.low %v648_v55, %v658_v5  ;;  %v4782_v54 = vcombine.low %v1299_v60, %v1302_v22  ;;  %v1309_v13 = vsel %vm4501_vm6, %v1307_v53, %v1308_v21  ;;  %v1319_v57 = vrot.slane %v4586_v26, 5  ;;  %v4824_v22 = vld [vmem:[%s5257_s1 + $0x18] sm:$0xff]  }
  0x6a   : > { %v4786_v18 = vcombine.low %v1306_v45, %v1309_v13  ;;  %v1322_v29 = vrot.slane %v4596_v59, 5  ;;  %v1313_v8 = vsel %vm4501_vm6, %v3297_v4, %v1312_v34  ;;  %v1316_v25 = vsel %vm4501_vm6, %v1314_v52, %v1315_v30 }
  0x6b   : > { %3647 = vmatmul.mubr.msk.bf16.gmra.mrb[28].mxu1 %vm716_vm2, %v4780_v46  ;;  %3801 = vmatmul.mubr.msk.bf16.gmra.mrb[12].mxu0 %vm716_vm2, %v4782_v54  ;;  %v1321_v31 = vrot.slane %v1319_v57, 4  ;;  %v1326_v50 = vrot.slane %v4629_v40, 5  ;;  %v1333_v36 = vrot.slane %v4658_v16, 5  ;;  %v1320_v21 = vsel %vm4501_vm6, %v3298_v14, %v1319_v57 }
  0x6c   : > { %3652 = vmatprep.mubr.msk.bf16.mxu1 %vm716_vm2, %v3254_v48  ;;  %3804 = vmatprep.mubr.msk.bf16.mxu0 %vm716_vm2, %v4786_v18  ;;  %v4808_v48 = vcombine.low %v1313_v8, %v1316_v25  ;;  %v3299_v17 = vrot.slane %v4615_v39, 9  ;;  %v1329_v61 = vrot.slane %v4634_v2, 5  ;;  %v4814_v34 = vcombine.low %v4313_v27, %v4326_v33 }
  0x6d   : > { %v1323_v59 = vsel %vm4501_vm6, %v1321_v31, %v1322_v29  ;;  %v1328_v60 = vrot.slane %v1326_v50, 4  ;;  %v3300_v55 = vrot.slane %v4651_v47, 9  ;;  %v1335_v53 = vrot.slane %v1333_v36, 4 }
  0x6e   : > { %v4817_v45 = vcombine.low %v1320_v21, %v1323_v59  ;;  %v1336_v4 = vrot.slane %v4671_v41, 5  ;;  %v1340_v5 = vrot.slane %v4690_v23, 5  ;;  %v1327_v27 = vsel %vm4501_vm6, %v3299_v17, %v1326_v50 }
  0x6f   : > { %v1330_v33 = vsel %vm4501_vm6, %v1328_v60, %v1329_v61  ;;  %v4839_v2 = vcombine.low %v4340_v51, %v4345_v56  ;;  %v1334_v41 = vsel %vm4501_vm6, %v3300_v55, %v1333_v36  ;;  %v3301_v52 = vrot.slane %v4681_v10, 9 }
  0x70   : > { %v4846_v30 = vcombine.low %v4465_v62, %v4470_v15  ;;  %v1347_v13 = vrot.slane %v4728_v44, 5  ;;  %v4855_v51 = vcombine.low %v4492_v42, %v4506_v1  ;;  %v4859_v56 = vcombine.low %v4533_v0, %v4549_v20 }
  0x71   : > { %v4861_v14 = vcombine.low %v1327_v27, %v1330_v33  ;;  %v1342_v62 = vrot.slane %v1340_v5, 4  ;;  %v1343_v15 = vrot.slane %v4704_v11, 5  ;;  %v4866_v57 = vcombine.low %v4580_v58, %v4586_v26  ;;  %v4914_v11 = vld [vmem:[%s4284_s28 + $0xc0] sm:$0xf] }
  0x72   : > { %v4871_v42 = vcombine.low %v4615_v39, %v4629_v40  ;;  %v4875_v1 = vcombine.low %v4651_v47, %v4658_v16  ;;  %v4879_v0 = vcombine.low %v4681_v10, %v4690_v23  ;;  %v4883_v20 = vcombine.low %v4716_v49, %v4728_v44  ;;  %v4894_v40 = vld [vmem:[%s4284_s28 + $0xc4] sm:$0xf]  ;;  %v266_v44 = vld [vmem:[%s4284_s28 + $0xc8] sm:$0x1] }
  0x73   : > { %3653 = vmatmul.mubr.msk.bf16.vlgmr.msra.gmra.mrb[0].mxu1 %vm716_vm2, %v4323_v32  ;;  %3805 = vmatmul.mubr.msk.bf16.gmra.mrb[16].mxu0 %vm716_vm2, %v4808_v48  ;;  %v4887_v58 = vcombine.low %v4359_v6, %v4371_v19  ;;  %v3302_v39 = vrot.slane %v4716_v49, 9  ;;  %v1349_v16 = vrot.slane %v1347_v13, 4  ;;  %v1350_v47 = vrot.slane %v4734_v24, 5 }
  0x74   : > { %3685 = vmatpush3.bf16.msra.mxu1 %v4366_v12  ;;  %3656 = vmatprep.mubr.msk.bf16.mxu1 %vm716_vm2, %v4814_v34  ;;  %v1337_v12 = vsel %vm4501_vm6, %v1335_v53, %v1336_v4  ;;  %v1341_v6 = vsel %vm4501_vm6, %v3301_v52, %v1340_v5  ;;  %v1344_v19 = vsel %vm4501_vm6, %v1342_v62, %v1343_v15  ;;  %v2095_v10 = vrot.slane %v4894_v40, 5  ;;  %v5315_v52 = vld [vmem:[#allocation4_spill] sm:$0xff] }
  0x75   : > { %3808 = vmatprep.mubr.msk.bf16.mxu0 %vm716_vm2, %v4817_v45  ;;  %3718 = vmatprep.subr.bf16.mxu1 %v4824_v22  ;;  %v4889_v26 = vcombine.low %v1334_v41, %v1337_v12  ;;  %v1348_v23 = vsel %vm4501_vm6, %v3302_v39, %v1347_v13  ;;  %v1351_v49 = vsel %vm4501_vm6, %v1349_v16, %v1350_v47  ;;  %v1861_v25 = vshrl.u32 %v4914_v11, 16  ;;  %v5316_v16 = vld [vmem:[#allocation13_spill] sm:$0xff]  ;;  %v4216_v47 = vld [vmem:[%s4284_s28 + $0x4] sm:$0xf] }
  0x76   : > { %v4919_v24 = vcombine.low %v4386_v37, %v4393_v43  ;;  %v4921_v29 = vcombine.low %v1341_v6, %v1344_v19  ;;  %v4925_v8 = vcombine.low %v4415_v63, %v4422_v9  ;;  %v1864_v31 = vshll.u32 %v4914_v11, 16  ;;  %v4217_v19 = vld [vmem:[%s4284_s28 + $0x8] sm:$0x1] }
  0x77   : > { %v1870_v50 = vshll.u32 %v4894_v40, 16  ;;  %v1874_v36 = vshrl.u32 %v4894_v40, 16  ;;  %v4931_v21 = vcombine.low %v1348_v23, %v1351_v49  ;;  %v3378_v59 = vrot.slane %v4914_v11, 9  ;;  %v4218_v23 = vld [vmem:[%s4284_s28] sm:$0xf] }
  0x78   : > { %v2097_v37 = vrot.slane %v2095_v10, 4  ;;  %v2098_v43 = vrot.slane %v266_v44, 5  ;;  %v1863_v17 = vrot.slane %v1861_v25, 4  ;;  %v1866_v60 = vrot.slane %v1864_v31, 5 }
  0x79   : > { %v1872_v61 = vrot.slane %v1870_v50, 5  ;;  %v1876_v55 = vrot.slane %v1874_v36, 4  ;;  %v1880_v53 = vshll.u32 %v266_v44, 16  ;;  %v2096_v4 = vsel %vm4501_vm6, %v3378_v59, %v2095_v10  ;;  %v5317_v36 = vld [vmem:[#allocation9_spill] sm:$0xff]  ;;  %v5318_v59 = vld [vmem:[#allocation11_spill] sm:$0xff] }
  0x7a   : > { %v1867_v63 = vor.u32 %v1866_v60, %v1863_v17  ;;  %v2099_v5 = vsel %vm4501_vm6, %v2097_v37, %v2098_v43  ;;  %v4948_v12 = vcombine.low %v5315_v52, %v4448_v38  ;;  %v4215_v38 = vld [vmem:[%s5257_s1 + $0x40] sm:$0xff]   ;;  %v1242_v6 = vrot.slane %v4216_v47, 5  ;;  %v5320_v17 = vld [vmem:[#allocation16_spill] sm:$0xff]  ;;  %v5321_v60 = vld [vmem:[#allocation19_spill] sm:$0xff] }
  0x7b   : > { %3657 = vmatmul.mubr.msk.bf16.gmra.mrb[4].mxu1 %vm716_vm2, %v4839_v2  ;;  %3809 = vmatmul.mubr.msk.bf16.gmra.mrb[20].mxu0 %vm716_vm2, %v4861_v14  ;;  %v1877_v9 = vor.u32 %v1876_v55, %v1872_v61  ;;  %v1882_v41 = vrot.slane %v1880_v53, 5  ;;  %v4950_v13 = vcombine.low %v2096_v4, %v2099_v5  ;;  %v1245_v10 = vrot.slane %v4217_v19, 5  ;;  %v4219_v37 = vld [vmem:[%s5257_s1 + $0x20] sm:$0xff]   ;;  %v5041_v55 = vld [vmem:[%s4284_s28 + $0xcc] sm:$0xf]  ;;  %v5325_v53 = vld [vmem:[#allocation5_spill] sm:$0xff] }
  0x7c   : > { %3660 = vmatprep.mubr.msk.bf16.mxu1 %vm716_vm2, %v4887_v58  ;;  %3812 = vmatprep.mubr.msk.bf16.mxu0 %vm716_vm2, %v4889_v26  ;;  %v1868_v27 = vrot.slane %v1867_v63, 4  ;;  %v3287_v49 = vrot.slane %v4218_v23, 9  ;;  %v1244_v44 = vrot.slane %v1242_v6, 4  ;;  %v5319_v43 = vld [vmem:[#allocation14_spill] sm:$0xff]  ;;  %v5044_v63 = vld [vmem:[%s4284_s28 + $0xd0] sm:$0xf] }
  0x7d   : > { %v1878_v33 = vrot.slane %v1877_v9, 4  ;;  %v5324_v9 = vld [vmem:[#allocation3_spill] sm:$0xff]  ;;  %v5326_v4 = vld [vmem:[#allocation6_spill] sm:$0xff]  ;;  %v269_v23 = vld [vmem:[%s4284_s28 + $0xd4] sm:$0x1]  ;;  %v2753_v28 = vrot.slane %v5044_v63, 5 }
  0x7e   : > { %v1873_v62 = vsel %vm4317_vm3, %v1868_v27, %v1872_v61  ;;  %v1243_v25 = vsel %vm4501_vm6, %v3287_v49, %v1242_v6  ;;  %v1246_v31 = vsel %vm4501_vm6, %v1244_v44, %v1245_v10  ;;  %v5322_v61 = vld [vmem:[#allocation21_spill] sm:$0xff]  ;;  %v5327_v5 = vld [vmem:[#allocation7_spill] sm:$0xff]  ;;  %v5328_v27 = vld [vmem:[#allocation8_spill] sm:$0xff] }
  0x7f   : > { %v1883_v15 = vsel %vm4317_vm3, %v1878_v33, %v1882_v41  ;;  %v3305_v50 = vcombine.low %v1243_v25, %v1246_v31  ;;  %v5329_v33 = vld [vmem:[#allocation10_spill] sm:$0xff]  ;;  %v5330_v41 = vld [vmem:[#allocation12_spill] sm:$0xff]  ;;  %v5331_v52 = vld [vmem:[#allocation15_spill] sm:$0xff]  ;;  %v2538_v25 = vshll.u32 %v269_v23, 16 }
  0x80   : > { %v4956_v39 = vcombine.low %v1873_v62, %v1883_v15  ;;  %v5332_v62 = vld [vmem:[#allocation17_spill] sm:$0xff]  ;;  %v2519_v15 = vshrl.u32 %v5041_v55, 16  ;;  %v5333_v47 = vld [vmem:[#allocation18_spill] sm:$0xff]  ;;  %v5334_v49 = vld [vmem:[#allocation20_spill] sm:$0xff] }
  0x82   : > { %v2521_v6 = vrot.slane %v2519_v15, 4 }
  0x83   : > { %3661 = vmatmul.mubr.msk.bf16.gmra.mrb[8].mxu1 %vm716_vm2, %v4919_v24  ;;  %3813 = vmatmul.mubr.msk.bf16.gmra.mrb[24].mxu0 %vm716_vm2, %v4921_v29 }
  0x84   : > { %3664 = vmatprep.mubr.msk.bf16.mxu1 %vm716_vm2, %v4925_v8  ;;  %3816 = vmatprep.mubr.msk.bf16.mxu0 %vm716_vm2, %v4931_v21 }
  0x8b   : > { %3665 = vmatmul.mubr.msk.bf16.gmra.mrb[12].mxu1 %vm716_vm2, %v4948_v12  ;;  %3817 = vmatmul.mubr.msk.bf16.gmra.mrb[28].mxu0 %vm716_vm2, %v4950_v13 }
  0x8c   : > { %3668 = vmatprep.mubr.msk.bf16.mxu1 %vm716_vm2, %v4846_v30  ;;  %3822 = vmatprep.mubr.msk.bf16.mxu0 %vm716_vm2, %v4814_v34 }
  0x93   : > { %3669 = vmatmul.mubr.msk.bf16.gmra.mrb[16].mxu1 %vm716_vm2, %v4855_v51  ;;  %3823 = vmatmul.mubr.msk.bf16.vlgmr.msra.gmra.mrb[0].mxu0 %vm716_vm2, %v4839_v2 }
  0x94   : > { %3855 = vmatpush3.bf16.msra.mxu0 %v5316_v16  ;;  %3672 = vmatprep.mubr.msk.bf16.mxu1 %vm716_vm2, %v4859_v56  ;;  %v2532_v16 = vshrl.u32 %v5044_v63, 16 }
  0x95   : > { %3826 = vmatprep.mubr.msk.bf16.mxu0 %vm716_vm2, %v4887_v58  ;;  %3888 = vmatprep.subr.bf16.mxu0 %v4215_v38 }
  0x96   : > { %v2534_v10 = vrot.slane %v2532_v16, 4 }
  0x9b   : > { %3673 = vmatmul.mubr.msk.bf16.gmra.mrb[20].mxu1 %vm716_vm2, %v4866_v57  ;;  %3827 = vmatmul.mubr.msk.bf16.gmra.mrb[4].mxu0 %vm716_vm2, %v4919_v24 }
  0x9c   : > { %3676 = vmatprep.mubr.msk.bf16.mxu1 %vm716_vm2, %v4871_v42  ;;  %3830 = vmatprep.mubr.msk.bf16.mxu0 %vm716_vm2, %v4925_v8 }
  0xa3   : > { %3677 = vmatmul.mubr.msk.bf16.gmra.mrb[24].mxu1 %vm716_vm2, %v4875_v1  ;;  %3831 = vmatmul.mubr.msk.bf16.gmra.mrb[8].mxu0 %vm716_vm2, %v4948_v12 }
  0xa4   : > { %3680 = vmatprep.mubr.msk.bf16.mxu1 %vm716_vm2, %v4879_v0  ;;  %3834 = vmatprep.mubr.msk.bf16.mxu0 %vm716_vm2, %v4846_v30 }
  0xab   : > { %3681 = vmatmul.mubr.msk.bf16.gmra.mrb[28].mxu1 %vm716_vm2, %v4883_v20  ;;  %3835 = vmatmul.mubr.msk.bf16.gmra.mrb[12].mxu0 %vm716_vm2, %v4855_v51 }
  0xac   : > { %3686 = vmatprep.mubr.msk.bf16.mxu1 %vm716_vm2, %v3305_v50  ;;  %3838 = vmatprep.mubr.msk.bf16.mxu0 %vm716_vm2, %v4859_v56 }
  0xb3   : > { %3687 = vmatmul.mubr.msk.bf16.vlgmr.msra.gmra.mrb[0].mxu1 %vm716_vm2, %v5317_v36  ;;  %3839 = vmatmul.mubr.msk.bf16.gmra.mrb[16].mxu0 %vm716_vm2, %v4866_v57  ;;  %v2540_v36 = vrot.slane %v2538_v25, 5 }
  0xb4   : > { %3719 = vmatpush3.bf16.msra.mxu1 %v4824_v22  ;;  %3690 = vmatprep.mubr.msk.bf16.mxu1 %vm716_vm2, %v5318_v59  ;;  %v5030_v22 = vcombine.low %v4914_v11, %v4894_v40  ;;  %v3401_v40 = vcombine.low %v5041_v55, %v5044_v63  ;;  %v5323_v11 = vld [vmem:[#allocation2_spill] sm:$0xff] }
  0xb5   : > { %3842 = vmatprep.mubr.msk.bf16.mxu0 %vm716_vm2, %v4871_v42  ;;  %3922 = vmatprep.subr.bf16.mxu1 %v4219_v37 }
  0xbb   : > { %3691 = vmatmul.mubr.msk.bf16.gmra.mrb[4].mxu1 %vm716_vm2, %v5319_v43  ;;  %3843 = vmatmul.mubr.msk.bf16.gmra.mrb[20].mxu0 %vm716_vm2, %v4875_v1 }
  0xbc   : > { %3694 = vmatprep.mubr.msk.bf16.mxu1 %vm716_vm2, %v5320_v17  ;;  %3846 = vmatprep.mubr.msk.bf16.mxu0 %vm716_vm2, %v4879_v0 }
  0xc3   : > { %3695 = vmatmul.mubr.msk.bf16.gmra.mrb[8].mxu1 %vm716_vm2, %v5321_v60  ;;  %3847 = vmatmul.mubr.msk.bf16.gmra.mrb[24].mxu0 %vm716_vm2, %v4883_v20 }
  0xc4   : > { %3698 = vmatprep.mubr.msk.bf16.mxu1 %vm716_vm2, %v5322_v61  ;;  %3850 = vmatprep.mubr.msk.bf16.mxu0 %vm716_vm2, %v5030_v22 }
  0xcb   : > { %3699 = vmatmul.mubr.msk.bf16.gmra.mrb[12].mxu1 %vm716_vm2, %v4751_v35  ;;  %3851 = vmatmul.mubr.msk.bf16.gmra.mrb[28].mxu0 %vm716_vm2, %v3401_v40 }
  0xcc   : > { %3702 = vmatprep.mubr.msk.bf16.mxu1 %vm716_vm2, %v4782_v54  ;;  %3856 = vmatprep.mubr.msk.bf16.mxu0 %vm716_vm2, %v5323_v11 }
  0xd3   : > { %3703 = vmatmul.mubr.msk.bf16.gmra.mrb[16].mxu1 %vm716_vm2, %v4786_v18  ;;  %3857 = vmatmul.mubr.msk.bf16.vlgmr.msra.gmra.mrb[0].mxu0 %vm716_vm2, %v5324_v9 }
  0xd4   : > { %3889 = vmatpush3.bf16.msra.mxu0 %v4215_v38  ;;  %3706 = vmatprep.mubr.msk.bf16.mxu1 %vm716_vm2, %v4808_v48  ;;  %v2522_v38 = vshll.u32 %v5041_v55, 16 }
  0xd5   : > { %3860 = vmatprep.mubr.msk.bf16.mxu0 %vm716_vm2, %v5325_v53 }
  0xdb   : > { %3707 = vmatmul.mubr.msk.bf16.gmra.mrb[20].mxu1 %vm716_vm2, %v4817_v45  ;;  %3861 = vmatmul.mubr.msk.bf16.gmra.mrb[4].mxu0 %vm716_vm2, %v5326_v4 }
  0xdc   : > { %3710 = vmatprep.mubr.msk.bf16.mxu1 %vm716_vm2, %v4861_v14  ;;  %3864 = vmatprep.mubr.msk.bf16.mxu0 %vm716_vm2, %v5327_v5 }
  0xe3   : > { %3711 = vmatmul.mubr.msk.bf16.gmra.mrb[24].mxu1 %vm716_vm2, %v4889_v26  ;;  %3865 = vmatmul.mubr.msk.bf16.gmra.mrb[8].mxu0 %vm716_vm2, %v5328_v27 }
  0xe4   : > { %3714 = vmatprep.mubr.msk.bf16.mxu1 %vm716_vm2, %v4921_v29  ;;  %3868 = vmatprep.mubr.msk.bf16.mxu0 %vm716_vm2, %v5329_v33 }
  0xeb   : > { %3715 = vmatmul.mubr.msk.bf16.gmra.mrb[28].mxu1 %vm716_vm2, %v4931_v21  ;;  %3869 = vmatmul.mubr.msk.bf16.gmra.mrb[12].mxu0 %vm716_vm2, %v5330_v41 }
  0xec   : > { %3720 = vmatprep.mubr.msk.bf16.mxu1 %vm716_vm2, %v4323_v32  ;;  %3872 = vmatprep.mubr.msk.bf16.mxu0 %vm716_vm2, %v5331_v52  ;;  %v2528_v32 = vshll.u32 %v5044_v63, 16 }
  0xee   : > { %v2530_v19 = vrot.slane %v2528_v32, 5 }
  0xf0   : > { %v2535_v44 = vor.u32 %v2534_v10, %v2530_v19 }
  0xf2   : > { %v2536_v50 = vrot.slane %v2535_v44, 4 }
  0xf3   : > { %3721 = vmatmul.mubr.msk.bf16.vlgmr.msra.gmra.mrb[0].mxu1 %vm716_vm2, %v4814_v34  ;;  %3873 = vmatmul.mubr.msk.bf16.gmra.mrb[16].mxu0 %vm716_vm2, %v5332_v62  ;;  %v2524_v34 = vrot.slane %v2522_v38, 5 }
  0xf4   : > { %3923 = vmatpush3.bf16.msra.mxu1 %v4219_v37  ;;  %3724 = vmatprep.mubr.msk.bf16.mxu1 %vm716_vm2, %v4839_v2 }
  0xf5   : > { %3876 = vmatprep.mubr.msk.bf16.mxu0 %vm716_vm2, %v5333_v47  ;;  %v2525_v2 = vor.u32 %v2524_v34, %v2521_v6 }
  0xf7   : > { %v2526_v31 = vrot.slane %v2525_v2, 4 }
  0xfb   : > { %3725 = vmatmul.mubr.msk.bf16.gmra.mrb[4].mxu1 %vm716_vm2, %v4887_v58  ;;  %3877 = vmatmul.mubr.msk.bf16.gmra.mrb[20].mxu0 %vm716_vm2, %v5334_v49  ;;  %v2531_v58 = vsel %vm4317_vm3, %v2526_v31, %v2530_v19 }
  0xfc   : > { %3728 = vmatprep.mubr.msk.bf16.mxu1 %vm716_vm2, %v4919_v24  ;;  %3880 = vmatprep.mubr.msk.bf16.mxu0 %vm716_vm2, %v4753_v3  ;;  %v2541_v24 = vsel %vm4317_vm3, %v2536_v50, %v2540_v36 }
  0xfd   : > { %v3421_v37 = vcombine.low %v2531_v58, %v2541_v24 }
 0x103   : > { %3729 = vmatmul.mubr.msk.bf16.gmra.mrb[8].mxu1 %vm716_vm2, %v4925_v8  ;;  %3881 = vmatmul.mubr.msk.bf16.gmra.mrb[24].mxu0 %vm716_vm2, %v4780_v46 }
 0x104   : > { %3732 = vmatprep.mubr.msk.bf16.mxu1 %vm716_vm2, %v4948_v12  ;;  %3884 = vmatprep.mubr.msk.bf16.mxu0 %vm716_vm2, %v4956_v39 }
 0x10b   : > { %3733 = vmatmul.mubr.msk.bf16.gmra.mrb[12].mxu1 %vm716_vm2, %v4846_v30  ;;  %3885 = vmatmul.mubr.msk.bf16.gmra.mrb[28].mxu0 %vm716_vm2, %v3421_v37 }
 0x10c   : > { %3736 = vmatprep.mubr.msk.bf16.mxu1 %vm716_vm2, %v4855_v51  ;;  %3890 = vmatprep.mubr.msk.bf16.mxu0 %vm716_vm2, %v5318_v59 }
 0x113   : > { %3737 = vmatmul.mubr.msk.bf16.gmra.mrb[16].mxu1 %vm716_vm2, %v4859_v56  ;;  %3891 = vmatmul.mubr.msk.bf16.vlgmr.msra.gmra.mrb[0].mxu0 %vm716_vm2, %v5319_v43 }
 0x114   : > { %3740 = vmatprep.mubr.msk.bf16.mxu1 %vm716_vm2, %v4866_v57  ;;  %3894 = vmatprep.mubr.msk.bf16.mxu0 %vm716_vm2, %v5320_v17 }
 0x11b   : > { %3741 = vmatmul.mubr.msk.bf16.gmra.mrb[20].mxu1 %vm716_vm2, %v4871_v42  ;;  %3895 = vmatmul.mubr.msk.bf16.gmra.mrb[4].mxu0 %vm716_vm2, %v5321_v60 }
 0x11c   : > { %3744 = vmatprep.mubr.msk.bf16.mxu1 %vm716_vm2, %v4875_v1  ;;  %3898 = vmatprep.mubr.msk.bf16.mxu0 %vm716_vm2, %v5322_v61 }
 0x123   : > { %3745 = vmatmul.mubr.msk.bf16.gmra.mrb[24].mxu1 %vm716_vm2, %v4879_v0  ;;  %3899 = vmatmul.mubr.msk.bf16.gmra.mrb[8].mxu0 %vm716_vm2, %v4751_v35  ;;  %v3439_v35 = vrot.slane %v5041_v55, 9 }
 0x124   : > { %3748 = vmatprep.mubr.msk.bf16.mxu1 %vm716_vm2, %v4883_v20  ;;  %3902 = vmatprep.mubr.msk.bf16.mxu0 %vm716_vm2, %v4782_v54  ;;  %v2755_v54 = vrot.slane %v2753_v28, 4 }
 0x12b   : > { %3749 = vmatmul.mubr.msk.bf16.gmra.mrb[28].mxu1 %vm716_vm2, %v5030_v22  ;;  %3903 = vmatmul.mubr.msk.bf16.gmra.mrb[12].mxu0 %vm716_vm2, %v4786_v18  ;;  %v2756_v18 = vrot.slane %v269_v23, 5 }
 0x12c   : > { %3770 = vmatprep.mubr.msk.bf16.mxu1 %vm716_vm2, %v5330_v41  ;;  %3906 = vmatprep.mubr.msk.bf16.mxu0 %vm716_vm2, %v4808_v48  ;;  %v2754_v48 = vsel %vm4501_vm6, %v3439_v35, %v2753_v28 }
 0x133   : > { %3771 = vmatmul.mubr.msk.bf16.vlgmr.msra.gmra.mrb[16].mxu1 %vm716_vm2, %v5331_v52  ;;  %3907 = vmatmul.mubr.msk.bf16.gmra.mrb[16].mxu0 %vm716_vm2, %v4817_v45  ;;  %v2757_v45 = vsel %vm4501_vm6, %v2755_v54, %v2756_v18 }
 0x134   : > { %3774 = vmatprep.mubr.msk.bf16.mxu1 %vm716_vm2, %v5332_v62  ;;  %3910 = vmatprep.mubr.msk.bf16.mxu0 %vm716_vm2, %v4861_v14  ;;  %v3442_v30 = vcombine.low %v2754_v48, %v2757_v45 }
 0x13b   : > { %3775 = vmatmul.mubr.msk.bf16.gmra.mrb[20].mxu1 %vm716_vm2, %v5333_v47  ;;  %3911 = vmatmul.mubr.msk.bf16.gmra.mrb[20].mxu0 %vm716_vm2, %v4889_v26 }
 0x13c   : > { %3778 = vmatprep.mubr.msk.bf16.mxu1 %vm716_vm2, %v5334_v49  ;;  %3914 = vmatprep.mubr.msk.bf16.mxu0 %vm716_vm2, %v4921_v29 }
 0x143   : > { %3779 = vmatmul.mubr.msk.bf16.gmra.mrb[24].mxu1 %vm716_vm2, %v4753_v3  ;;  %3915 = vmatmul.mubr.msk.bf16.gmra.mrb[24].mxu0 %vm716_vm2, %v4931_v21 }
 0x144   : > { %3782 = vmatprep.mubr.msk.bf16.mxu1 %vm716_vm2, %v4780_v46  ;;  %3918 = vmatprep.mubr.msk.bf16.mxu0 %vm716_vm2, %v4950_v13 }
 0x14b   : > { %3783 = vmatmul.mubr.msk.bf16.gmra.mrb[28].mxu1 %vm716_vm2, %v4956_v39  ;;  %3919 = vmatmul.mubr.msk.bf16.gmra.mrb[28].mxu0 %vm716_vm2, %v3442_v30 }
 0x1c6   : > { %v3722_v3 = vpop.f32.mrb[0].mxu1 }
 0x1c7   : > { %v1701_v51 = vpop.f32.mrb[1].mxu1 }
 0x1c8   : > { %v3723_v56 = vpop.f32.mrb[2].mxu1 }
 0x1c9   : > { %v1704_v46 = vpop.f32.mrb[3].mxu1 }
 0x1ce   : > { %v3726_v14 = vpop.f32.mrb[4].mxu1 }
 0x1cf   : > { %v1717_v57 = vpop.f32.mrb[5].mxu1 }
 0x1d0   : > { %v3727_v42 = vpop.f32.mrb[6].mxu1 }
 0x1d1   : > { %v1720_v1 = vpop.f32.mrb[7].mxu1 }
 0x1d6   : > { %v3730_v0 = vpop.f32.mrb[8].mxu1 }
 0x1d7   : > { %v1733_v20 = vpop.f32.mrb[9].mxu1 }
 0x1d8   : > { %v3731_v26 = vpop.f32.mrb[10].mxu1 }
 0x1d9   : > { %v5192_v7 = vpop.f32.mrb[11].mxu1 }
 0x1de   : > { %v5194_v29 = vpop.f32.mrb[12].mxu1 }
 0x1df   : > { %v5196_v8 = vpop.f32.mrb[13].mxu1 }
 0x1e0   : > { %v5198_v21 = vpop.f32.mrb[14].mxu1 }
 0x1e1   : > { %v5200_v12 = vpop.f32.mrb[15].mxu1 }
 0x1e6   : > { %v3892_v13 = vpop.f32.mrb[0].mxu0 }
 0x1e7   : > { %v3924_v39 = vadd.f32 %v3892_v13, %v3722_v3  ;;  %v2807_v59 = vpop.f32.mrb[1].mxu0 }
 0x1e8   : > { %v3925_v43 = vadd.f32 %v2807_v59, %v1701_v51  ;;  %v3893_v17 = vpop.f32.mrb[2].mxu0 }
 0x1e9   : > { %2968 = vst [vmem:[%s5206_s20 + $0x10] sm:$0xff] %v3924_v39  ;;  %v3926_v22 = vadd.f32 %v3893_v17, %v3723_v56  ;;  %v2810_v60 = vpop.f32.mrb[3].mxu0  ;;  %v3038_v11 = vmul.f32 %v3924_v39, %v3924_v39 }
 0x1ea   : > { %2966 = vst [vmem:[%s5206_s20] sm:$0xff] %v3925_v43  ;;  %v3927_v61 = vadd.f32 %v2810_v60, %v1704_v46  ;;  %v3036_v55 = vmul.f32 %v3925_v43, %v3925_v43 }
 0x1eb   : > { %2969 = vst [vmem:[%s5206_s20 + $0x18] sm:$0xff] %v3926_v22  ;;  %v3039_v33 = vmul.f32 %v3926_v22, %v3926_v22 }
 0x1ec   : > { %2967 = vst [vmem:[%s5206_s20 + $0x8] sm:$0xff] %v3927_v61  ;;  %v2998_v63 = vadd.f32 %v3927_v61, %v3925_v43  ;;  %v3037_v40 = vmul.f32 %v3927_v61, %v3927_v61 }
 0x1ee   : > { %v2999_v9 = vadd.f32 %v3924_v39, %v2998_v63  ;;  %v3068_v53 = vadd.f32 %v3037_v40, %v3036_v55  ;;  %v3896_v4 = vpop.f32.mrb[4].mxu0 }
 0x1ef   : > { %v3928_v5 = vadd.f32 %v3896_v4, %v3726_v14  ;;  %v2823_v27 = vpop.f32.mrb[5].mxu0 }
 0x1f0   : > { %v3069_v41 = vadd.f32 %v3068_v53, %v3038_v11  ;;  %v3929_v52 = vadd.f32 %v2823_v27, %v1717_v57  ;;  %v3000_v62 = vadd.f32 %v3926_v22, %v2999_v9  ;;  %v3897_v15 = vpop.f32.mrb[6].mxu0 }
 0x1f1   : > { %2972 = vst [vmem:[%s5206_s20 + $0x30] sm:$0xff] %v3928_v5  ;;  %v3930_v38 = vadd.f32 %v3897_v15, %v3727_v42  ;;  %v2826_v16 = vpop.f32.mrb[7].mxu0  ;;  %v3042_v49 = vmul.f32 %v3928_v5, %v3928_v5 }
 0x1f2   : > { %2970 = vst [vmem:[%s5206_s20 + $0x20] sm:$0xff] %v3929_v52  ;;  %v3001_v32 = vadd.f32 %v3929_v52, %v3000_v62  ;;  %v3040_v47 = vmul.f32 %v3929_v52, %v3929_v52  ;;  %v3070_v6 = vadd.f32 %v3069_v41, %v3039_v33  ;;  %v3931_v34 = vadd.f32 %v2826_v16, %v1720_v1 }
 0x1f3   : > { %2973 = vst [vmem:[%s5206_s20 + $0x38] sm:$0xff] %v3930_v38  ;;  %v3043_v36 = vmul.f32 %v3930_v38, %v3930_v38 }
 0x1f4   : > { %v3071_v19 = vadd.f32 %v3070_v6, %v3040_v47  ;;  %2971 = vst [vmem:[%s5206_s20 + $0x28] sm:$0xff] %v3931_v34  ;;  %v3002_v10 = vadd.f32 %v3931_v34, %v3001_v32  ;;  %v3041_v23 = vmul.f32 %v3931_v34, %v3931_v34 }
 0x1f6   : > { %v3003_v2 = vadd.f32 %v3928_v5, %v3002_v10  ;;  %v3072_v44 = vadd.f32 %v3071_v19, %v3041_v23  ;;  %v3900_v25 = vpop.f32.mrb[8].mxu0 }
 0x1f7   : > { %v3932_v31 = vadd.f32 %v3900_v25, %v3730_v0  ;;  %v2839_v50 = vpop.f32.mrb[9].mxu0 }
 0x1f8   : > { %v3073_v58 = vadd.f32 %v3072_v44, %v3042_v49  ;;  %v3933_v24 = vadd.f32 %v2839_v50, %v1733_v20  ;;  %v3004_v37 = vadd.f32 %v3930_v38, %v3003_v2  ;;  %v3901_v28 = vpop.f32.mrb[10].mxu0 }
 0x1f9   : > { %2976 = vst [vmem:[%s5206_s20 + $0x50] sm:$0xff] %v3932_v31  ;;  %v3934_v35 = vadd.f32 %v3901_v28, %v3731_v26  ;;  %v2842_v54 = vpop.f32.mrb[11].mxu0  ;;  %v3046_v46 = vmul.f32 %v3932_v31, %v3932_v31 }
 0x1fa   : > { %2974 = vst [vmem:[%s5206_s20 + $0x40] sm:$0xff] %v3933_v24  ;;  %v3005_v18 = vadd.f32 %v3933_v24, %v3004_v37  ;;  %v3044_v48 = vmul.f32 %v3933_v24, %v3933_v24  ;;  %v3074_v45 = vadd.f32 %v3073_v58, %v3043_v36  ;;  %v3935_v30 = vadd.f32 %v2842_v54, %v5192_v7 }
 0x1fb   : > { %2977 = vst [vmem:[%s5206_s20 + $0x58] sm:$0xff] %v3934_v35  ;;  %v3047_v20 = vmul.f32 %v3934_v35, %v3934_v35 }
 0x1fc   : > { %v3075_v3 = vadd.f32 %v3074_v45, %v3044_v48  ;;  %2975 = vst [vmem:[%s5206_s20 + $0x48] sm:$0xff] %v3935_v30  ;;  %v3006_v51 = vadd.f32 %v3935_v30, %v3005_v18  ;;  %v3045_v56 = vmul.f32 %v3935_v30, %v3935_v30 }
 0x1fe   : > { %v3007_v14 = vadd.f32 %v3932_v31, %v3006_v51  ;;  %v3076_v57 = vadd.f32 %v3075_v3, %v3045_v56  ;;  %v3904_v42 = vpop.f32.mrb[12].mxu0 }
 0x1ff   : > { %v3936_v1 = vadd.f32 %v3904_v42, %v5194_v29  ;;  %v2855_v0 = vpop.f32.mrb[13].mxu0 }
 0x200   : > { %v3077_v26 = vadd.f32 %v3076_v57, %v3046_v46  ;;  %v3937_v7 = vadd.f32 %v2855_v0, %v5196_v8  ;;  %v3008_v13 = vadd.f32 %v3934_v35, %v3007_v14  ;;  %v3905_v39 = vpop.f32.mrb[14].mxu0 }
 0x201   : > { %2980 = vst [vmem:[%s5206_s20 + $0x70] sm:$0xff] %v3936_v1  ;;  %v3938_v59 = vadd.f32 %v3905_v39, %v5198_v21  ;;  %v2858_v43 = vpop.f32.mrb[15].mxu0  ;;  %v3050_v40 = vmul.f32 %v3936_v1, %v3936_v1 }
 0x202   : > { %2978 = vst [vmem:[%s5206_s20 + $0x60] sm:$0xff] %v3937_v7  ;;  %v3009_v17 = vadd.f32 %v3937_v7, %v3008_v13  ;;  %v3048_v22 = vmul.f32 %v3937_v7, %v3937_v7  ;;  %v3078_v60 = vadd.f32 %v3077_v26, %v3047_v20  ;;  %v3939_v61 = vadd.f32 %v2858_v43, %v5200_v12 }
 0x203   : > { %2981 = vst [vmem:[%s5206_s20 + $0x78] sm:$0xff] %v3938_v59  ;;  %v3051_v27 = vmul.f32 %v3938_v59, %v3938_v59 }
 0x204   : > { %v3079_v29 = vadd.f32 %v3078_v60, %v3048_v22  ;;  %2979 = vst [vmem:[%s5206_s20 + $0x68] sm:$0xff] %v3939_v61  ;;  %v3010_v55 = vadd.f32 %v3939_v61, %v3009_v17  ;;  %v3049_v63 = vmul.f32 %v3939_v61, %v3939_v61 }
 0x206   : > { %v3011_v8 = vadd.f32 %v3936_v1, %v3010_v55  ;;  %v3080_v11 = vadd.f32 %v3079_v29, %v3049_v63  ;;  %v3772_v9 = vpop.f32.mrb[16].mxu1  ;;  %v3908_v53 = vpop.f32.mrb[16].mxu0 }
 0x207   : > { %v3940_v21 = vadd.f32 %v3908_v53, %v3772_v9  ;;  %v1997_v4 = vpop.f32.mrb[17].mxu1  ;;  %v2871_v5 = vpop.f32.mrb[17].mxu0 }
 0x208   : > { %v3081_v33 = vadd.f32 %v3080_v11, %v3050_v40  ;;  %v3941_v12 = vadd.f32 %v2871_v5, %v1997_v4  ;;  %v3012_v41 = vadd.f32 %v3938_v59, %v3011_v8  ;;  %v3773_v52 = vpop.f32.mrb[18].mxu1  ;;  %v3909_v62 = vpop.f32.mrb[18].mxu0 }
 0x209   : > { %2984 = vst [vmem:[%s5206_s20 + $0x90] sm:$0xff] %v3940_v21  ;;  %v3942_v15 = vadd.f32 %v3909_v62, %v3773_v52  ;;  %v2000_v38 = vpop.f32.mrb[19].mxu1  ;;  %v2874_v16 = vpop.f32.mrb[19].mxu0  ;;  %v3054_v49 = vmul.f32 %v3940_v21, %v3940_v21 }
 0x20a   : > { %2982 = vst [vmem:[%s5206_s20 + $0x80] sm:$0xff] %v3941_v12  ;;  %v3013_v32 = vadd.f32 %v3941_v12, %v3012_v41  ;;  %v3052_v47 = vmul.f32 %v3941_v12, %v3941_v12  ;;  %v3082_v6 = vadd.f32 %v3081_v33, %v3051_v27  ;;  %v3943_v34 = vadd.f32 %v2874_v16, %v2000_v38 }
 0x20b   : > { %2985 = vst [vmem:[%s5206_s20 + $0x98] sm:$0xff] %v3942_v15  ;;  %v3055_v24 = vmul.f32 %v3942_v15, %v3942_v15 }
 0x20c   : > { %v3083_v19 = vadd.f32 %v3082_v6, %v3052_v47  ;;  %2983 = vst [vmem:[%s5206_s20 + $0x88] sm:$0xff] %v3943_v34  ;;  %v3014_v10 = vadd.f32 %v3943_v34, %v3013_v32  ;;  %v3053_v23 = vmul.f32 %v3943_v34, %v3943_v34 }
 0x20e   : > { %v3015_v2 = vadd.f32 %v3940_v21, %v3014_v10  ;;  %v3084_v44 = vadd.f32 %v3083_v19, %v3053_v23  ;;  %v3776_v25 = vpop.f32.mrb[20].mxu1  ;;  %v3912_v31 = vpop.f32.mrb[20].mxu0 }
 0x20f   : > { %v3944_v50 = vadd.f32 %v3912_v31, %v3776_v25  ;;  %v2013_v36 = vpop.f32.mrb[21].mxu1  ;;  %v2887_v58 = vpop.f32.mrb[21].mxu0 }
 0x210   : > { %v3085_v37 = vadd.f32 %v3084_v44, %v3054_v49  ;;  %v3945_v28 = vadd.f32 %v2887_v58, %v2013_v36  ;;  %v3016_v35 = vadd.f32 %v3942_v15, %v3015_v2  ;;  %v3777_v54 = vpop.f32.mrb[22].mxu1  ;;  %v3913_v18 = vpop.f32.mrb[22].mxu0 }
 0x211   : > { %2988 = vst [vmem:[%s5206_s20 + $0xb0] sm:$0xff] %v3944_v50  ;;  %v3946_v48 = vadd.f32 %v3913_v18, %v3777_v54  ;;  %v2016_v45 = vpop.f32.mrb[23].mxu1  ;;  %v2890_v30 = vpop.f32.mrb[23].mxu0  ;;  %v3058_v1 = vmul.f32 %v3944_v50, %v3944_v50 }
 0x212   : > { %2986 = vst [vmem:[%s5206_s20 + $0xa0] sm:$0xff] %v3945_v28  ;;  %v3017_v3 = vadd.f32 %v3945_v28, %v3016_v35  ;;  %v3056_v51 = vmul.f32 %v3945_v28, %v3945_v28  ;;  %v3086_v56 = vadd.f32 %v3085_v37, %v3055_v24  ;;  %v3947_v46 = vadd.f32 %v2890_v30, %v2016_v45 }
 0x213   : > { %2989 = vst [vmem:[%s5206_s20 + $0xb8] sm:$0xff] %v3946_v48  ;;  %v3059_v43 = vmul.f32 %v3946_v48, %v3946_v48 }
 0x214   : > { %v3087_v14 = vadd.f32 %v3086_v56, %v3056_v51  ;;  %2987 = vst [vmem:[%s5206_s20 + $0xa8] sm:$0xff] %v3947_v46  ;;  %v3018_v57 = vadd.f32 %v3947_v46, %v3017_v3  ;;  %v3057_v42 = vmul.f32 %v3947_v46, %v3947_v46 }
 0x216   : > { %v3019_v0 = vadd.f32 %v3944_v50, %v3018_v57  ;;  %v3088_v20 = vadd.f32 %v3087_v14, %v3057_v42  ;;  %v3780_v26 = vpop.f32.mrb[24].mxu1  ;;  %v3916_v7 = vpop.f32.mrb[24].mxu0 }
 0x217   : > { %v3948_v13 = vadd.f32 %v3916_v7, %v3780_v26  ;;  %v2029_v39 = vpop.f32.mrb[25].mxu1  ;;  %v2903_v59 = vpop.f32.mrb[25].mxu0 }
 0x218   : > { %v3089_v17 = vadd.f32 %v3088_v20, %v3058_v1  ;;  %v3949_v22 = vadd.f32 %v2903_v59, %v2029_v39  ;;  %v3020_v60 = vadd.f32 %v3946_v48, %v3019_v0  ;;  %v3781_v61 = vpop.f32.mrb[26].mxu1  ;;  %v3917_v29 = vpop.f32.mrb[26].mxu0 }
 0x219   : > { %2992 = vst [vmem:[%s5206_s20 + $0xd0] sm:$0xff] %v3948_v13  ;;  %v3950_v55 = vadd.f32 %v3917_v29, %v3781_v61  ;;  %v2032_v63 = vpop.f32.mrb[27].mxu1  ;;  %v2906_v40 = vpop.f32.mrb[27].mxu0  ;;  %v3062_v27 = vmul.f32 %v3948_v13, %v3948_v13 }
 0x21a   : > { %2990 = vst [vmem:[%s5206_s20 + $0xc0] sm:$0xff] %v3949_v22  ;;  %v3021_v8 = vadd.f32 %v3949_v22, %v3020_v60  ;;  %v3060_v11 = vmul.f32 %v3949_v22, %v3949_v22  ;;  %v3090_v9 = vadd.f32 %v3089_v17, %v3059_v43  ;;  %v3951_v53 = vadd.f32 %v2906_v40, %v2032_v63 }
 0x21b   : > { %2993 = vst [vmem:[%s5206_s20 + $0xd8] sm:$0xff] %v3950_v55  ;;  %v3063_v16 = vmul.f32 %v3950_v55, %v3950_v55 }
 0x21c   : > { %v3091_v21 = vadd.f32 %v3090_v9, %v3060_v11  ;;  %2991 = vst [vmem:[%s5206_s20 + $0xc8] sm:$0xff] %v3951_v53  ;;  %v3022_v4 = vadd.f32 %v3951_v53, %v3021_v8  ;;  %v3061_v5 = vmul.f32 %v3951_v53, %v3951_v53 }
 0x21e   : > { %v3023_v33 = vadd.f32 %v3948_v13, %v3022_v4  ;;  %v3092_v12 = vadd.f32 %v3091_v21, %v3061_v5  ;;  %v3784_v41 = vpop.f32.mrb[28].mxu1  ;;  %v3920_v52 = vpop.f32.mrb[28].mxu0 }
 0x21f   : > { %v3952_v62 = vadd.f32 %v3920_v52, %v3784_v41  ;;  %v2045_v15 = vpop.f32.mrb[29].mxu1  ;;  %v2919_v38 = vpop.f32.mrb[29].mxu0 }
 0x220   : > { %v3093_v32 = vadd.f32 %v3092_v12, %v3062_v27  ;;  %v3953_v47 = vadd.f32 %v2919_v38, %v2045_v15  ;;  %v3024_v6 = vadd.f32 %v3950_v55, %v3023_v33  ;;  %v3785_v34 = vpop.f32.mrb[30].mxu1  ;;  %v3921_v19 = vpop.f32.mrb[30].mxu0 }
 0x221   : > { %2996 = vst [vmem:[%s5206_s20 + $0xf0] sm:$0xff] %v3952_v62  ;;  %v3954_v10 = vadd.f32 %v3921_v19, %v3785_v34  ;;  %v2048_v23 = vpop.f32.mrb[31].mxu1  ;;  %v2922_v49 = vpop.f32.mrb[31].mxu0  ;;  %v3066_v24 = vmul.f32 %v3952_v62, %v3952_v62 }
 0x222   : > { %2994 = vst [vmem:[%s5206_s20 + $0xe0] sm:$0xff] %v3953_v47  ;;  %v3025_v2 = vadd.f32 %v3953_v47, %v3024_v6  ;;  %v3064_v44 = vmul.f32 %v3953_v47, %v3953_v47  ;;  %v3094_v25 = vadd.f32 %v3093_v32, %v3063_v16  ;;  %v3955_v31 = vadd.f32 %v2922_v49, %v2048_v23 }
 0x223   : > { %2997 = vst [vmem:[%s5206_s20 + $0xf8] sm:$0xff] %v3954_v10  ;;  %v3067_v35 = vmul.f32 %v3954_v10, %v3954_v10 }
 0x224   : > { %v3095_v50 = vadd.f32 %v3094_v25, %v3064_v44  ;;  %2995 = vst [vmem:[%s5206_s20 + $0xe8] sm:$0xff] %v3955_v31  ;;  %v3026_v36 = vadd.f32 %v3955_v31, %v3025_v2  ;;  %v3065_v58 = vmul.f32 %v3955_v31, %v3955_v31 }
 0x226   : > { %v3027_v37 = vadd.f32 %v3952_v62, %v3026_v36  ;;  %v3096_v28 = vadd.f32 %v3095_v50, %v3065_v58 }
 0x228   : > { %v3028_v54 = vadd.f32 %v3954_v10, %v3027_v37  ;;  %v3097_v18 = vadd.f32 %v3096_v28, %v3066_v24 }
 0x22a   : > { %v3029_v48 = vrot.slane %v3028_v54, 4  ;;  %v3098_v45 = vadd.f32 %v3097_v18, %v3067_v35 }
 0x22c   : > { %v3030_v30 = vadd.f32 %v3029_v48, %v3028_v54  ;;  %v3099_v3 = vrot.slane %v3098_v45, 4 }
 0x22e   : > { %v3031_v51 = vrot.slane %v3030_v30, 2  ;;  %v3100_v56 = vadd.f32 %v3099_v3, %v3098_v45 }
 0x230   : > { %v3032_v46 = vadd.f32 %v3031_v51, %v3030_v30  ;;  %v3101_v14 = vrot.slane %v3100_v56, 2 }
 0x232   : > { %v3033_v57 = vrot.slane %v3032_v46, 1  ;;  %v3102_v42 = vadd.f32 %v3101_v14, %v3100_v56 }
 0x234   : > { %v3034_v1 = vadd.f32 %v3033_v57, %v3032_v46  ;;  %v3103_v0 = vrot.slane %v3102_v42, 1 }
 0x236   : > { %3035 = vst [vmem:[%s211_s23] sm:$0x1] %v3034_v1  ;;  %v3104_v20 = vadd.f32 %v3103_v0, %v3102_v42 }
 0x238   : > { %3105 = vst [vmem:[%s214_s26] sm:$0x1] %v3104_v20 }
 0x239 PF: > { %s15_s15 = sadd.s32 1, %s4226_s15  }
 0x23a   : > { %p12_p4 = scmp.ge.s32.totalorder %s15_s15, 4  }
 0x23c   :  { %14 = sbr.rel (!%p12_p4) target bundleno = 1 (0x1), region = 90 }

// kernel: up_forward.7
= control target key start
LH: loop header
LB: loop body
LE: loop exit
PB: predicated region body
PF: predicated region fallthrough
CT: control target
= control target key end

     0   :  { %s451_s12 = smov 0   ;;  %s610_s0 = inlined_call_operand.vmem [shape: f32[2,256,128], index: 0, kind: input, shape index: {}]   ;;  %s611_s1 = inlined_call_operand.vmem [shape: f32[1,1,128], index: 1, kind: input, shape index: {}]   ;;  %s612_s2 = inlined_call_operand.vmem [shape: f32[1,1,128], index: 2, kind: input, shape index: {}]   ;;  %s613_s3 = inlined_call_operand.vmem [shape: f32[2,256,128], index: 3, kind: output, shape index: {}]  }
   0x1 LB: > { %s400_s13 = sadd.s32 4294967295, %s429_s12   ;;  %p404_p0 = scmp.ge.s32.totalorder %s429_s12, 1  ;;  %s429_s12 = sphi %s451_s12, %s13_s12  }
   0x2   : > { %p137_p1 = scmp.lt.s32.totalorder %s429_s12, 3 }
   0x4   : > { %p138_p2 = pnand %p404_p0, %p137_p1 }
   0x5   : > { %p161_p3 = scmp.lt.s32.totalorder (!%p138_p2), %s400_s13, 1  ;;  %v462_v0 = vld [vmem:[%s611_s1] ss:$0 sm:$0xff] (!%p138_p2) }
   0x6   : > { %141 = sbr.rel (%p138_p2) target bundleno = 46 (0x2e), region = 32  ;;  %v472_v1 = vld [vmem:[%s612_s2] ss:$0 sm:$0xff] (!%p138_p2) }
   0xd   : > { %s615_s13 = smov (!%p161_p3, %s400_s13), 1 }
   0xe   : > { %s413_s14 = sshll.u32 %s615_s13, 8 }
   0xf   : > { %s467_s19 = scalar_lea.vmem %s610_s0, %s413_s14  ;;  %s495_s24 = scalar_lea.vmem %s613_s3, %s413_s14 }
  0x10   : > { %v171_v2 = vld [vmem:[%s467_s19] sm:$0xff]  ;;  %v172_v3 = vld [vmem:[%s467_s19 + $0x8] sm:$0xff]  ;;  %v173_v4 = vld [vmem:[%s467_s19 + $0x10] sm:$0xff] }
  0x11   : > { %v210_v5 = vmul.f32 %v462_v0, %v171_v2  ;;  %v211_v6 = vmul.f32 %v462_v0, %v172_v3  ;;  %v212_v7 = vmul.f32 %v462_v0, %v173_v4  ;;  %v174_v8 = vld [vmem:[%s467_s19 + $0x18] sm:$0xff]  ;;  %v175_v9 = vld [vmem:[%s467_s19 + $0x20] sm:$0xff]  ;;  %v176_v10 = vld [vmem:[%s467_s19 + $0x28] sm:$0xff] }
  0x12   : > { %v213_v11 = vmul.f32 %v462_v0, %v174_v8  ;;  %v214_v12 = vmul.f32 %v462_v0, %v175_v9  ;;  %v215_v13 = vmul.f32 %v462_v0, %v176_v10  ;;  %v177_v14 = vld [vmem:[%s467_s19 + $0x30] sm:$0xff]  ;;  %v178_v15 = vld [vmem:[%s467_s19 + $0x38] sm:$0xff]  ;;  %v179_v24 = vld [vmem:[%s467_s19 + $0x40] sm:$0xff] }
  0x13   : > { %v249_v16 = vadd.f32 %v472_v1, %v210_v5  ;;  %v250_v17 = vadd.f32 %v472_v1, %v211_v6  ;;  %v251_v18 = vadd.f32 %v472_v1, %v212_v7  ;;  %v216_v19 = vmul.f32 %v462_v0, %v177_v14  ;;  %v180_v25 = vld [vmem:[%s467_s19 + $0x48] sm:$0xff]  ;;  %v181_v26 = vld [vmem:[%s467_s19 + $0x50] sm:$0xff]  ;;  %v182_v31 = vld [vmem:[%s467_s19 + $0x58] sm:$0xff] }
  0x14   : > { %v252_v20 = vadd.f32 %v472_v1, %v213_v11  ;;  %v253_v21 = vadd.f32 %v472_v1, %v214_v12  ;;  %v254_v22 = vadd.f32 %v472_v1, %v215_v13  ;;  %v217_v23 = vmul.f32 %v462_v0, %v178_v15  ;;  %v183_v32 = vld [vmem:[%s467_s19 + $0x60] sm:$0xff]  ;;  %v184_v33 = vld [vmem:[%s467_s19 + $0x68] sm:$0xff]  ;;  %v185_v38 = vld [vmem:[%s467_s19 + $0x70] sm:$0xff] }
  0x15   : > { %v281_v27 = vmax.f32 %v249_v16, 0.0  ;;  %v282_v28 = vmax.f32 %v250_v17, 0.0  ;;  %v283_v29 = vmax.f32 %v251_v18, 0.0  ;;  %v255_v30 = vadd.f32 %v472_v1, %v216_v19  ;;  %v186_v43 = vld [vmem:[%s467_s19 + $0x78] sm:$0xff]  ;;  %v187_v56 = vld [vmem:[%s467_s19 + $0x80] sm:$0xff]  ;;  %v188_v57 = vld [vmem:[%s467_s19 + $0x88] sm:$0xff] }
  0x16   : > { %v284_v34 = vmax.f32 %v252_v20, 0.0  ;;  %v285_v35 = vmax.f32 %v253_v21, 0.0  ;;  %v286_v36 = vmax.f32 %v254_v22, 0.0  ;;  %v256_v37 = vadd.f32 %v472_v1, %v217_v23  ;;  %v189_v58 = vld [vmem:[%s467_s19 + $0x90] sm:$0xff]  ;;  %v190_v63 = vld [vmem:[%s467_s19 + $0x98] sm:$0xff]  ;;  %v191_v2 = vld [vmem:[%s467_s19 + $0xa0] sm:$0xff] }
  0x17   : > { %313 = vst [vmem:[%s495_s24] sm:$0xff] %v281_v27  ;;  %314 = vst [vmem:[%s495_s24 + $0x8] sm:$0xff] %v282_v28  ;;  %v287_v39 = vmax.f32 %v255_v30, 0.0  ;;  %v218_v40 = vmul.f32 %v462_v0, %v179_v24  ;;  %v219_v41 = vmul.f32 %v462_v0, %v180_v25  ;;  %v220_v42 = vmul.f32 %v462_v0, %v181_v26  ;;  %v192_v3 = vld [vmem:[%s467_s19 + $0xa8] sm:$0xff]  ;;  %v193_v8 = vld [vmem:[%s467_s19 + $0xb0] sm:$0xff] }
  0x18   : > { %315 = vst [vmem:[%s495_s24 + $0x10] sm:$0xff] %v283_v29  ;;  %316 = vst [vmem:[%s495_s24 + $0x18] sm:$0xff] %v284_v34  ;;  %v288_v44 = vmax.f32 %v256_v37, 0.0  ;;  %v221_v45 = vmul.f32 %v462_v0, %v182_v31  ;;  %v222_v46 = vmul.f32 %v462_v0, %v183_v32  ;;  %v223_v47 = vmul.f32 %v462_v0, %v184_v33  ;;  %v194_v13 = vld [vmem:[%s467_s19 + $0xb8] sm:$0xff]  ;;  %v195_v26 = vld [vmem:[%s467_s19 + $0xc0] sm:$0xff] }
  0x19   : > { %317 = vst [vmem:[%s495_s24 + $0x20] sm:$0xff] %v285_v35  ;;  %318 = vst [vmem:[%s495_s24 + $0x28] sm:$0xff] %v286_v36  ;;  %v257_v48 = vadd.f32 %v472_v1, %v218_v40  ;;  %v258_v49 = vadd.f32 %v472_v1, %v219_v41  ;;  %v259_v50 = vadd.f32 %v472_v1, %v220_v42  ;;  %v196_v27 = vld [vmem:[%s467_s19 + $0xc8] sm:$0xff]  ;;  %v197_v28 = vld [vmem:[%s467_s19 + $0xd0] sm:$0xff] }
  0x1a   : > { %319 = vst [vmem:[%s495_s24 + $0x30] sm:$0xff] %v287_v39  ;;  %v224_v51 = vmul.f32 %v462_v0, %v185_v38  ;;  %320 = vst [vmem:[%s495_s24 + $0x38] sm:$0xff] %v288_v44  ;;  %v260_v52 = vadd.f32 %v472_v1, %v221_v45  ;;  %v261_v53 = vadd.f32 %v472_v1, %v222_v46  ;;  %v198_v33 = vld [vmem:[%s467_s19 + $0xd8] sm:$0xff]  ;;  %v199_v34 = vld [vmem:[%s467_s19 + $0xe0] sm:$0xff] }
  0x1b   : > { %v262_v54 = vadd.f32 %v472_v1, %v223_v47  ;;  %v225_v55 = vmul.f32 %v462_v0, %v186_v43  ;;  %v289_v59 = vmax.f32 %v257_v48, 0.0  ;;  %v290_v60 = vmax.f32 %v258_v49, 0.0  ;;  %v200_v35 = vld [vmem:[%s467_s19 + $0xe8] sm:$0xff]  ;;  %v201_v40 = vld [vmem:[%s467_s19 + $0xf0] sm:$0xff]  ;;  %v202_v45 = vld [vmem:[%s467_s19 + $0xf8] sm:$0xff] }
  0x1c   : > { %v291_v61 = vmax.f32 %v259_v50, 0.0  ;;  %v263_v62 = vadd.f32 %v472_v1, %v224_v51  ;;  %v292_v4 = vmax.f32 %v260_v52, 0.0  ;;  %v293_v5 = vmax.f32 %v261_v53, 0.0 }
  0x1d   : > { %v294_v6 = vmax.f32 %v262_v54, 0.0  ;;  %v264_v7 = vadd.f32 %v472_v1, %v225_v55  ;;  %321 = vst [vmem:[%s495_s24 + $0x40] sm:$0xff] %v289_v59  ;;  %322 = vst [vmem:[%s495_s24 + $0x48] sm:$0xff] %v290_v60  ;;  %v226_v10 = vmul.f32 %v462_v0, %v187_v56  ;;  %v227_v11 = vmul.f32 %v462_v0, %v188_v57 }
  0x1e   : > { %323 = vst [vmem:[%s495_s24 + $0x50] sm:$0xff] %v291_v61  ;;  %v295_v9 = vmax.f32 %v263_v62, 0.0  ;;  %v228_v12 = vmul.f32 %v462_v0, %v189_v58  ;;  %324 = vst [vmem:[%s495_s24 + $0x58] sm:$0xff] %v292_v4  ;;  %v229_v15 = vmul.f32 %v462_v0, %v190_v63  ;;  %v230_v16 = vmul.f32 %v462_v0, %v191_v2 }
  0x1f   : > { %325 = vst [vmem:[%s495_s24 + $0x60] sm:$0xff] %v293_v5  ;;  %326 = vst [vmem:[%s495_s24 + $0x68] sm:$0xff] %v294_v6  ;;  %v296_v14 = vmax.f32 %v264_v7, 0.0  ;;  %v231_v17 = vmul.f32 %v462_v0, %v192_v3  ;;  %v265_v18 = vadd.f32 %v472_v1, %v226_v10  ;;  %v266_v19 = vadd.f32 %v472_v1, %v227_v11 }
  0x20   : > { %327 = vst [vmem:[%s495_s24 + $0x70] sm:$0xff] %v295_v9  ;;  %v267_v20 = vadd.f32 %v472_v1, %v228_v12  ;;  %v232_v21 = vmul.f32 %v462_v0, %v193_v8  ;;  %v268_v22 = vadd.f32 %v472_v1, %v229_v15  ;;  %v269_v23 = vadd.f32 %v472_v1, %v230_v16 }
  0x21   : > { %328 = vst [vmem:[%s495_s24 + $0x78] sm:$0xff] %v296_v14  ;;  %v270_v24 = vadd.f32 %v472_v1, %v231_v17  ;;  %v233_v25 = vmul.f32 %v462_v0, %v194_v13  ;;  %v297_v29 = vmax.f32 %v265_v18, 0.0  ;;  %v298_v30 = vmax.f32 %v266_v19, 0.0 }
  0x22   : > { %v299_v31 = vmax.f32 %v267_v20, 0.0  ;;  %v271_v32 = vadd.f32 %v472_v1, %v232_v21  ;;  %v300_v36 = vmax.f32 %v268_v22, 0.0  ;;  %v301_v37 = vmax.f32 %v269_v23, 0.0 }
  0x23   : > { %v302_v38 = vmax.f32 %v270_v24, 0.0  ;;  %v272_v39 = vadd.f32 %v472_v1, %v233_v25  ;;  %329 = vst [vmem:[%s495_s24 + $0x80] sm:$0xff] %v297_v29  ;;  %330 = vst [vmem:[%s495_s24 + $0x88] sm:$0xff] %v298_v30  ;;  %v234_v42 = vmul.f32 %v462_v0, %v195_v26  ;;  %v235_v43 = vmul.f32 %v462_v0, %v196_v27 }
  0x24   : > { %331 = vst [vmem:[%s495_s24 + $0x90] sm:$0xff] %v299_v31  ;;  %v303_v41 = vmax.f32 %v271_v32, 0.0  ;;  %v236_v44 = vmul.f32 %v462_v0, %v197_v28  ;;  %332 = vst [vmem:[%s495_s24 + $0x98] sm:$0xff] %v300_v36  ;;  %v237_v47 = vmul.f32 %v462_v0, %v198_v33  ;;  %v238_v48 = vmul.f32 %v462_v0, %v199_v34 }
  0x25   : > { %333 = vst [vmem:[%s495_s24 + $0xa0] sm:$0xff] %v301_v37  ;;  %334 = vst [vmem:[%s495_s24 + $0xa8] sm:$0xff] %v302_v38  ;;  %v304_v46 = vmax.f32 %v272_v39, 0.0  ;;  %v239_v49 = vmul.f32 %v462_v0, %v200_v35  ;;  %v273_v50 = vadd.f32 %v472_v1, %v234_v42  ;;  %v274_v51 = vadd.f32 %v472_v1, %v235_v43 }
  0x26   : > { %335 = vst [vmem:[%s495_s24 + $0xb0] sm:$0xff] %v303_v41  ;;  %v275_v52 = vadd.f32 %v472_v1, %v236_v44  ;;  %v240_v53 = vmul.f32 %v462_v0, %v201_v40  ;;  %v276_v54 = vadd.f32 %v472_v1, %v237_v47  ;;  %v277_v55 = vadd.f32 %v472_v1, %v238_v48 }
  0x27   : > { %336 = vst [vmem:[%s495_s24 + $0xb8] sm:$0xff] %v304_v46  ;;  %v278_v56 = vadd.f32 %v472_v1, %v239_v49  ;;  %v241_v57 = vmul.f32 %v462_v0, %v202_v45  ;;  %v305_v58 = vmax.f32 %v273_v50, 0.0  ;;  %v306_v59 = vmax.f32 %v274_v51, 0.0 }
  0x28   : > { %v307_v60 = vmax.f32 %v275_v52, 0.0  ;;  %v279_v61 = vadd.f32 %v472_v1, %v240_v53  ;;  %v308_v62 = vmax.f32 %v276_v54, 0.0  ;;  %v309_v63 = vmax.f32 %v277_v55, 0.0 }
  0x29   : > { %v310_v2 = vmax.f32 %v278_v56, 0.0  ;;  %v280_v3 = vadd.f32 %v472_v1, %v241_v57  ;;  %337 = vst [vmem:[%s495_s24 + $0xc0] sm:$0xff] %v305_v58  ;;  %338 = vst [vmem:[%s495_s24 + $0xc8] sm:$0xff] %v306_v59 }
  0x2a   : > { %339 = vst [vmem:[%s495_s24 + $0xd0] sm:$0xff] %v307_v60  ;;  %v311_v4 = vmax.f32 %v279_v61, 0.0  ;;  %340 = vst [vmem:[%s495_s24 + $0xd8] sm:$0xff] %v308_v62 }
  0x2b   : > { %341 = vst [vmem:[%s495_s24 + $0xe0] sm:$0xff] %v309_v63  ;;  %342 = vst [vmem:[%s495_s24 + $0xe8] sm:$0xff] %v310_v2  ;;  %v312_v0 = vmax.f32 %v280_v3, 0.0 }
  0x2c   : > { %343 = vst [vmem:[%s495_s24 + $0xf0] sm:$0xff] %v311_v4 }
  0x2d   : > { %344 = vst [vmem:[%s495_s24 + $0xf8] sm:$0xff] %v312_v0 }
  0x2e PF: > { %s13_s12 = sadd.s32 1, %s429_s12  }
  0x2f   : > { %p10_p4 = scmp.ge.s32.totalorder %s13_s12, 4  }
  0x31   :  { %12 = sbr.rel (!%p10_p4) target bundleno = 1 (0x1), region = 62 }

// kernel: up_forward.6
= control target key start
LH: loop header
LB: loop body
LE: loop exit
PB: predicated region body
PF: predicated region fallthrough
CT: control target
= control target key end

     0   :  { %s5790_s27 = smov 0   ;;  %s7161_s0 = inlined_call_operand.vmem [shape: bf16[2,18,18,128], index: 0, kind: input, shape index: {}]   ;;  %s7162_s1 = inlined_call_operand.vmem [shape: bf16[9,128,128], index: 1, kind: input, shape index: {}]   ;;  %s7163_s2 = inlined_call_operand.vmem [shape: bf16[128,128], index: 2, kind: input, shape index: {}]   ;;  %s7164_s3 = inlined_call_operand.vmem [shape: f32[1,128], index: 3, kind: input, shape index: {}]   ;;  %s7165_s4 = inlined_call_operand.vmem [shape: bf16[128,128], index: 4, kind: input, shape index: {}]   ;;  %s7166_s5 = inlined_call_operand.vmem [shape: f32[1,128], index: 5, kind: input, shape index: {}]   ;;  %s7167_s6 = inlined_call_operand.vmem [shape: f32[2,256,128], index: 6, kind: output, shape index: {0}]   ;;  %s7168_s7 = inlined_call_operand.vmem [shape: f32[2,1,128], index: 7, kind: output, shape index: {1}]   ;;  %s7169_s8 = inlined_call_operand.vmem [shape: f32[2,1,128], index: 8, kind: output, shape index: {2}]  }
   0x1 LB: > { %s4242_s28 = sadd.s32 4294967295, %s5743_s27   ;;  %p4246_p0 = scmp.ge.s32.totalorder %s5743_s27, 1  ;;  %s5743_s27 = sphi %s5790_s27, %s19_s27  }
   0x2   : > { %p267_p1 = scmp.lt.s32.totalorder %s5743_s27, 3 }
   0x4   : > { %p268_p2 = pnand %p4246_p0, %p267_p1 }
   0x6   : > { %271 = sbr.rel (%p268_p2) target bundleno = 1071 (0x42f), region = 44 }
   0xd   : > { %v5616_v0 = vld [vmem:[%s7162_s1 + $0x40] sm:$0xff]   ;;  %p307_p3 = scmp.lt.s32.totalorder %s4242_s28, 1  ;;  %v5618_v2 = vld [vmem:[%s7162_s1 + $0x48] sm:$0xff]   ;;  %v5620_v4 = vld [vmem:[%s7162_s1 + $0x50] sm:$0xff]   ;;  %vm394_vm0 = vsmask.f32 3328 }
   0xe   : > { %v5617_v1 = vld [vmem:[%s7162_s1 + $0xc0] sm:$0xff]   ;;  %4807 = vmatprep.subr.bf16.mxu1 %v5616_v0  ;;  %v5619_v3 = vld [vmem:[%s7162_s1 + $0xc8] sm:$0xff]   ;;  %v5621_v5 = vld [vmem:[%s7162_s1 + $0xd0] sm:$0xff]   ;;  %vm395_vm1 = vsmask.f32 7440  ;;  %vm1392_vm3 = vcmask 1042432  }
   0xf   : > { %4951 = vmatprep.subr.bf16.mxu0 %v5617_v1  ;;  %4808 = vmatpush3.bf16.msra.mxu1 %v5616_v0  ;;  %s7263_s28 = smov (!%p307_p3, %s4242_s28), 1  ;;  %v5622_v6 = vld [vmem:[%s7162_s1 + $0x58] sm:$0xff]   ;;  %v5624_v8 = vld [vmem:[%s7162_s1 + $0x60] sm:$0xff]   ;;  %v5626_v10 = vld [vmem:[%s7162_s1 + $0x68] sm:$0xff]   ;;  %vm1393_vm4 = vcmask 1046532  }
  0x10   : > { %4952 = vmatpush3.bf16.msra.mxu0 %v5617_v1  ;;  %4809 = vmatprep.subr.bf16.mxu1 %v5618_v2  ;;  %v5623_v7 = vld [vmem:[%s7162_s1 + $0xd8] sm:$0xff]   ;;  %s5607_s23 = smul.u32 216, %s7263_s28  ;;  %v5625_v9 = vld [vmem:[%s7162_s1 + $0xe0] sm:$0xff]   ;;  %v5627_v11 = vld [vmem:[%s7162_s1 + $0xe8] sm:$0xff]   ;;  %s4542_s14 = sshll.u32 %s7263_s28, 8 }
  0x11   : > { %4953 = vmatprep.subr.bf16.mxu0 %v5619_v3  ;;  %v5628_v17 = vld [vmem:[%s7162_s1 + $0x70] sm:$0xff]   ;;  %vm5863_vm2 = vmor %vm394_vm0, %vm395_vm1  ;;  %v5630_v44 = vld [vmem:[%s7162_s1 + $0x78] sm:$0xff]   ;;  %s7053_s17 = scalar_lea.vmem %s7167_s6, %s4542_s14  ;;  %s319_s19 = scalar_lea.vmem %s7168_s7, %s7263_s28 }
  0x12   : > { %s5834_s10 = scalar_lea.vmem %s7161_s0, %s5607_s23  ;;  %v5629_v32 = vld [vmem:[%s7162_s1 + $0xf0] sm:$0xff]   ;;  %v5631_v49 = vld [vmem:[%s7162_s1 + $0xf8] sm:$0xff]   ;;  %vm6304_vm5 = vmor %vm1392_vm3, %vm1393_vm4  ;;  %s322_s22 = scalar_lea.vmem %s7169_s8, %s7263_s28 }
  0x13   : > { %4810 = vmatpush3.bf16.msra.mxu1 %v5618_v2  ;;  %v324_v12 = vld [vmem:[%s5834_s10] sm:$0xf]  ;;  %v325_v13 = vld [vmem:[%s5834_s10 + $0x4] sm:$0xf]  ;;  %v326_v14 = vld [vmem:[%s5834_s10 + $0x8] sm:$0x1] }
  0x14   : > { %4954 = vmatpush3.bf16.msra.mxu0 %v5619_v3  ;;  %4811 = vmatprep.subr.bf16.mxu1 %v5620_v4  ;;  %v398_v15 = vshrl.u32 %v324_v12, 16  ;;  %v401_v16 = vshll.u32 %v324_v12, 16  ;;  %v407_v18 = vshll.u32 %v325_v13, 16  ;;  %v411_v19 = vshrl.u32 %v325_v13, 16  ;;  %v327_v21 = vld [vmem:[%s5834_s10 + $0xc] sm:$0xf] }
  0x15   : > { %4955 = vmatprep.subr.bf16.mxu0 %v5621_v5  ;;  %v417_v20 = vshll.u32 %v326_v14, 16  ;;  %v5850_v24 = vld [vmem:[%s5834_s10 + $0x10] sm:$0xf]  ;;  %v422_v25 = vshrl.u32 %v327_v21, 16  ;;  %v425_v26 = vshll.u32 %v327_v21, 16  ;;  %v5634_v3 = vld [vmem:[%s7162_s1 + $0x100] sm:$0xff]  }
  0x16   : > { %v400_v22 = vrot.slane %v398_v15, 4  ;;  %v403_v23 = vrot.slane %v401_v16, 5  ;;  %v409_v27 = vrot.slane %v407_v18, 5  ;;  %v413_v28 = vrot.slane %v411_v19, 4  ;;  %v329_v31 = vld [vmem:[%s5834_s10 + $0x14] sm:$0x1] }
  0x17   : > { %4812 = vmatpush3.bf16.msra.mxu1 %v5620_v4  ;;  %v419_v29 = vrot.slane %v417_v20, 5  ;;  %v431_v30 = vshll.u32 %v5850_v24, 16  ;;  %v424_v34 = vrot.slane %v422_v25, 4  ;;  %v427_v35 = vrot.slane %v425_v26, 5  ;;  %v5859_v37 = vld [vmem:[%s5834_s10 + $0x18] sm:$0xf] }
  0x18   : > { %4956 = vmatpush3.bf16.msra.mxu0 %v5621_v5  ;;  %4813 = vmatprep.subr.bf16.mxu1 %v5622_v6  ;;  %v404_v33 = vor.u32 %v403_v23, %v400_v22  ;;  %v435_v36 = vshrl.u32 %v5850_v24, 16  ;;  %v414_v39 = vor.u32 %v413_v28, %v409_v27  ;;  %v5868_v40 = vcombine.low %v327_v21, %v5850_v24  ;;  %v5871_v43 = vld [vmem:[%s5834_s10 + $0x1c] sm:$0xf]  ;;  %v5886_v57 = vld [vmem:[%s5834_s10 + $0x20] sm:$0x1] }
  0x19   : > { %4957 = vmatprep.subr.bf16.mxu0 %v5623_v7  ;;  %v433_v41 = vrot.slane %v431_v30, 5  ;;  %v441_v42 = vshll.u32 %v329_v31, 16  ;;  %v428_v47 = vor.u32 %v427_v35, %v424_v34  ;;  %v446_v48 = vshrl.u32 %v5859_v37, 16  ;;  %v5891_v60 = vld [vmem:[%s5834_s10 + $0x24] sm:$0xf] }
  0x1a   : > { %v405_v45 = vrot.slane %v404_v33, 4  ;;  %v437_v46 = vrot.slane %v435_v36, 4  ;;  %v415_v50 = vrot.slane %v414_v39, 4  ;;  %v449_v51 = vshll.u32 %v5859_v37, 16  ;;  %4967 = vmatprep.mubr.bf16.mxu0 %v5868_v40  ;;  %v334_v1 = vld [vmem:[%s5834_s10 + $0x28] sm:$0xf] }
  0x1b   : > { %4814 = vmatpush3.bf16.msra.mxu1 %v5622_v6  ;;  %v459_v52 = vshrl.u32 %v5871_v43, 16  ;;  %v429_v54 = vrot.slane %v428_v47, 4  ;;  %v443_v56 = vrot.slane %v441_v42, 5  ;;  %v448_v59 = vrot.slane %v446_v48, 4  ;;  %v5911_v12 = vld [vmem:[%s5834_s10 + $0x30] sm:$0xf] }
  0x1c   : > { %4958 = vmatpush3.bf16.msra.mxu0 %v5623_v7  ;;  %4815 = vmatprep.subr.bf16.mxu1 %v5624_v8  ;;  %v410_v53 = vsel %vm5863_vm2, %v405_v45, %v409_v27  ;;  %v438_v55 = vor.u32 %v437_v46, %v433_v41  ;;  %v420_v58 = vsel %vm5863_vm2, %v415_v50, %v419_v29  ;;  %v451_v0 = vrot.slane %v449_v51, 5  ;;  %v335_v7 = vld [vmem:[%s5834_s10 + $0x2c] sm:$0x1]  ;;  %v5931_v36 = vld [vmem:[%s5834_s10 + $0x38] sm:$0x1]  ;;  %v5648_v39 = vld [vmem:[%s7162_s1] sm:$0xff]  }
  0x1d   : > { %4959 = vmatprep.subr.bf16.mxu0 %v5625_v9  ;;  %v4266_v61 = vcombine.low %v410_v53, %v420_v58  ;;  %v434_v62 = vsel %vm5863_vm2, %v429_v54, %v433_v41  ;;  %v5898_v2 = vcombine.low %v5859_v37, %v5871_v43  ;;  %v455_v4 = vshll.u32 %v5871_v43, 16  ;;  %v5635_v27 = vld [vmem:[%s7162_s1 + $0x108] sm:$0xff]   ;;  %v5943_v46 = vld [vmem:[%s5834_s10 + $0x3c] sm:$0xf]  ;;  %v5638_v50 = vld [vmem:[%s7162_s1 + $0x110] sm:$0xff]  }
  0x1e   : > { %v439_v63 = vrot.slane %v438_v55, 4  ;;  %v461_v5 = vrot.slane %v459_v52, 4  ;;  %v465_v6 = vshll.u32 %v5886_v57, 16  ;;  %v473_v16 = vshll.u32 %v5891_v60, 16  ;;  %v5953_v52 = vld [vmem:[%s5834_s10 + $0x40] sm:$0xf] }
  0x1f   : > { %4816 = vmatpush3.bf16.msra.mxu1 %v5624_v8  ;;  %4823 = vmatprep.mubr.bf16.mxu1 %v4266_v61  ;;  %v457_v14 = vrot.slane %v455_v4, 5  ;;  %v483_v19 = vshrl.u32 %v334_v1, 16  ;;  %v5920_v20 = vcombine.low %v5891_v60, %v334_v1  ;;  %v479_v25 = vshll.u32 %v334_v1, 16  ;;  %v5959_v58 = vld [vmem:[%s5834_s10 + $0x44] sm:$0x1]  ;;  %v5650_v1 = vld [vmem:[%s7162_s1 + $0x8] sm:$0xff]  }
  0x20   : > { %4960 = vmatpush3.bf16.msra.mxu0 %v5625_v9  ;;  %4817 = vmatprep.subr.bf16.mxu1 %v5626_v10  ;;  %v444_v8 = vsel %vm5863_vm2, %v439_v63, %v443_v56  ;;  %v467_v15 = vrot.slane %v465_v6, 5  ;;  %v475_v23 = vrot.slane %v473_v16, 5  ;;  %v489_v26 = vshll.u32 %v335_v7, 16  ;;  %v5639_v16 = vld [vmem:[%s7162_s1 + $0x118] sm:$0xff]   ;;  %v6117_v9 = vld [vmem:[%s5834_s10 + $0x84] sm:$0xf] }
  0x21   : > { %4961 = vmatprep.subr.bf16.mxu0 %v5627_v11  ;;  %v5913_v13 = vcombine.low %v434_v62, %v444_v8  ;;  %7205 = vst [vmem:[#allocation2_spill] sm:$0xff] %v5920_v20  ;;  %v462_v22 = vor.u32 %v461_v5, %v457_v14  ;;  %v485_v29 = vrot.slane %v483_v19, 4  ;;  %v494_v30 = vshrl.u32 %v5911_v12, 16  ;;  %v5706_v38 = vld [vmem:[%s7163_s2] sm:$0xff]  }
  0x22   : > { %v497_v31 = vshll.u32 %v5911_v12, 16  ;;  %v481_v34 = vrot.slane %v479_v25, 5  ;;  %v491_v35 = vrot.slane %v489_v26, 5  ;;  %v513_v56 = vshll.u32 %v5931_v36, 16 }
  0x23   : > { %4818 = vmatpush3.bf16.msra.mxu1 %v5626_v10  ;;  %v452_v10 = vor.u32 %v451_v0, %v448_v59  ;;  %v5962_v59 = vld [vmem:[%s5834_s10 + $0x48] sm:$0xf]  ;;  %v518_v0 = vshrl.u32 %v5943_v46, 16  ;;  %v521_v5 = vshll.u32 %v5943_v46, 16  ;;  %v531_v6 = vshrl.u32 %v5953_v52, 16 }
  0x24   : > { %4962 = vmatpush3.bf16.msra.mxu0 %v5627_v11  ;;  %4819 = vmatprep.subr.bf16.mxu1 %v5628_v17  ;;  %v470_v11 = vshrl.u32 %v5891_v60, 16  ;;  %v499_v45 = vrot.slane %v497_v31, 5  ;;  %v515_v4 = vrot.slane %v513_v56, 5  ;;  %v537_v26 = vshll.u32 %v5959_v58, 16 }
  0x25   : > { %4963 = vmatprep.subr.bf16.mxu0 %v5629_v32  ;;  %v453_v18 = vrot.slane %v452_v10, 4  ;;  %v5977_v10 = vcombine.low %v5943_v46, %v5953_v52  ;;  %v523_v19 = vrot.slane %v521_v5, 5  ;;  %v533_v25 = vrot.slane %v531_v6, 4 }
  0x26   : > { %v472_v21 = vrot.slane %v470_v11, 4  ;;  %v520_v11 = vrot.slane %v518_v0, 4  ;;  %v545_v31 = vshll.u32 %v5962_v59, 16 }
  0x27   : > { %4820 = vmatpush3.bf16.msra.mxu1 %v5628_v17  ;;  %v5917_v17 = vld [vmem:[%s5834_s10 + $0x34] sm:$0xf]  ;;  %v458_v28 = vsel %vm5863_vm2, %v453_v18, %v457_v14  ;;  %7208 = vst [vmem:[#allocation5_spill] sm:$0xff] %v5977_v10  ;;  %v5980_v14 = vld [vmem:[%s5834_s10 + $0x4c] sm:$0xf] }
  0x28   : > { %4964 = vmatpush3.bf16.msra.mxu0 %v5629_v32  ;;  %4821 = vmatprep.subr.bf16.mxu1 %v5630_v44  ;;  %v463_v32 = vrot.slane %v462_v22, 4  ;;  %v476_v33 = vor.u32 %v475_v23, %v472_v21  ;;  %v507_v41 = vshrl.u32 %v5917_v17, 16  ;;  %v5940_v42 = vcombine.low %v5911_v12, %v5917_v17  ;;  %v5651_v22 = vld [vmem:[%s7162_s1 + $0x10] sm:$0xff]  }
  0x29   : > { %4965 = vmatprep.subr.bf16.mxu0 %v5631_v49  ;;  %v503_v51 = vshll.u32 %v5917_v17, 16  ;;  %v527_v21 = vshll.u32 %v5953_v52, 16 }
  0x2a   : > { %7206 = vst [vmem:[#allocation3_spill] sm:$0xff] %v5940_v42  ;;  %v468_v47 = vsel %vm5863_vm2, %v463_v32, %v467_v15  ;;  %v477_v48 = vrot.slane %v476_v33, 4  ;;  %v509_v55 = vrot.slane %v507_v41, 4  ;;  %v555_v32 = vshrl.u32 %v5980_v14, 16  ;;  %v5642_v33 = vld [vmem:[%s7162_s1 + $0x120] sm:$0xff]  }
  0x2b   : > { %4822 = vmatpush3.bf16.msra.mxu1 %v5630_v44  ;;  %v496_v44 = vrot.slane %v494_v30, 4  ;;  %v5955_v53 = vcombine.low %v458_v28, %v468_v47  ;;  %v505_v63 = vrot.slane %v503_v51, 5  ;;  %v5996_v28 = vld [vmem:[%s5834_s10 + $0x50] sm:$0x1]  ;;  %v529_v30 = vrot.slane %v527_v21, 5 }
  0x2c   : > { %4966 = vmatpush3.bf16.msra.mxu0 %v5631_v49  ;;  %v486_v49 = vor.u32 %v485_v29, %v481_v34  ;;  %4855 = vmatprep.subr.bf16.mxu1 %v5648_v39  ;;  %v482_v61 = vsel %vm5863_vm2, %v477_v48, %v481_v34  ;;  %v524_v29 = vor.u32 %v523_v19, %v520_v11  ;;  %v6006_v34 = vld [vmem:[%s5834_s10 + $0x54] sm:$0xf]  ;;  %v551_v51 = vshll.u32 %v5980_v14, 16  ;;  %v5653_v11 = vld [vmem:[%s7162_s1 + $0x18] sm:$0xff]  }
  0x2d   : > { %4999 = vmatprep.subr.bf16.mxu0 %v5634_v3  ;;  %7207 = vst [vmem:[#allocation4_spill] sm:$0xff] %v5955_v53  ;;  %v500_v54 = vor.u32 %v499_v45, %v496_v44  ;;  %v510_v8 = vor.u32 %v509_v55, %v505_v63  ;;  %v6013_v41 = vcombine.low %v5962_v59, %v5980_v14  ;;  %v6016_v45 = vld [vmem:[%s5834_s10 + $0x58] sm:$0xf]  ;;  %v561_v55 = vshll.u32 %v5996_v28, 16 }
  0x2e   : > { %4824 = vmatmul.mubr.bf16.vlgmr.msra.gmra.mrb[0].mxu1 %v5913_v13  ;;  %v487_v62 = vrot.slane %v486_v49, 4  ;;  %v525_v48 = vrot.slane %v524_v29, 4  ;;  %v534_v49 = vor.u32 %v533_v25, %v529_v30  ;;  %v566_v56 = vshrl.u32 %v6006_v34, 16 }
  0x2f   : > { %4968 = vmatmul.mubr.bf16.vlgmr.msra.gmra.mrb[0].mxu0 %v5898_v2  ;;  %4856 = vmatpush3.bf16.msra.mxu1 %v5648_v39  ;;  %v511_v23 = vrot.slane %v510_v8, 4  ;;  %v539_v39 = vrot.slane %v537_v26, 5  ;;  %7210 = vst [vmem:[#allocation7_spill] sm:$0xff] %v6013_v41  ;;  %v563_v5 = vrot.slane %v561_v55, 5  ;;  %v579_v6 = vshrl.u32 %v6016_v45, 16 }
  0x30   : > { %5000 = vmatpush3.bf16.msra.mxu0 %v5634_v3  ;;  %4971 = vmatprep.mubr.bf16.mxu0 %v5920_v20  ;;  %v501_v3 = vrot.slane %v500_v54, 4  ;;  %v492_v7 = vsel %vm5863_vm2, %v487_v62, %v491_v35  ;;  %v557_v54 = vrot.slane %v555_v32, 4  ;;  %v535_v62 = vrot.slane %v534_v49, 4  ;;  %v6039_v8 = vld [vmem:[%s5834_s10 + $0x60] sm:$0xf] }
  0x31   : > { %5001 = vmatprep.subr.bf16.mxu0 %v5635_v27  ;;  %4827 = vmatprep.mubr.bf16.mxu1 %v5955_v53  ;;  %v5982_v15 = vcombine.low %v482_v61, %v492_v7  ;;  %v516_v35 = vsel %vm5863_vm2, %v511_v23, %v515_v4  ;;  %v530_v61 = vsel %vm5863_vm2, %v525_v48, %v529_v30  ;;  %v553_v4 = vrot.slane %v551_v51, 5  ;;  %v5654_v23 = vld [vmem:[%s7162_s1 + $0x20] sm:$0xff]   ;;  %v6056_v30 = vld [vmem:[%s5834_s10 + $0x68] sm:$0x1] }
  0x32   : > { %4857 = vmatprep.subr.bf16.mxu1 %v5650_v1  ;;  %v506_v18 = vsel %vm5863_vm2, %v501_v3, %v505_v63  ;;  %v5643_v63 = vld [vmem:[%s7162_s1 + $0x128] sm:$0xff]   ;;  %v6031_v3 = vld [vmem:[%s5834_s10 + $0x5c] sm:$0x1]  ;;  %v6036_v7 = vcombine.low %v6006_v34, %v6016_v45  ;;  %7214 = vst [vmem:[#allocation11_spill] sm:$0xff] %v6039_v8  ;;  %v568_v19 = vrot.slane %v566_v56, 4  ;;  %v581_v29 = vrot.slane %v579_v6, 4 }
  0x33   : > { %7209 = vst [vmem:[#allocation6_spill] sm:$0xff] %v5982_v15  ;;  %4858 = vmatpush3.bf16.msra.mxu1 %v5650_v1  ;;  %v6018_v47 = vcombine.low %v506_v18, %v516_v35  ;;  %v569_v1 = vshll.u32 %v6006_v34, 16  ;;  %7212 = vst [vmem:[#allocation9_spill] sm:$0xff] %v6031_v3  ;;  %v540_v18 = vsel %vm5863_vm2, %v535_v62, %v539_v39  ;;  %v585_v35 = vshll.u32 %v6031_v3, 16  ;;  %v6081_v6 = vld [vmem:[%s5834_s10 + $0x70] sm:$0xf] }
  0x34   : > { %5002 = vmatpush3.bf16.msra.mxu0 %v5635_v27  ;;  %v542_v27 = vshrl.u32 %v5962_v59, 16  ;;  %4859 = vmatprep.subr.bf16.mxu1 %v5651_v22  ;;  %7213 = vst [vmem:[#allocation10_spill] sm:$0xff] %v6036_v7  ;;  %v6052_v25 = vcombine.low %v530_v61, %v540_v18  ;;  %v558_v26 = vor.u32 %v557_v54, %v553_v4  ;;  %7217 = vst [vmem:[#allocation14_spill] sm:$0xff] %v6056_v30 }
  0x35   : > { %5003 = vmatprep.subr.bf16.mxu0 %v5638_v50  ;;  %7211 = vst [vmem:[#allocation8_spill] sm:$0xff] %v6018_v47  ;;  %v571_v21 = vrot.slane %v569_v1, 5  ;;  %v590_v39 = vshrl.u32 %v6039_v8, 16  ;;  %v587_v55 = vrot.slane %v585_v35, 5  ;;  %v5656_v35 = vld [vmem:[%s7162_s1 + $0x28] sm:$0xff]  }
  0x36   : > { %4828 = vmatmul.mubr.bf16.gmra.mrb[4].mxu1 %v5982_v15  ;;  %v544_v44 = vrot.slane %v542_v27, 4  ;;  %7216 = vst [vmem:[#allocation13_spill] sm:$0xff] %v6052_v25  ;;  %v575_v27 = vshll.u32 %v6016_v45, 16  ;;  %v559_v48 = vrot.slane %v558_v26, 4 }
  0x37   : > { %4972 = vmatmul.mubr.bf16.gmra.mrb[4].mxu0 %v5940_v42  ;;  %4860 = vmatpush3.bf16.msra.mxu1 %v5651_v22  ;;  %v6047_v22 = vld [vmem:[%s5834_s10 + $0x64] sm:$0xf]  ;;  %v572_v32 = vor.u32 %v571_v21, %v568_v19  ;;  %v592_v61 = vrot.slane %v590_v39, 4  ;;  %v6092_v21 = vld [vmem:[%s5834_s10 + $0x74] sm:$0x1] }
  0x38   : > { %5004 = vmatpush3.bf16.msra.mxu0 %v5638_v50  ;;  %4975 = vmatprep.mubr.bf16.mxu0 %v5977_v10  ;;  %v547_v50 = vrot.slane %v545_v31, 5  ;;  %7215 = vst [vmem:[#allocation12_spill] sm:$0xff] %v6047_v22  ;;  %v577_v49 = vrot.slane %v575_v27, 5  ;;  %v603_v51 = vshrl.u32 %v6047_v22, 16  ;;  %v6072_v56 = vcombine.low %v6039_v8, %v6047_v22  ;;  %7220 = vst [vmem:[#allocation17_spill] sm:$0xff] %v6092_v21 }
  0x39   : > { %5005 = vmatprep.subr.bf16.mxu0 %v5639_v16  ;;  %4831 = vmatprep.mubr.bf16.mxu1 %v6018_v47  ;;  %v573_v54 = vrot.slane %v572_v32, 4  ;;  %v564_v62 = vsel %vm5863_vm2, %v559_v48, %v563_v5  ;;  %v609_v5 = vshll.u32 %v6056_v30, 16  ;;  %v6096_v32 = vld [vmem:[%s5834_s10 + $0x78] sm:$0xf]  ;;  %v627_v48 = vshrl.u32 %v6081_v6, 16 }
  0x3a   : > { %v548_v0 = vor.u32 %v547_v50, %v544_v44  ;;  %4861 = vmatprep.subr.bf16.mxu1 %v5653_v11  ;;  %v6064_v44 = vld [vmem:[%s5834_s10 + $0x6c] sm:$0xf]  ;;  %v593_v50 = vshll.u32 %v6039_v8, 16  ;;  %7218 = vst [vmem:[#allocation15_spill] sm:$0xff] %v6072_v56  ;;  %v605_v19 = vrot.slane %v603_v51, 4 }
  0x3b   : > { %4862 = vmatpush3.bf16.msra.mxu1 %v5653_v11  ;;  %v578_v18 = vsel %vm5863_vm2, %v573_v54, %v577_v49  ;;  %v611_v39 = vrot.slane %v609_v5, 5  ;;  %v6114_v5 = vld [vmem:[%s5834_s10 + $0x80] sm:$0x1]  ;;  %v6173_v10 = vld [vmem:[%s5834_s10 + $0x9c] sm:$0xf] }
  0x3c   : > { %5006 = vmatpush3.bf16.msra.mxu0 %v5639_v16  ;;  %v549_v16 = vrot.slane %v548_v0, 4  ;;  %v582_v0 = vor.u32 %v581_v29, %v577_v49  ;;  %v595_v1 = vrot.slane %v593_v50, 5  ;;  %4863 = vmatprep.subr.bf16.mxu1 %v5654_v23  ;;  %v6106_v49 = vld [vmem:[%s5834_s10 + $0x7c] sm:$0xf]  ;;  %7222 = vst [vmem:[#allocation19_spill] sm:$0xff] %v6114_v5 }
  0x3d   : > { %5007 = vmatprep.subr.bf16.mxu0 %v5642_v33  ;;  %v6191_v30 = vld [vmem:[%s5834_s10 + $0xa0] sm:$0xf] }
  0x3e   : > { %v554_v31 = vsel %vm5863_vm2, %v549_v16, %v553_v4  ;;  %4832 = vmatmul.mubr.bf16.gmra.mrb[8].mxu1 %v6052_v25  ;;  %v599_v4 = vshll.u32 %v6047_v22, 16  ;;  %v5647_v16 = vld [vmem:[%s7162_s1 + $0x138] sm:$0xff]   ;;  %v583_v26 = vrot.slane %v582_v0, 4  ;;  %v596_v27 = vor.u32 %v595_v1, %v592_v61 }
  0x3f   : > { %4976 = vmatmul.mubr.bf16.gmra.mrb[8].mxu0 %v6013_v41  ;;  %v6083_v11 = vcombine.low %v554_v31, %v564_v62  ;;  %4864 = vmatpush3.bf16.msra.mxu1 %v5654_v23  ;;  %v614_v31 = vshrl.u32 %v6064_v44, 16  ;;  %v617_v23 = vshll.u32 %v6064_v44, 16  ;;  %v6170_v41 = vld [vmem:[%s5834_s10 + $0x98] sm:$0x1] }
  0x40   : > { %5008 = vmatpush3.bf16.msra.mxu0 %v5642_v33  ;;  %4979 = vmatprep.mubr.bf16.mxu0 %v6036_v7  ;;  %v5646_v33 = vld [vmem:[%s7162_s1 + $0x130] sm:$0xff]   ;;  %v601_v29 = vrot.slane %v599_v4, 5  ;;  %v588_v50 = vsel %vm5863_vm2, %v583_v26, %v587_v55  ;;  %v597_v51 = vrot.slane %v596_v27, 4  ;;  %v629_v4 = vrot.slane %v627_v48, 4  ;;  %v5649_v27 = vld [vmem:[%s7162_s1 + $0x140] sm:$0xff]   ;;  %7225 = vst [vmem:[#allocation22_spill] sm:$0xff] %v6170_v41 }
  0x41   : > { %5009 = vmatprep.subr.bf16.mxu0 %v5643_v63  ;;  %7219 = vst [vmem:[#allocation16_spill] sm:$0xff] %v6083_v11  ;;  %4835 = vmatprep.mubr.bf16.mxu1 %v6083_v11  ;;  %v616_v61 = vrot.slane %v614_v31, 4  ;;  %v6110_v62 = vcombine.low %v578_v18, %v588_v50  ;;  %v619_v0 = vrot.slane %v617_v23, 5  ;;  %v5657_v55 = vld [vmem:[%s7162_s1 + $0x30] sm:$0xff]   ;;  %v633_v26 = vshll.u32 %v6092_v21, 16 }
  0x42   : > { %v606_v54 = vor.u32 %v605_v19, %v601_v29  ;;  %4865 = vmatprep.subr.bf16.mxu1 %v5656_v35  ;;  %v602_v19 = vsel %vm5863_vm2, %v597_v51, %v601_v29  ;;  %v638_v31 = vshrl.u32 %v6096_v32, 16  ;;  %v647_v29 = vshll.u32 %v6106_v49, 16  ;;  %v5659_v51 = vld [vmem:[%s7162_s1 + $0x38] sm:$0xff]  }
  0x43   : > { %7221 = vst [vmem:[#allocation18_spill] sm:$0xff] %v6110_v62  ;;  %4866 = vmatpush3.bf16.msra.mxu1 %v5656_v35  ;;  %v620_v35 = vor.u32 %v619_v0, %v616_v61  ;;  %v651_v50 = vshrl.u32 %v6106_v49, 16 }
  0x44   : > { %5010 = vmatpush3.bf16.msra.mxu0 %v5643_v63  ;;  %v623_v63 = vshll.u32 %v6081_v6, 16  ;;  %v607_v18 = vrot.slane %v606_v54, 4  ;;  %v640_v48 = vrot.slane %v638_v31, 4  ;;  %4867 = vmatprep.subr.bf16.mxu1 %v5657_v55  ;;  %v662_v31 = vshrl.u32 %v6117_v9, 16 }
  0x45   : > { %5011 = vmatprep.subr.bf16.mxu0 %v5646_v33  ;;  %v621_v61 = vrot.slane %v620_v35, 4  ;;  %v6152_v35 = vld [vmem:[%s5834_s10 + $0x8c] sm:$0x1] }
  0x46   : > { %v625_v1 = vrot.slane %v623_v63, 5  ;;  %4836 = vmatmul.mubr.bf16.gmra.mrb[12].mxu1 %v6110_v62  ;;  %v635_v63 = vrot.slane %v633_v26, 5  ;;  %v6143_v26 = vld [vmem:[%s5834_s10 + $0x88] sm:$0xf]  ;;  %7224 = vst [vmem:[#allocation21_spill] sm:$0xff] %v6152_v35 }
  0x47   : > { %4980 = vmatmul.mubr.bf16.gmra.mrb[12].mxu0 %v6072_v56  ;;  %4868 = vmatpush3.bf16.msra.mxu1 %v5657_v55  ;;  %v649_v56 = vrot.slane %v647_v29, 5  ;;  %v6159_v29 = vld [vmem:[%s5834_s10 + $0x90] sm:$0xf]  ;;  %v675_v7 = vshrl.u32 %v6143_v26, 16 }
  0x48   : > { %5012 = vmatpush3.bf16.msra.mxu0 %v5646_v33  ;;  %5015 = vmatprep.mubr.bf16.mxu0 %v5913_v13  ;;  %v630_v23 = vor.u32 %v629_v4, %v625_v1  ;;  %v641_v33 = vshll.u32 %v6096_v32, 16  ;;  %v612_v13 = vsel %vm5863_vm2, %v607_v18, %v611_v39  ;;  %v653_v39 = vrot.slane %v651_v50, 4 }
  0x49   : > { %5013 = vmatprep.subr.bf16.mxu0 %v5647_v16  ;;  %v6139_v54 = vcombine.low %v602_v19, %v612_v13  ;;  %v657_v18 = vshll.u32 %v6114_v5, 16  ;;  %4869 = vmatprep.subr.bf16.mxu1 %v5659_v51  ;;  %v626_v19 = vsel %vm5863_vm2, %v621_v61, %v625_v1  ;;  %v664_v61 = vrot.slane %v662_v31, 4 }
  0x4a   : > { %v631_v0 = vrot.slane %v630_v23, 4  ;;  %v643_v4 = vrot.slane %v641_v33, 5  ;;  %v665_v23 = vshll.u32 %v6117_v9, 16  ;;  %v5652_v33 = vld [vmem:[%s7162_s1 + $0x148] sm:$0xff]   ;;  %v654_v1 = vor.u32 %v653_v39, %v649_v56  ;;  %v5655_v39 = vld [vmem:[%s7162_s1 + $0x150] sm:$0xff]  }
  0x4b   : > { %7223 = vst [vmem:[#allocation20_spill] sm:$0xff] %v6139_v54  ;;  %4839 = vmatprep.mubr.bf16.mxu1 %v6139_v54  ;;  %v659_v50 = vrot.slane %v657_v18, 5  ;;  %4870 = vmatpush3.bf16.msra.mxu1 %v5659_v51  ;;  %v681_v31 = vshll.u32 %v6152_v35, 16  ;;  %v677_v51 = vrot.slane %v675_v7, 4 }
  0x4c   : > { %5014 = vmatpush3.bf16.msra.mxu0 %v5647_v16  ;;  %v636_v55 = vsel %vm5863_vm2, %v631_v0, %v635_v63  ;;  %v644_v16 = vor.u32 %v643_v4, %v640_v48  ;;  %v6164_v63 = vld [vmem:[%s5834_s10 + $0x94] sm:$0xf]  ;;  %v667_v0 = vrot.slane %v665_v23, 5  ;;  %v671_v4 = vshll.u32 %v6143_v26, 16 }
  0x4d   : > { %5047 = vmatprep.subr.bf16.mxu0 %v5649_v27  ;;  %v6161_v13 = vcombine.low %v626_v19, %v636_v55  ;;  %v655_v18 = vrot.slane %v654_v1, 4  ;;  %v686_v19 = vshrl.u32 %v6159_v29, 16  ;;  %v689_v55 = vshll.u32 %v6159_v29, 16 }
  0x4e   : > { %v645_v48 = vrot.slane %v644_v16, 4  ;;  %v668_v23 = vor.u32 %v667_v0, %v664_v61  ;;  %v683_v1 = vrot.slane %v681_v31, 5  ;;  %v695_v21 = vshll.u32 %v6164_v63, 16  ;;  %v5658_v0 = vld [vmem:[%s7162_s1 + $0x158] sm:$0xff]   ;;  %v6212_v31 = vld [vmem:[%s7162_s1 + $0x80] sm:$0xff]  }
  0x4f   : > { %5016 = vmatmul.mubr.bf16.vlgmr.msra.gmra.mrb[0].mxu0 %v5955_v53  ;;  %4840 = vmatmul.mubr.bf16.gmra.mrb[16].mxu1 %v6161_v13  ;;  %v673_v53 = vrot.slane %v671_v4, 5  ;;  %v691_v35 = vrot.slane %v689_v55, 5  ;;  %v699_v7 = vshrl.u32 %v6164_v63, 16  ;;  %v705_v61 = vshll.u32 %v6170_v41, 16  ;;  %v6234_v41 = vld [vmem:[%s5834_s10 + $0xb4] sm:$0xf] }
  0x50   : > { %5048 = vmatpush3.bf16.msra.mxu0 %v5649_v27  ;;  %5019 = vmatprep.mubr.bf16.mxu0 %v5982_v15  ;;  %v650_v16 = vsel %vm5863_vm2, %v645_v48, %v649_v56  ;;  %v660_v27 = vsel %vm5863_vm2, %v655_v18, %v659_v50  ;;  %v688_v15 = vrot.slane %v686_v19, 4  ;;  %v669_v5 = vrot.slane %v668_v23, 4  ;;  %v6196_v50 = vld [vmem:[%s5834_s10 + $0xa4] sm:$0x1]  ;;  %v6207_v18 = vld [vmem:[%s5834_s10 + $0xa8] sm:$0xf] }
  0x51   : > { %5049 = vmatprep.subr.bf16.mxu0 %v5652_v33  ;;  %v6187_v42 = vcombine.low %v650_v16, %v660_v27  ;;  %v678_v20 = vor.u32 %v677_v51, %v673_v53  ;;  %7226 = vst [vmem:[#allocation23_spill] sm:$0xff] %v6196_v50  ;;  %v710_v48 = vshrl.u32 %v6173_v10, 16  ;;  %v701_v55 = vrot.slane %v699_v7, 4  ;;  %v6215_v51 = vld [vmem:[%s5834_s10 + $0xac] sm:$0xf]  ;;  %4903 = vmatprep.subr.bf16.mxu1 %v6212_v31 }
  0x52   : > { %v692_v56 = vor.u32 %v691_v35, %v688_v15  ;;  %v674_v4 = vsel %vm5863_vm2, %v669_v5, %v673_v53  ;;  %v697_v15 = vrot.slane %v695_v21, 5  ;;  %v713_v35 = vshll.u32 %v6173_v10, 16  ;;  %v6223_v27 = vld [vmem:[%s5834_s10 + $0xb0] sm:$0x1] }
  0x53   : > { %4843 = vmatprep.mubr.bf16.mxu1 %v6187_v42  ;;  %v707_v16 = vrot.slane %v705_v61, 5  ;;  %v712_v23 = vrot.slane %v710_v48, 4  ;;  %v719_v21 = vshll.u32 %v6191_v30, 16  ;;  %v723_v5 = vshrl.u32 %v6191_v30, 16 }
  0x54   : > { %5050 = vmatpush3.bf16.msra.mxu0 %v5652_v33  ;;  %v679_v33 = vrot.slane %v678_v20, 4  ;;  %v693_v19 = vrot.slane %v692_v56, 4  ;;  %v715_v53 = vrot.slane %v713_v35, 5  ;;  %v702_v61 = vor.u32 %v701_v55, %v697_v15 }
  0x55   : > { %5051 = vmatprep.subr.bf16.mxu0 %v5655_v39  ;;  %v725_v35 = vrot.slane %v723_v5, 4  ;;  %v737_v55 = vshll.u32 %v6207_v18, 16  ;;  %v747_v5 = vshrl.u32 %v6215_v51, 16 }
  0x56   : > { %v684_v20 = vsel %vm5863_vm2, %v679_v33, %v683_v1  ;;  %v698_v7 = vsel %vm5863_vm2, %v693_v19, %v697_v15  ;;  %v729_v1 = vshll.u32 %v6196_v50, 16  ;;  %v716_v48 = vor.u32 %v715_v53, %v712_v23  ;;  %v6243_v23 = vld [vmem:[%s5834_s10 + $0xb8] sm:$0xf] }
  0x57   : > { %5020 = vmatmul.mubr.bf16.gmra.mrb[4].mxu0 %v6018_v47  ;;  %v6226_v56 = vcombine.low %v674_v4, %v684_v20  ;;  %v721_v33 = vrot.slane %v719_v21, 5  ;;  %v734_v47 = vshrl.u32 %v6207_v18, 16  ;;  %v5661_v4 = vld [vmem:[%s7162_s1 + $0x160] sm:$0xff]   ;;  %v703_v15 = vrot.slane %v702_v61, 4 }
  0x58   : > { %5023 = vmatprep.mubr.bf16.mxu0 %v6052_v25  ;;  %5052 = vmatpush3.bf16.msra.mxu0 %v5655_v39  ;;  %v731_v19 = vrot.slane %v729_v1, 5  ;;  %v743_v39 = vshll.u32 %v6215_v51, 16  ;;  %v717_v20 = vrot.slane %v716_v48, 4  ;;  %v739_v50 = vrot.slane %v737_v55, 5  ;;  %v6250_v1 = vld [vmem:[%s5834_s10 + $0xbc] sm:$0x1] }
  0x59   : > { %5053 = vmatprep.subr.bf16.mxu0 %v5658_v0  ;;  %4844 = vmatmul.mubr.bf16.gmra.mrb[20].mxu1 %v6226_v56  ;;  %v726_v53 = vor.u32 %v725_v35, %v721_v33  ;;  %v736_v21 = vrot.slane %v734_v47, 4  ;;  %v708_v25 = vsel %vm5863_vm2, %v703_v15, %v707_v16  ;;  %v753_v61 = vshll.u32 %v6223_v27, 16  ;;  %7227 = vst [vmem:[#allocation24_spill] sm:$0xff] %v6250_v1  ;;  %v5662_v48 = vld [vmem:[%s7162_s1 + $0x168] sm:$0xff]  }
  0x5a   : > { %v745_v22 = vrot.slane %v743_v39, 5  ;;  %v6255_v35 = vcombine.low %v698_v7, %v708_v25  ;;  %v722_v47 = vsel %vm5863_vm2, %v717_v20, %v721_v33  ;;  %v749_v3 = vrot.slane %v747_v5, 4 }
  0x5b   : > { %v727_v8 = vrot.slane %v726_v53, 4  ;;  %v740_v16 = vor.u32 %v739_v50, %v736_v21  ;;  %v755_v15 = vrot.slane %v753_v61, 5  ;;  %v758_v55 = vshrl.u32 %v6234_v41, 16 }
  0x5c   : > { %5054 = vmatpush3.bf16.msra.mxu0 %v5658_v0  ;;  %v761_v39 = vshll.u32 %v6234_v41, 16  ;;  %4847 = vmatprep.mubr.bf16.mxu1 %v6255_v35  ;;  %v750_v25 = vor.u32 %v749_v3, %v745_v22  ;;  %v767_v7 = vshll.u32 %v6243_v23, 16  ;;  %v771_v33 = vshrl.u32 %v6243_v23, 16 }
  0x5d   : > { %5055 = vmatprep.subr.bf16.mxu0 %v5661_v4  ;;  %v732_v0 = vsel %vm5863_vm2, %v727_v8, %v731_v19  ;;  %v741_v50 = vrot.slane %v740_v16, 4  ;;  %v760_v53 = vrot.slane %v758_v55, 4  ;;  %v5663_v8 = vld [vmem:[%s7162_s1 + $0x170] sm:$0xff]   ;;  %v777_v61 = vshll.u32 %v6250_v1, 16 }
  0x5e   : > { %v6267_v20 = vcombine.low %v722_v47, %v732_v0  ;;  %v763_v21 = vrot.slane %v761_v39, 5  ;;  %v751_v19 = vrot.slane %v750_v25, 4  ;;  %v769_v3 = vrot.slane %v767_v7, 5  ;;  %v6275_v47 = vld [vmem:[%s5834_s10 + $0xc0] sm:$0xf] }
  0x5f   : > { %5024 = vmatmul.mubr.bf16.gmra.mrb[8].mxu0 %v6083_v11  ;;  %v773_v5 = vrot.slane %v771_v33, 4  ;;  %v1411_v16 = vrot.slane %v5871_v43, 5  ;;  %v6282_v39 = vld [vmem:[%s5834_s10 + $0xc4] sm:$0xf]  ;;  %v2094_v0 = vshrl.u32 %v6275_v47, 16  ;;  %v779_v33 = vrot.slane %v777_v61, 5 }
  0x60   : > { %5027 = vmatprep.mubr.bf16.mxu0 %v6110_v62  ;;  %5056 = vmatpush3.bf16.msra.mxu0 %v5661_v4  ;;  %v746_v4 = vsel %vm5863_vm2, %v741_v50, %v745_v22  ;;  %v764_v55 = vor.u32 %v763_v21, %v760_v53  ;;  %7228 = vst [vmem:[#allocation25_spill] sm:$0xff] %v6282_v39  ;;  %v6288_v62 = vld [vmem:[%s5834_s10 + $0xc8] sm:$0x1]  ;;  %v2097_v11 = vshll.u32 %v6275_v47, 16  ;;  %v2103_v50 = vshll.u32 %v6282_v39, 16 }
  0x61   : > { %5057 = vmatprep.subr.bf16.mxu0 %v5662_v48  ;;  %4848 = vmatmul.mubr.bf16.gmra.mrb[24].mxu1 %v6267_v20  ;;  %v756_v25 = vsel %vm5863_vm2, %v751_v19, %v755_v15  ;;  %v774_v7 = vor.u32 %v773_v5, %v769_v3  ;;  %v2096_v22 = vrot.slane %v2094_v0, 4  ;;  %v2107_v15 = vshrl.u32 %v6282_v39, 16  ;;  %v5664_v19 = vld [vmem:[%s7162_s1 + $0x178] sm:$0xff]   ;;  %v6316_v0 = vld [vmem:[%s5834_s10 + $0x4] sm:$0xf] }
  0x62   : > { %v6291_v43 = vcombine.low %v746_v4, %v756_v25  ;;  %v765_v1 = vrot.slane %v764_v55, 4  ;;  %v2099_v21 = vrot.slane %v2097_v11, 5  ;;  %v1413_v5 = vrot.slane %v1411_v16, 4  ;;  %7232 = vst [vmem:[#allocation27_spill] sm:$0xff] %v6316_v0 }
  0x63   : > { %v775_v53 = vrot.slane %v774_v7, 4  ;;  %v1414_v61 = vrot.slane %v5886_v57, 5  ;;  %v1404_v11 = vrot.slane %v5850_v24, 5  ;;  %v6313_v57 = vld [vmem:[%s5834_s10] sm:$0xf]  ;;  %v6328_v7 = vrot.slane %v2103_v50, 5 }
  0x64   : > { %5058 = vmatpush3.bf16.msra.mxu0 %v5662_v48  ;;  %4851 = vmatprep.mubr.bf16.mxu1 %v6291_v43  ;;  %v770_v48 = vsel %vm5863_vm2, %v765_v1, %v769_v3  ;;  %7231 = vst [vmem:[#allocation26_spill] sm:$0xff] %v6313_v57  ;;  %v4290_v1 = vcombine.low %v6313_v57, %v6316_v0  ;;  %v6323_v3 = vld [vmem:[%s7162_s1 + $0x180] sm:$0xff]   ;;  %v7233_v39 = vrot.slane %v5859_v37, 9 }
  0x65   : > { %5059 = vmatprep.subr.bf16.mxu0 %v5663_v8  ;;  %v780_v55 = vsel %vm5863_vm2, %v775_v53, %v779_v33  ;;  %v2100_v24 = vor.u32 %v2099_v21, %v2096_v22  ;;  %v2113_v33 = vshll.u32 %v6288_v62, 16  ;;  %v2109_v53 = vrot.slane %v2107_v15, 4  ;;  %v5725_v22 = vld [vmem:[%s5834_s10 + $0x14] sm:$0x1] }
  0x66   : > { %v6325_v25 = vcombine.low %v770_v48, %v780_v55  ;;  %v6334_v0 = vcombine.low %v6064_v44, %v6081_v6  ;;  %v1412_v48 = vsel %vm6304_vm5, %v7233_v39, %v1411_v16  ;;  %v1407_v50 = vrot.slane %v5725_v22, 5 }
  0x67   : > { %5028 = vmatmul.mubr.bf16.gmra.mrb[12].mxu0 %v6139_v54  ;;  %v5724_v54 = vld [vmem:[%s5834_s10 + $0xc] sm:$0xf]  ;;  %v1415_v21 = vsel %vm6304_vm5, %v1413_v5, %v1414_v61  ;;  %v6350_v55 = vrot.slane %v2100_v24, 4  ;;  %v6352_v37 = vrot.slane %v2113_v33, 5  ;;  %v6356_v16 = vcombine.low %v6117_v9, %v6143_v26 }
  0x68   : > { %5031 = vmatprep.mubr.bf16.mxu0 %v6161_v13  ;;  %5060 = vmatpush3.bf16.msra.mxu0 %v5663_v8  ;;  %v4315_v57 = vrot.slane %v5724_v54, 9  ;;  %v1406_v8 = vrot.slane %v1404_v11, 4  ;;  %v6346_v54 = vcombine.low %v6096_v32, %v6106_v49  ;;  %v6348_v15 = vcombine.low %v1412_v48, %v1415_v21 }
  0x69   : > { %5061 = vmatprep.subr.bf16.mxu0 %v5664_v19  ;;  %4852 = vmatmul.mubr.bf16.gmra.mrb[28].mxu1 %v6325_v25  ;;  %v4318_v39 = vrot.slane %v5911_v12, 9  ;;  %v2110_v5 = vor.u32 %v2109_v53, %v6328_v7  ;;  %v1425_v61 = vrot.slane %v5917_v17, 5  ;;  %v6365_v24 = vcombine.low %v6159_v29, %v6164_v63  ;;  %v5668_v17 = vld [vmem:[%s7162_s1 + $0x88] sm:$0xff]  }
  0x6a   : > { %4871 = vmatprep.mubr.bf16.mxu1 %v4290_v1  ;;  %v1428_v1 = vrot.slane %v5931_v36, 5  ;;  %v1408_v33 = vsel %vm6304_vm5, %v1406_v8, %v1407_v50  ;;  %v4319_v53 = vrot.slane %v5943_v46, 9  ;;  %v1432_v22 = vrot.slane %v5953_v52, 5  ;;  %v7241_v12 = vld [vmem:[#allocation3_spill] sm:$0xff] }
  0x6b   : > { %v1426_v36 = vsel %vm6304_vm5, %v4318_v39, %v1425_v61  ;;  %v1427_v48 = vrot.slane %v1425_v61, 4  ;;  %v2106_v46 = vsel %vm5863_vm2, %v6350_v55, %v6328_v7  ;;  %v4320_v8 = vrot.slane %v5962_v59, 9 }
  0x6c   : > { %5062 = vmatpush3.bf16.msra.mxu0 %v5664_v19  ;;  %v1405_v19 = vsel %vm6304_vm5, %v4315_v57, %v1404_v11  ;;  %v1435_v11 = vrot.slane %v5959_v58, 5  ;;  %v6388_v57 = vcombine.low %v6173_v10, %v6191_v30  ;;  %v1439_v50 = vrot.slane %v5980_v14, 5 }
  0x6d   : > { %5095 = vmatprep.subr.bf16.mxu0 %v6323_v3  ;;  %v2111_v21 = vrot.slane %v2110_v5, 4  ;;  %v1429_v52 = vsel %vm6304_vm5, %v1427_v48, %v1428_v1  ;;  %v1433_v58 = vsel %vm6304_vm5, %v4319_v53, %v1432_v22  ;;  %v1434_v39 = vrot.slane %v1432_v22, 4 }
  0x6e   : > { %v6397_v61 = vcombine.low %v1426_v36, %v1429_v52  ;;  %v1440_v7 = vsel %vm6304_vm5, %v4320_v8, %v1439_v50  ;;  %v1441_v55 = vrot.slane %v1439_v50, 4  ;;  %v1442_v59 = vrot.slane %v5996_v28, 5  ;;  %v5671_v28 = vld [vmem:[%s7162_s1 + $0x90] sm:$0xff]   ;;  %v7234_v36 = vld [vmem:[#allocation9_spill] sm:$0xff]  ;;  %v7235_v8 = vld [vmem:[#allocation11_spill] sm:$0xff] }
  0x6f   : > { %5032 = vmatmul.mubr.bf16.gmra.mrb[16].mxu0 %v6187_v42  ;;  %v1436_v14 = vsel %vm6304_vm5, %v1434_v39, %v1435_v11  ;;  %v6408_v5 = vcombine.low %v6207_v18, %v6215_v51  ;;  %v1446_v1 = vrot.slane %v6016_v45, 5  ;;  %v1449_v48 = vrot.slane %v7234_v36, 5 }
  0x70   : > { %5035 = vmatprep.mubr.bf16.mxu0 %v6226_v56  ;;  %v6415_v53 = vcombine.low %v1433_v58, %v1436_v14  ;;  %v6422_v22 = vcombine.low %v6234_v41, %v6243_v23  ;;  %v4322_v50 = vrot.slane %v7235_v8, 9  ;;  %v6429_v52 = vcombine.low %v1405_v19, %v1408_v33  ;;  %v6432_v58 = vld [vmem:[%s5834_s10 + $0x28] sm:$0xf]  ;;  %v7237_v14 = vld [vmem:[#allocation14_spill] sm:$0xff]  ;;  %v7238_v33 = vld [vmem:[#allocation17_spill] sm:$0xff] }
  0x71   : > { %4872 = vmatmul.mubr.bf16.vlgmr.msra.gmra.mrb[0].mxu1 %v5868_v40  ;;  %v4321_v40 = vrot.slane %v6006_v34, 9  ;;  %v1448_v45 = vrot.slane %v1446_v1, 4  ;;  %v1418_v39 = vrot.slane %v6432_v58, 5  ;;  %v1456_v36 = vrot.slane %v7237_v14, 5 }
  0x72   : > { %4875 = vmatprep.mubr.bf16.mxu1 %v5898_v2  ;;  %4904 = vmatpush3.bf16.msra.mxu1 %v6212_v31  ;;  %v1443_v31 = vsel %vm6304_vm5, %v1441_v55, %v1442_v59  ;;  %v7236_v55 = vld [vmem:[#allocation12_spill] sm:$0xff]  ;;  %v1460_v19 = vrot.slane %v6081_v6, 5  ;;  %v6455_v6 = vld [vmem:[%s5834_s10 + $0x2c] sm:$0x1] }
  0x73   : > { %4905 = vmatprep.subr.bf16.mxu1 %v5668_v17  ;;  %v6424_v11 = vcombine.low %v1440_v7, %v1443_v31  ;;  %v1447_v34 = vsel %vm6304_vm5, %v4321_v40, %v1446_v1  ;;  %v1453_v59 = vrot.slane %v7236_v55, 5  ;;  %v1450_v7 = vsel %vm6304_vm5, %v1448_v45, %v1449_v48 }
  0x74   : > { %v4323_v40 = vrot.slane %v6064_v44, 9  ;;  %v1463_v1 = vrot.slane %v7238_v33, 5  ;;  %v2116_v31 = vsel %vm5863_vm2, %v2111_v21, %v6352_v37  ;;  %v6450_v8 = vcombine.low %v1447_v34, %v1450_v7  ;;  %v7239_v21 = vld [vmem:[#allocation2_spill] sm:$0xff]  ;;  %v7240_v33 = vld [vmem:[#allocation19_spill] sm:$0xff] }
  0x75   : > { %v1454_v44 = vsel %vm6304_vm5, %v4322_v50, %v1453_v59  ;;  %v1455_v48 = vrot.slane %v1453_v59, 4  ;;  %v1462_v14 = vrot.slane %v1460_v19, 4  ;;  %v4324_v37 = vrot.slane %v6096_v32, 9  ;;  %v5676_v32 = vld [vmem:[%s7162_s1 + $0xa0] sm:$0xff]  }
  0x76   : > { %4906 = vmatpush3.bf16.msra.mxu1 %v5668_v17  ;;  %v5673_v17 = vld [vmem:[%s7162_s1 + $0x98] sm:$0xff]   ;;  %v1461_v55 = vsel %vm6304_vm5, %v4323_v40, %v1460_v19  ;;  %v1467_v7 = vrot.slane %v6106_v49, 5  ;;  %v1470_v50 = vrot.slane %v7240_v33, 5  ;;  %v4325_v59 = vrot.slane %v6117_v9, 9  ;;  %v7243_v33 = vld [vmem:[#allocation22_spill] sm:$0xff] }
  0x77   : > { %5036 = vmatmul.mubr.bf16.gmra.mrb[20].mxu0 %v6255_v35  ;;  %4907 = vmatprep.subr.bf16.mxu1 %v5671_v28  ;;  %v1457_v34 = vsel %vm6304_vm5, %v1455_v48, %v1456_v36  ;;  %v6468_v45 = vcombine.low %v2106_v46, %v2116_v31  ;;  %v1464_v36 = vsel %vm6304_vm5, %v1462_v14, %v1463_v1  ;;  %v1474_v49 = vrot.slane %v6143_v26, 5  ;;  %v7242_v48 = vld [vmem:[#allocation21_spill] sm:$0xff]  ;;  %v5678_v26 = vld [vmem:[%s7162_s1 + $0xa8] sm:$0xff]  }
  0x78   : > { %5039 = vmatprep.mubr.bf16.mxu0 %v6267_v20  ;;  %v6473_v40 = vcombine.low %v1454_v44, %v1457_v34  ;;  %v6480_v19 = vrot.slane %v1418_v39, 4  ;;  %v6482_v9 = vcombine.low %v1461_v55, %v1464_v36  ;;  %v1468_v46 = vsel %vm6304_vm5, %v4324_v37, %v1467_v7 }
  0x79   : > { %4876 = vmatmul.mubr.bf16.gmra.mrb[4].mxu1 %v7239_v21  ;;  %v1475_v31 = vsel %vm6304_vm5, %v4325_v59, %v1474_v49  ;;  %v1476_v44 = vrot.slane %v1474_v49, 4  ;;  %v1477_v34 = vrot.slane %v7242_v48, 5  ;;  %v4326_v1 = vrot.slane %v6159_v29, 9  ;;  %v7244_v49 = vld [vmem:[#allocation23_spill] sm:$0xff] }
  0x7a   : > { %4879 = vmatprep.mubr.bf16.mxu1 %v7241_v12  ;;  %4908 = vmatpush3.bf16.msra.mxu1 %v5671_v28  ;;  %v1469_v28 = vrot.slane %v1467_v7, 4  ;;  %v1481_v14 = vrot.slane %v6164_v63, 5  ;;  %v1484_v37 = vrot.slane %v7243_v33, 5  ;;  %v4327_v7 = vrot.slane %v6173_v10, 9 }
  0x7b   : > { %4909 = vmatprep.subr.bf16.mxu1 %v5673_v17  ;;  %v1478_v29 = vsel %vm6304_vm5, %v1476_v44, %v1477_v34  ;;  %v1488_v36 = vrot.slane %v6191_v30, 5  ;;  %v1491_v48 = vrot.slane %v7244_v49, 5  ;;  %v1495_v44 = vrot.slane %v6215_v51, 5  ;;  %v7245_v34 = vld [vmem:[#allocation5_spill] sm:$0xff]  ;;  %v5681_v51 = vld [vmem:[%s7162_s1 + $0xb0] sm:$0xff]  }
  0x7c   : > { %v1471_v55 = vsel %vm6304_vm5, %v1469_v28, %v1470_v50  ;;  %v6506_v63 = vcombine.low %v1475_v31, %v1478_v29  ;;  %v1482_v10 = vsel %vm6304_vm5, %v4326_v1, %v1481_v14  ;;  %v1483_v50 = vrot.slane %v1481_v14, 4  ;;  %v7246_v14 = vld [vmem:[#allocation24_spill] sm:$0xff] }
  0x7d   : > { %v6499_v59 = vcombine.low %v1468_v46, %v1471_v55  ;;  %v1489_v46 = vsel %vm6304_vm5, %v4327_v7, %v1488_v36  ;;  %v1490_v28 = vrot.slane %v1488_v36, 4  ;;  %v1498_v30 = vrot.slane %v6223_v27, 5 }
  0x7e   : > { %4910 = vmatpush3.bf16.msra.mxu1 %v5673_v17  ;;  %v4328_v17 = vrot.slane %v6207_v18, 9  ;;  %v1485_v31 = vsel %vm6304_vm5, %v1483_v50, %v1484_v37  ;;  %v4329_v55 = vrot.slane %v6234_v41, 9  ;;  %v1502_v1 = vrot.slane %v6243_v23, 5  ;;  %v7247_v18 = vld [vmem:[#allocation7_spill] sm:$0xff] }
  0x7f   : > { %5040 = vmatmul.mubr.bf16.gmra.mrb[24].mxu0 %v6291_v43  ;;  %4911 = vmatprep.subr.bf16.mxu1 %v5676_v32  ;;  %v1505_v33 = vrot.slane %v7246_v14, 5  ;;  %v6525_v7 = vcombine.low %v1482_v10, %v1485_v31  ;;  %v1492_v27 = vsel %vm6304_vm5, %v1490_v28, %v1491_v48  ;;  %v1497_v41 = vrot.slane %v1495_v44, 4  ;;  %v7248_v10 = vld [vmem:[#allocation25_spill] sm:$0xff] }
  0x80   : > { %5043 = vmatprep.mubr.bf16.mxu0 %v6325_v25  ;;  %v1496_v37 = vsel %vm6304_vm5, %v4328_v17, %v1495_v44  ;;  %v6531_v23 = vcombine.low %v1489_v46, %v1492_v27  ;;  %v1503_v29 = vsel %vm6304_vm5, %v4329_v55, %v1502_v1  ;;  %v4420_v36 = vrot.slane %v6275_v47, 9  ;;  %v5683_v44 = vld [vmem:[%s7162_s1 + $0xb8] sm:$0xff]  }
  0x81   : > { %4880 = vmatmul.mubr.bf16.gmra.mrb[8].mxu1 %v7245_v34  ;;  %v1499_v49 = vsel %vm6304_vm5, %v1497_v41, %v1498_v30  ;;  %v2382_v50 = vrot.slane %v7248_v10, 5  ;;  %v2385_v48 = vrot.slane %v6288_v62, 5  ;;  %v6542_v17 = vcombine.low %v6275_v47, %v7248_v10 }
  0x82   : > { %4883 = vmatprep.mubr.bf16.mxu1 %v7247_v18  ;;  %4912 = vmatpush3.bf16.msra.mxu1 %v5676_v32  ;;  %v1504_v32 = vrot.slane %v1502_v1, 4  ;;  %v6544_v28 = vcombine.low %v1496_v37, %v1499_v49  ;;  %v7249_v47 = vrot.slane %v5891_v60, 9  ;;  %v7250_v55 = vrot.slane %v6455_v6, 5  ;;  %v7252_v37 = vld [vmem:[#allocation15_spill] sm:$0xff]  ;;  %v5728_v6 = vld [vmem:[%s7162_s1 + $0xc0] sm:$0xff]  }
  0x83   : > { %4913 = vmatprep.subr.bf16.mxu1 %v5678_v26  ;;  %v2383_v62 = vsel %vm6304_vm5, %v4420_v36, %v2382_v50  ;;  %v2384_v31 = vrot.slane %v2382_v50, 4  ;;  %v5672_v60 = vld [vmem:[%s7162_s1 + $0x188] sm:$0xff]   ;;  %v7254_v49 = vld [vmem:[#allocation26_spill] sm:$0xff] }
  0x84   : > { %v1506_v46 = vsel %vm6304_vm5, %v1504_v32, %v1505_v33  ;;  %v1422_v1 = vsel %vm6304_vm5, %v6480_v19, %v7250_v55  ;;  %v7251_v33 = vld [vmem:[#allocation10_spill] sm:$0xff]  ;;  %v5682_v19 = vld [vmem:[%s7162_s1 + $0x198] sm:$0xff]   ;;  %v5729_v32 = vld [vmem:[%s5834_s10 + $0x8] sm:$0x1]  ;;  %v4314_v10 = vrot.slane %v7254_v49, 9 }
  0x85   : > { %v6552_v30 = vcombine.low %v1503_v29, %v1506_v46  ;;  %v2386_v14 = vsel %vm6304_vm5, %v2384_v31, %v2385_v48  ;;  %v5685_v29 = vld [vmem:[%s7162_s1 + $0x1a8] sm:$0xff]   ;;  %v1400_v36 = vrot.slane %v5729_v32, 5  ;;  %v5686_v48 = vld [vmem:[%s7162_s1 + $0x1b0] sm:$0xff]   ;;  %v7260_v32 = vld [vmem:[#allocation18_spill] sm:$0xff] }
  0x86   : > { %4914 = vmatpush3.bf16.msra.mxu1 %v5678_v26  ;;  %v1419_v26 = vsel %vm6304_vm5, %v7249_v47, %v1418_v39  ;;  %v6571_v27 = vcombine.low %v2383_v62, %v2386_v14  ;;  %v5677_v39 = vld [vmem:[%s7162_s1 + $0x190] sm:$0xff]   ;;  %v5687_v62 = vld [vmem:[%s7162_s1 + $0x1b8] sm:$0xff]   ;;  %v5688_v47 = vld [vmem:[%s7162_s1 + $0x1c0] sm:$0xff]  }
  0x87   : > { %5044 = vmatmul.mubr.bf16.gmra.mrb[28].mxu0 %v6468_v45  ;;  %4915 = vmatprep.subr.bf16.mxu1 %v5681_v51  ;;  %v6577_v58 = vcombine.low %v1419_v26, %v1422_v1  ;;  %v5730_v26 = vld [vmem:[%s7162_s1 + $0xc8] sm:$0xff]   ;;  %v5731_v55 = vld [vmem:[%s7162_s1 + $0xd0] sm:$0xff]   ;;  %v5733_v1 = vld [vmem:[%s7162_s1 + $0xe0] sm:$0xff]  }
  0x88   : > { %5063 = vmatprep.mubr.bf16.mxu0 %v6429_v52  ;;  %v5734_v14 = vld [vmem:[%s7162_s1 + $0xe8] sm:$0xff]   ;;  %v5704_v49 = vld [vmem:[%s7162_s1 + $0x230] sm:$0xff]  }
  0x89   : > { %4884 = vmatmul.mubr.bf16.gmra.mrb[12].mxu1 %v7251_v33 }
  0x8a   : > { %4887 = vmatprep.mubr.bf16.mxu1 %v7252_v37  ;;  %4916 = vmatpush3.bf16.msra.mxu1 %v5681_v51  ;;  %v7253_v51 = vld [vmem:[#allocation27_spill] sm:$0xff] }
  0x8b   : > { %4917 = vmatprep.subr.bf16.mxu1 %v5683_v44  ;;  %v1397_v41 = vrot.slane %v7253_v51, 5  ;;  %v7259_v51 = vld [vmem:[#allocation16_spill] sm:$0xff] }
  0x8d   : > { %v1399_v50 = vrot.slane %v1397_v41, 4  ;;  %v1398_v46 = vsel %vm6304_vm5, %v4314_v10, %v1397_v41  ;;  %v5702_v41 = vld [vmem:[%s7162_s1 + $0x220] sm:$0xff]   ;;  %v5705_v10 = vld [vmem:[%s7162_s1 + $0x238] sm:$0xff]  }
  0x8e   : > { %4918 = vmatpush3.bf16.msra.mxu1 %v5683_v44 }
  0x8f   : > { %5064 = vmatmul.mubr.bf16.vlgmr.msra.gmra.mrb[0].mxu0 %v6348_v15  ;;  %5335 = vmatprep.subr.bf16.mxu1 %v5728_v6  ;;  %v1401_v44 = vsel %vm6304_vm5, %v1399_v50, %v1400_v36  ;;  %v7261_v36 = vld [vmem:[#allocation20_spill] sm:$0xff] }
  0x90   : > { %5096 = vmatpush3.bf16.msra.mxu0 %v6323_v3  ;;  %5067 = vmatprep.mubr.bf16.mxu0 %v6577_v58  ;;  %v5684_v3 = vld [vmem:[%s7162_s1 + $0x1a0] sm:$0xff]   ;;  %v4346_v31 = vcombine.low %v1398_v46, %v1401_v44 }
  0x91   : > { %5097 = vmatprep.subr.bf16.mxu0 %v5672_v60  ;;  %4888 = vmatmul.mubr.bf16.gmra.mrb[16].mxu1 %v6334_v0 }
  0x92   : > { %4891 = vmatprep.mubr.bf16.mxu1 %v6346_v54 }
  0x94   : > { %5098 = vmatpush3.bf16.msra.mxu0 %v5672_v60  ;;  %v5735_v60 = vld [vmem:[%s7162_s1 + $0xf0] sm:$0xff]  }
  0x95   : > { %5099 = vmatprep.subr.bf16.mxu0 %v5677_v39 }
  0x97   : > { %5068 = vmatmul.mubr.bf16.gmra.mrb[4].mxu0 %v6397_v61 }
  0x98   : > { %5071 = vmatprep.mubr.bf16.mxu0 %v6415_v53  ;;  %5100 = vmatpush3.bf16.msra.mxu0 %v5677_v39  ;;  %v5736_v39 = vld [vmem:[%s7162_s1 + $0xf8] sm:$0xff]  }
  0x99   : > { %5101 = vmatprep.subr.bf16.mxu0 %v5682_v19  ;;  %4892 = vmatmul.mubr.bf16.gmra.mrb[20].mxu1 %v6356_v16 }
  0x9a   : > { %4895 = vmatprep.mubr.bf16.mxu1 %v6365_v24 }
  0x9c   : > { %5102 = vmatpush3.bf16.msra.mxu0 %v5682_v19  ;;  %v5691_v19 = vld [vmem:[%s7162_s1 + $0x1d8] sm:$0xff]  }
  0x9d   : > { %5103 = vmatprep.subr.bf16.mxu0 %v5684_v3 }
  0x9f   : > { %5072 = vmatmul.mubr.bf16.gmra.mrb[8].mxu0 %v6424_v11 }
  0xa0   : > { %5075 = vmatprep.mubr.bf16.mxu0 %v6450_v8  ;;  %5104 = vmatpush3.bf16.msra.mxu0 %v5684_v3  ;;  %v7257_v3 = vld [vmem:[#allocation8_spill] sm:$0xff] }
  0xa1   : > { %5105 = vmatprep.subr.bf16.mxu0 %v5685_v29  ;;  %4896 = vmatmul.mubr.bf16.gmra.mrb[24].mxu1 %v6388_v57 }
  0xa2   : > { %4899 = vmatprep.mubr.bf16.mxu1 %v6408_v5 }
  0xa4   : > { %5106 = vmatpush3.bf16.msra.mxu0 %v5685_v29  ;;  %v5703_v29 = vld [vmem:[%s7162_s1 + $0x228] sm:$0xff]  }
  0xa5   : > { %5107 = vmatprep.subr.bf16.mxu0 %v5686_v48 }
  0xa7   : > { %5076 = vmatmul.mubr.bf16.gmra.mrb[12].mxu0 %v6473_v40 }
  0xa8   : > { %5079 = vmatprep.mubr.bf16.mxu0 %v6482_v9  ;;  %5108 = vmatpush3.bf16.msra.mxu0 %v5686_v48 }
  0xa9   : > { %5109 = vmatprep.subr.bf16.mxu0 %v5687_v62  ;;  %4900 = vmatmul.mubr.bf16.gmra.mrb[28].mxu1 %v6422_v22 }
  0xaa   : > { %4919 = vmatprep.mubr.bf16.mxu1 %v4346_v31 }
  0xac   : > { %5110 = vmatpush3.bf16.msra.mxu0 %v5687_v62 }
  0xad   : > { %5143 = vmatprep.subr.bf16.mxu0 %v5688_v47 }
  0xaf   : > { %5080 = vmatmul.mubr.bf16.gmra.mrb[16].mxu0 %v6499_v59 }
  0xb0   : > { %5083 = vmatprep.mubr.bf16.mxu0 %v6506_v63 }
  0xb1   : > { %4920 = vmatmul.mubr.bf16.vlgmr.msra.gmra.mrb[0].mxu1 %v6429_v52  ;;  %v5732_v52 = vld [vmem:[%s7162_s1 + $0xd8] sm:$0xff]  }
  0xb2   : > { %4923 = vmatprep.mubr.bf16.mxu1 %v6348_v15  ;;  %5343 = vmatpush3.bf16.msra.mxu1 %v5728_v6  ;;  %v5689_v6 = vld [vmem:[%s7162_s1 + $0x1c8] sm:$0xff]  }
  0xb3   : > { %5336 = vmatprep.subr.bf16.mxu1 %v5730_v26 }
  0xb6   : > { %5344 = vmatpush3.bf16.msra.mxu1 %v5730_v26 }
  0xb7   : > { %5084 = vmatmul.mubr.bf16.gmra.mrb[20].mxu0 %v6525_v7  ;;  %5337 = vmatprep.subr.bf16.mxu1 %v5731_v55 }
  0xb8   : > { %5087 = vmatprep.mubr.bf16.mxu0 %v6531_v23 }
  0xb9   : > { %4924 = vmatmul.mubr.bf16.gmra.mrb[4].mxu1 %v6577_v58 }
  0xba   : > { %4927 = vmatprep.mubr.bf16.mxu1 %v6397_v61  ;;  %5345 = vmatpush3.bf16.msra.mxu1 %v5731_v55 }
  0xbb   : > { %5338 = vmatprep.subr.bf16.mxu1 %v5732_v52 }
  0xbe   : > { %5346 = vmatpush3.bf16.msra.mxu1 %v5732_v52 }
  0xbf   : > { %5088 = vmatmul.mubr.bf16.gmra.mrb[24].mxu0 %v6544_v28  ;;  %5339 = vmatprep.subr.bf16.mxu1 %v5733_v1 }
  0xc0   : > { %5091 = vmatprep.mubr.bf16.mxu0 %v6552_v30 }
  0xc1   : > { %4928 = vmatmul.mubr.bf16.gmra.mrb[8].mxu1 %v6415_v53 }
  0xc2   : > { %4931 = vmatprep.mubr.bf16.mxu1 %v6424_v11  ;;  %5347 = vmatpush3.bf16.msra.mxu1 %v5733_v1 }
  0xc3   : > { %5340 = vmatprep.subr.bf16.mxu1 %v5734_v14 }
  0xc6   : > { %5348 = vmatpush3.bf16.msra.mxu1 %v5734_v14 }
  0xc7   : > { %5092 = vmatmul.mubr.bf16.gmra.mrb[28].mxu0 %v6571_v27  ;;  %5341 = vmatprep.subr.bf16.mxu1 %v5735_v60 }
  0xc8   : > { %5111 = vmatprep.mubr.bf16.mxu0 %v5898_v2  ;;  %v5690_v2 = vld [vmem:[%s7162_s1 + $0x1d0] sm:$0xff]  }
  0xc9   : > { %4932 = vmatmul.mubr.bf16.gmra.mrb[12].mxu1 %v6450_v8 }
  0xca   : > { %4935 = vmatprep.mubr.bf16.mxu1 %v6473_v40  ;;  %5349 = vmatpush3.bf16.msra.mxu1 %v5735_v60 }
  0xcb   : > { %5342 = vmatprep.subr.bf16.mxu1 %v5736_v39 }
  0xce   : > { %5350 = vmatpush3.bf16.msra.mxu1 %v5736_v39 }
  0xcf   : > { %5112 = vmatmul.mubr.bf16.vlgmr.msra.gmra.mrb[0].mxu0 %v7239_v21  ;;  %v5693_v21 = vld [vmem:[%s7162_s1 + $0x1e8] sm:$0xff]   ;;  %5239 = vmatprep.subr.bf16.mxu1 %v5706_v38 }
  0xd0   : > { %5144 = vmatpush3.bf16.msra.mxu0 %v5688_v47  ;;  %5115 = vmatprep.mubr.bf16.mxu0 %v7241_v12  ;;  %v5692_v12 = vld [vmem:[%s7162_s1 + $0x1e0] sm:$0xff]  }
  0xd1   : > { %5145 = vmatprep.subr.bf16.mxu0 %v5689_v6  ;;  %4936 = vmatmul.mubr.bf16.gmra.mrb[16].mxu1 %v6482_v9 }
  0xd2   : > { %4939 = vmatprep.mubr.bf16.mxu1 %v6499_v59 }
  0xd4   : > { %5146 = vmatpush3.bf16.msra.mxu0 %v5689_v6 }
  0xd5   : > { %5147 = vmatprep.subr.bf16.mxu0 %v5690_v2 }
  0xd7   : > { %5116 = vmatmul.mubr.bf16.gmra.mrb[4].mxu0 %v7245_v34  ;;  %v5694_v34 = vld [vmem:[%s7162_s1 + $0x1f0] sm:$0xff]  }
  0xd8   : > { %5119 = vmatprep.mubr.bf16.mxu0 %v7247_v18  ;;  %5148 = vmatpush3.bf16.msra.mxu0 %v5690_v2  ;;  %v5697_v18 = vld [vmem:[%s7162_s1 + $0x1f8] sm:$0xff]  }
  0xd9   : > { %5149 = vmatprep.subr.bf16.mxu0 %v5691_v19  ;;  %4940 = vmatmul.mubr.bf16.gmra.mrb[20].mxu1 %v6506_v63 }
  0xda   : > { %4943 = vmatprep.mubr.bf16.mxu1 %v6525_v7 }
  0xdc   : > { %5150 = vmatpush3.bf16.msra.mxu0 %v5691_v19 }
  0xdd   : > { %5151 = vmatprep.subr.bf16.mxu0 %v5692_v12 }
  0xdf   : > { %5120 = vmatmul.mubr.bf16.gmra.mrb[8].mxu0 %v7251_v33  ;;  %v5698_v33 = vld [vmem:[%s7162_s1 + $0x200] sm:$0xff]  }
  0xe0   : > { %5123 = vmatprep.mubr.bf16.mxu0 %v7252_v37  ;;  %5152 = vmatpush3.bf16.msra.mxu0 %v5692_v12  ;;  %v6717_v37 = vld [vmem:[%s5834_s10 + $0xd0] sm:$0xf] }
  0xe1   : > { %5153 = vmatprep.subr.bf16.mxu0 %v5693_v21  ;;  %4944 = vmatmul.mubr.bf16.gmra.mrb[24].mxu1 %v6531_v23  ;;  %v2927_v46 = vshrl.u32 %v6717_v37, 16  ;;  %v2923_v44 = vshll.u32 %v6717_v37, 16 }
  0xe2   : > { %4947 = vmatprep.mubr.bf16.mxu1 %v6544_v28 }
  0xe3   : > { %v2929_v47 = vrot.slane %v2927_v46, 4 }
  0xe4   : > { %5154 = vmatpush3.bf16.msra.mxu0 %v5693_v21 }
  0xe5   : > { %5155 = vmatprep.subr.bf16.mxu0 %v5694_v34 }
  0xe7   : > { %5124 = vmatmul.mubr.bf16.gmra.mrb[12].mxu0 %v6334_v0 }
  0xe8   : > { %5127 = vmatprep.mubr.bf16.mxu0 %v6346_v54  ;;  %5156 = vmatpush3.bf16.msra.mxu0 %v5694_v34 }
  0xe9   : > { %5157 = vmatprep.subr.bf16.mxu0 %v5697_v18  ;;  %4948 = vmatmul.mubr.bf16.gmra.mrb[28].mxu1 %v6552_v30 }
  0xea   : > { %4983 = vmatprep.mubr.bf16.mxu1 %v6334_v0  ;;  %v6714_v0 = vld [vmem:[%s5834_s10 + $0xcc] sm:$0xf] }
  0xeb   : > { %v2914_v50 = vshrl.u32 %v6714_v0, 16  ;;  %v2917_v48 = vshll.u32 %v6714_v0, 16 }
  0xec   : > { %5158 = vmatpush3.bf16.msra.mxu0 %v5697_v18 }
  0xed   : > { %5191 = vmatprep.subr.bf16.mxu0 %v5698_v33  ;;  %v2916_v62 = vrot.slane %v2914_v50, 4  ;;  %v2919_v31 = vrot.slane %v2917_v48, 5  ;;  %v5714_v48 = vld [vmem:[%s7165_s4] sm:$0xff]  }
  0xef   : > { %5128 = vmatmul.mubr.bf16.gmra.mrb[16].mxu0 %v6356_v16 }
  0xf0   : > { %5131 = vmatprep.mubr.bf16.mxu0 %v6365_v24 }
  0xf1   : > { %4984 = vmatmul.mubr.bf16.vlgmr.msra.gmra.mrb[16].mxu1 %v6346_v54  ;;  %v4462_v54 = vcombine.low %v6714_v0, %v6717_v37 }
  0xf2   : > { %4987 = vmatprep.mubr.bf16.mxu1 %v6356_v16  ;;  %v7255_v16 = vld [vmem:[#allocation4_spill] sm:$0xff]  ;;  %5240 = vmatpush3.bf16.msra.mxu1 %v5706_v38 }
  0xf7   : > { %5132 = vmatmul.mubr.bf16.gmra.mrb[20].mxu0 %v6388_v57 }
  0xf8   : > { %5135 = vmatprep.mubr.bf16.mxu0 %v6408_v5 }
  0xf9   : > { %4988 = vmatmul.mubr.bf16.gmra.mrb[20].mxu1 %v6365_v24  ;;  %v5699_v24 = vld [vmem:[%s7162_s1 + $0x208] sm:$0xff]  }
  0xfa   : > { %4991 = vmatprep.mubr.bf16.mxu1 %v6388_v57  ;;  %v7256_v57 = vld [vmem:[#allocation6_spill] sm:$0xff] }
  0xff   : > { %5136 = vmatmul.mubr.bf16.gmra.mrb[24].mxu0 %v6422_v22 }
 0x100   : > { %5139 = vmatprep.mubr.bf16.mxu0 %v6542_v17 }
 0x101   : > { %4992 = vmatmul.mubr.bf16.gmra.mrb[24].mxu1 %v6408_v5  ;;  %v5700_v5 = vld [vmem:[%s7162_s1 + $0x210] sm:$0xff]  }
 0x102   : > { %4995 = vmatprep.mubr.bf16.mxu1 %v6422_v22  ;;  %v5701_v22 = vld [vmem:[%s7162_s1 + $0x218] sm:$0xff]  }
 0x107   : > { %5140 = vmatmul.mubr.bf16.gmra.mrb[28].mxu0 %v4462_v54 }
 0x108   : > { %5159 = vmatprep.mubr.bf16.mxu0 %v7255_v16 }
 0x109   : > { %4996 = vmatmul.mubr.bf16.gmra.mrb[28].mxu1 %v6542_v17  ;;  %v7258_v17 = vld [vmem:[#allocation13_spill] sm:$0xff] }
 0x10f   : > { %5160 = vmatmul.mubr.bf16.vlgmr.msra.gmra.mrb[0].mxu0 %v7256_v57 }
 0x110   : > { %5192 = vmatpush3.bf16.msra.mxu0 %v5698_v33  ;;  %5163 = vmatprep.mubr.bf16.mxu0 %v7257_v3 }
 0x111   : > { %5193 = vmatprep.subr.bf16.mxu0 %v5699_v24 }
 0x114   : > { %5194 = vmatpush3.bf16.msra.mxu0 %v5699_v24 }
 0x115   : > { %5195 = vmatprep.subr.bf16.mxu0 %v5700_v5 }
 0x117   : > { %5164 = vmatmul.mubr.bf16.gmra.mrb[4].mxu0 %v7258_v17 }
 0x118   : > { %5167 = vmatprep.mubr.bf16.mxu0 %v7259_v51  ;;  %5196 = vmatpush3.bf16.msra.mxu0 %v5700_v5 }
 0x119   : > { %5197 = vmatprep.subr.bf16.mxu0 %v5701_v22 }
 0x11c   : > { %5198 = vmatpush3.bf16.msra.mxu0 %v5701_v22 }
 0x11d   : > { %5199 = vmatprep.subr.bf16.mxu0 %v5702_v41 }
 0x11f   : > { %5168 = vmatmul.mubr.bf16.gmra.mrb[8].mxu0 %v7260_v32 }
 0x120   : > { %5171 = vmatprep.mubr.bf16.mxu0 %v7261_v36  ;;  %5200 = vmatpush3.bf16.msra.mxu0 %v5702_v41 }
 0x121   : > { %5201 = vmatprep.subr.bf16.mxu0 %v5703_v29 }
 0x124   : > { %5202 = vmatpush3.bf16.msra.mxu0 %v5703_v29 }
 0x125   : > { %5203 = vmatprep.subr.bf16.mxu0 %v5704_v49 }
 0x127   : > { %5172 = vmatmul.mubr.bf16.gmra.mrb[12].mxu0 %v6161_v13  ;;  %v2925_v13 = vrot.slane %v2923_v44, 5 }
 0x128   : > { %5175 = vmatprep.mubr.bf16.mxu0 %v6187_v42  ;;  %5204 = vmatpush3.bf16.msra.mxu0 %v5704_v49  ;;  %v377_v42 = vld [vmem:[%s5834_s10 + $0xd4] sm:$0x1] }
 0x129   : > { %5205 = vmatprep.subr.bf16.mxu0 %v5705_v10  ;;  %v2930_v26 = vor.u32 %v2929_v47, %v2925_v13  ;;  %v2933_v55 = vshll.u32 %v377_v42, 16 }
 0x12b   : > { %v2931_v1 = vrot.slane %v2930_v26, 4  ;;  %v2935_v14 = vrot.slane %v2933_v55, 5 }
 0x12c   : > { %5206 = vmatpush3.bf16.msra.mxu0 %v5705_v10 }
 0x12d   : > { %v2936_v60 = vsel %vm5863_vm2, %v2931_v1, %v2935_v14 }
 0x12f   : > { %5176 = vmatmul.mubr.bf16.gmra.mrb[16].mxu0 %v6226_v56  ;;  %v2920_v56 = vor.u32 %v2919_v31, %v2916_v62 }
 0x130   : > { %5179 = vmatprep.mubr.bf16.mxu0 %v6255_v35 }
 0x131   : > { %v2921_v52 = vrot.slane %v2920_v56, 4 }
 0x133   : > { %v2926_v35 = vsel %vm5863_vm2, %v2921_v52, %v2925_v13  ;;  %v5715_v52 = vld [vmem:[%s7165_s4 + $0x8] sm:$0xff]  }
 0x134   : > { %v4487_v39 = vcombine.low %v2926_v35, %v2936_v60 }
 0x137   : > { %5180 = vmatmul.mubr.bf16.gmra.mrb[20].mxu0 %v6267_v20  ;;  %v5707_v20 = vld [vmem:[%s7163_s2 + $0x8] sm:$0xff]  }
 0x138   : > { %5183 = vmatprep.mubr.bf16.mxu0 %v6291_v43  ;;  %5241 = vmatprep.subr.bf16.mxu1 %v5707_v20  ;;  %v5708_v43 = vld [vmem:[%s7163_s2 + $0x10] sm:$0xff]  }
 0x139   : > { %5242 = vmatpush3.bf16.msra.mxu1 %v5707_v20 }
 0x13a   : > { %5243 = vmatprep.subr.bf16.mxu1 %v5708_v43 }
 0x13d   : > { %5244 = vmatpush3.bf16.msra.mxu1 %v5708_v43  ;;  %v5716_v43 = vld [vmem:[%s7165_s4 + $0x10] sm:$0xff]  }
 0x13f   : > { %5184 = vmatmul.mubr.bf16.gmra.mrb[24].mxu0 %v6325_v25  ;;  %v5709_v25 = vld [vmem:[%s7163_s2 + $0x18] sm:$0xff]  }
 0x140   : > { %5187 = vmatprep.mubr.bf16.mxu0 %v6468_v45  ;;  %5245 = vmatprep.subr.bf16.mxu1 %v5709_v25  ;;  %v3205_v45 = vrot.slane %v377_v42, 5 }
 0x141   : > { %5246 = vmatpush3.bf16.msra.mxu1 %v5709_v25 }
 0x147   : > { %5188 = vmatmul.mubr.bf16.gmra.mrb[28].mxu0 %v4487_v39 }
 0x148   : > { %5207 = vmatprep.mubr.bf16.mxu0 %v6348_v15  ;;  %v5710_v15 = vld [vmem:[%s7163_s2 + $0x20] sm:$0xff]  }
 0x149   : > { %5247 = vmatprep.subr.bf16.mxu1 %v5710_v15 }
 0x14a   : > { %5248 = vmatpush3.bf16.msra.mxu1 %v5710_v15 }
 0x14f   : > { %5208 = vmatmul.mubr.bf16.vlgmr.msra.gmra.mrb[0].mxu0 %v6577_v58 }
 0x150   : > { %5211 = vmatprep.mubr.bf16.mxu0 %v6397_v61  ;;  %v5711_v61 = vld [vmem:[%s7163_s2 + $0x28] sm:$0xff]  }
 0x151   : > { %5249 = vmatprep.subr.bf16.mxu1 %v5711_v61 }
 0x152   : > { %5250 = vmatpush3.bf16.msra.mxu1 %v5711_v61 }
 0x157   : > { %5212 = vmatmul.mubr.bf16.gmra.mrb[4].mxu0 %v6415_v53  ;;  %v3202_v53 = vrot.slane %v6717_v37, 5  ;;  %v5713_v37 = vld [vmem:[%s7163_s2 + $0x38] sm:$0xff]  }
 0x158   : > { %5215 = vmatprep.mubr.bf16.mxu0 %v6424_v11  ;;  %v4496_v11 = vrot.slane %v6714_v0, 9  ;;  %v5712_v0 = vld [vmem:[%s7163_s2 + $0x30] sm:$0xff]  }
 0x159   : > { %5251 = vmatprep.subr.bf16.mxu1 %v5712_v0 }
 0x15a   : > { %5252 = vmatpush3.bf16.msra.mxu1 %v5712_v0 }
 0x15b   : > { %5253 = vmatprep.subr.bf16.mxu1 %v5713_v37 }
 0x15e   : > { %5254 = vmatpush3.bf16.msra.mxu1 %v5713_v37  ;;  %v5720_v37 = vld [vmem:[%s7165_s4 + $0x30] sm:$0xff]  }
 0x15f   : > { %5216 = vmatmul.mubr.bf16.gmra.mrb[8].mxu0 %v6450_v8  ;;  %v3204_v8 = vrot.slane %v3202_v53, 4  ;;  %5287 = vmatprep.subr.bf16.mxu1 %v5714_v48 }
 0x160   : > { %5219 = vmatprep.mubr.bf16.mxu0 %v6473_v40  ;;  %v3203_v40 = vsel %vm6304_vm5, %v4496_v11, %v3202_v53  ;;  %v5717_v53 = vld [vmem:[%s7165_s4 + $0x18] sm:$0xff]  }
 0x167   : > { %5220 = vmatmul.mubr.bf16.gmra.mrb[12].mxu0 %v6482_v9  ;;  %v3206_v9 = vsel %vm6304_vm5, %v3204_v8, %v3205_v45 }
 0x168   : > { %5223 = vmatprep.mubr.bf16.mxu0 %v6499_v59  ;;  %v4513_v59 = vcombine.low %v3203_v40, %v3206_v9 }
 0x16f   : > { %5224 = vmatmul.mubr.bf16.gmra.mrb[16].mxu0 %v6506_v63 }
 0x170   : > { %5227 = vmatprep.mubr.bf16.mxu0 %v6525_v7 }
 0x177   : > { %5228 = vmatmul.mubr.bf16.gmra.mrb[20].mxu0 %v6531_v23 }
 0x178   : > { %5231 = vmatprep.mubr.bf16.mxu0 %v6544_v28 }
 0x17f   : > { %5232 = vmatmul.mubr.bf16.gmra.mrb[24].mxu0 %v6552_v30 }
 0x180   : > { %5235 = vmatprep.mubr.bf16.mxu0 %v6571_v27 }
 0x184   : > { %v4921_v63 = vpop.f32.mrb[0].mxu1 }
 0x185   : > { %v1670_v7 = vpop.f32.mrb[1].mxu1 }
 0x186   : > { %v4922_v23 = vpop.f32.mrb[2].mxu1 }
 0x187   : > { %5236 = vmatmul.mubr.bf16.gmra.mrb[28].mxu0 %v4513_v59  ;;  %v1673_v28 = vpop.f32.mrb[3].mxu1 }
 0x18c   : > { %v4925_v58 = vpop.f32.mrb[4].mxu1 }
 0x18d   : > { %v1686_v6 = vpop.f32.mrb[5].mxu1 }
 0x18e   : > { %v4926_v2 = vpop.f32.mrb[6].mxu1 }
 0x18f   : > { %v1689_v19 = vpop.f32.mrb[7].mxu1 }
 0x194   : > { %v6808_v12 = vpop.f32.mrb[8].mxu1 }
 0x195   : > { %v6810_v30 = vpop.f32.mrb[9].mxu1 }
 0x196   : > { %v6812_v27 = vpop.f32.mrb[10].mxu1 }
 0x197   : > { %v6814_v21 = vpop.f32.mrb[11].mxu1 }
 0x19c   : > { %v6816_v4 = vpop.f32.mrb[12].mxu1 }
 0x19d   : > { %v6818_v34 = vpop.f32.mrb[13].mxu1 }
 0x19e   : > { %v6820_v18 = vpop.f32.mrb[14].mxu1 }
 0x19f   : > { %v6822_v33 = vpop.f32.mrb[15].mxu1 }
 0x1c4   : > { %v6830_v54 = vpop.f32.mrb[16].mxu1 }
 0x1c5   : > { %v6832_v16 = vpop.f32.mrb[17].mxu1 }
 0x1c6   : > { %v6834_v24 = vpop.f32.mrb[18].mxu1 }
 0x1c7   : > { %v6836_v57 = vpop.f32.mrb[19].mxu1 }
 0x1cc   : > { %v6838_v3 = vpop.f32.mrb[20].mxu1 }
 0x1cd   : > { %v6840_v5 = vpop.f32.mrb[21].mxu1 }
 0x1ce   : > { %v6842_v22 = vpop.f32.mrb[22].mxu1 }
 0x1cf   : > { %v6844_v17 = vpop.f32.mrb[23].mxu1 }
 0x1d4   : > { %v6846_v51 = vpop.f32.mrb[24].mxu1 }
 0x1d5   : > { %v6848_v41 = vpop.f32.mrb[25].mxu1 }
 0x1d6   : > { %v6850_v29 = vpop.f32.mrb[26].mxu1 }
 0x1d7   : > { %v6852_v32 = vpop.f32.mrb[27].mxu1 }
 0x1dc   : > { %v6854_v36 = vpop.f32.mrb[28].mxu1 }
 0x1dd   : > { %v6856_v49 = vpop.f32.mrb[29].mxu1 }
 0x1de   : > { %v6858_v10 = vpop.f32.mrb[30].mxu1 }
 0x1df   : > { %v6860_v50 = vpop.f32.mrb[31].mxu1 }
 0x222   : > { %v5209_v46 = vpop.f32.mrb[0].mxu0 }
 0x223   : > { %v6865_v44 = vadd.f32 %v5209_v46, %v4921_v63  ;;  %v3310_v62 = vpop.f32.mrb[1].mxu0 }
 0x224   : > { %v6867_v31 = vadd.f32 %v3310_v62, %v1670_v7  ;;  %v5210_v13 = vpop.f32.mrb[2].mxu0  ;;  %v5718_v7 = vld [vmem:[%s7165_s4 + $0x20] sm:$0xff]  }
 0x225   : > { %v6869_v47 = vadd.f32 %v5210_v13, %v4922_v23  ;;  %v3313_v42 = vpop.f32.mrb[3].mxu0 }
 0x226   : > { %v6871_v56 = vadd.f32 %v3313_v42, %v1673_v28 }
 0x227   : > { %v3470_v55 = vpack.c.bf16 %v6869_v47, %v6865_v44 }
 0x228   : > { %v3469_v26 = vpack.c.bf16 %v6871_v56, %v6867_v31 }
 0x22a   : > { %v5213_v1 = vpop.f32.mrb[4].mxu0  ;;  %5255 = vmatprep.mubr.bf16.mxu1 %v3469_v26 }
 0x22b   : > { %v6880_v14 = vadd.f32 %v5213_v1, %v4925_v58  ;;  %v3326_v35 = vpop.f32.mrb[5].mxu0  ;;  %5256 = vmatmul.mubr.bf16.vlgmr.msra.gmra.mrb[32].mxu1 %v3470_v55 }
 0x22c   : > { %v6882_v60 = vadd.f32 %v3326_v35, %v1686_v6  ;;  %v5214_v39 = vpop.f32.mrb[6].mxu0  ;;  %5288 = vmatpush3.bf16.msra.mxu1 %v5714_v48  ;;  %v5719_v6 = vld [vmem:[%s7165_s4 + $0x28] sm:$0xff]  }
 0x22d   : > { %v6884_v38 = vadd.f32 %v5214_v39, %v4926_v2  ;;  %v3329_v20 = vpop.f32.mrb[7].mxu0  ;;  %5289 = vmatprep.subr.bf16.mxu1 %v5715_v52 }
 0x22e   : > { %v6889_v25 = vadd.f32 %v3329_v20, %v1689_v19 }
 0x22f   : > { %v3472_v61 = vpack.c.bf16 %v6884_v38, %v6880_v14 }
 0x230   : > { %v3471_v15 = vpack.c.bf16 %v6889_v25, %v6882_v60  ;;  %5290 = vmatpush3.bf16.msra.mxu1 %v5715_v52 }
 0x231   : > { %5291 = vmatprep.subr.bf16.mxu1 %v5716_v43 }
 0x232   : > { %v5217_v11 = vpop.f32.mrb[8].mxu0  ;;  %5259 = vmatprep.mubr.bf16.mxu1 %v3471_v15 }
 0x233   : > { %v6899_v8 = vadd.f32 %v5217_v11, %v6808_v12  ;;  %v3342_v45 = vpop.f32.mrb[9].mxu0  ;;  %5260 = vmatmul.mubr.bf16.gmra.mrb[36].mxu1 %v3472_v61 }
 0x234   : > { %v6902_v40 = vadd.f32 %v3342_v45, %v6810_v30  ;;  %v5218_v9 = vpop.f32.mrb[10].mxu0  ;;  %5292 = vmatpush3.bf16.msra.mxu1 %v5716_v43 }
 0x235   : > { %v6905_v59 = vadd.f32 %v5218_v9, %v6812_v27  ;;  %v3345_v63 = vpop.f32.mrb[11].mxu0  ;;  %5293 = vmatprep.subr.bf16.mxu1 %v5717_v53 }
 0x236   : > { %v6911_v23 = vadd.f32 %v3345_v63, %v6814_v21 }
 0x237   : > { %v3474_v58 = vpack.c.bf16 %v6905_v59, %v6899_v8 }
 0x238   : > { %v3473_v28 = vpack.c.bf16 %v6911_v23, %v6902_v40  ;;  %5294 = vmatpush3.bf16.msra.mxu1 %v5717_v53 }
 0x239   : > { %5295 = vmatprep.subr.bf16.mxu1 %v5718_v7 }
 0x23a   : > { %v5221_v2 = vpop.f32.mrb[12].mxu0  ;;  %5263 = vmatprep.mubr.bf16.mxu1 %v3473_v28 }
 0x23b   : > { %v6921_v19 = vadd.f32 %v5221_v2, %v6816_v4  ;;  %v3358_v12 = vpop.f32.mrb[13].mxu0  ;;  %5264 = vmatmul.mubr.bf16.gmra.mrb[40].mxu1 %v3474_v58 }
 0x23c   : > { %v6924_v30 = vadd.f32 %v3358_v12, %v6818_v34  ;;  %v5222_v27 = vpop.f32.mrb[14].mxu0  ;;  %5296 = vmatpush3.bf16.msra.mxu1 %v5718_v7 }
 0x23d   : > { %v6927_v21 = vadd.f32 %v5222_v27, %v6820_v18  ;;  %v3361_v0 = vpop.f32.mrb[15].mxu0  ;;  %5297 = vmatprep.subr.bf16.mxu1 %v5719_v6 }
 0x23e   : > { %v6933_v48 = vadd.f32 %v3361_v0, %v6822_v33 }
 0x23f   : > { %v3476_v34 = vpack.c.bf16 %v6927_v21, %v6921_v19 }
 0x240   : > { %v3475_v4 = vpack.c.bf16 %v6933_v48, %v6924_v30  ;;  %5298 = vmatpush3.bf16.msra.mxu1 %v5719_v6 }
 0x241   : > { %5299 = vmatprep.subr.bf16.mxu1 %v5720_v37 }
 0x242   : > { %v5225_v46 = vpop.f32.mrb[16].mxu0  ;;  %5267 = vmatprep.mubr.bf16.mxu1 %v3475_v4 }
 0x243   : > { %v6940_v18 = vadd.f32 %v5225_v46, %v6830_v54  ;;  %v3374_v62 = vpop.f32.mrb[17].mxu0  ;;  %5268 = vmatmul.mubr.bf16.gmra.mrb[44].mxu1 %v3476_v34 }
 0x244   : > { %v6943_v13 = vadd.f32 %v3374_v62, %v6832_v16  ;;  %v5226_v33 = vpop.f32.mrb[18].mxu0  ;;  %5300 = vmatpush3.bf16.msra.mxu1 %v5720_v37 }
 0x245   : > { %v6946_v42 = vadd.f32 %v5226_v33, %v6834_v24  ;;  %v3377_v26 = vpop.f32.mrb[19].mxu0 }
 0x246   : > { %v6949_v55 = vadd.f32 %v3377_v26, %v6836_v57 }
 0x247   : > { %v3478_v54 = vpack.c.bf16 %v6946_v42, %v6940_v18 }
 0x248   : > { %v3477_v52 = vpack.c.bf16 %v6949_v55, %v6943_v13 }
 0x24a   : > { %v5229_v1 = vpop.f32.mrb[20].mxu0  ;;  %5271 = vmatprep.mubr.bf16.mxu1 %v3477_v52 }
 0x24b   : > { %v6956_v16 = vadd.f32 %v5229_v1, %v6838_v3  ;;  %v3390_v35 = vpop.f32.mrb[21].mxu0  ;;  %5272 = vmatmul.mubr.bf16.gmra.mrb[48].mxu1 %v3478_v54 }
 0x24c   : > { %v6959_v24 = vadd.f32 %v3390_v35, %v6840_v5  ;;  %v5230_v39 = vpop.f32.mrb[22].mxu0 }
 0x24d   : > { %v6962_v57 = vadd.f32 %v5230_v39, %v6842_v22  ;;  %v3393_v20 = vpop.f32.mrb[23].mxu0 }
 0x24e   : > { %v6965_v43 = vadd.f32 %v3393_v20, %v6844_v17 }
 0x24f   : > { %v3480_v3 = vpack.c.bf16 %v6962_v57, %v6956_v16 }
 0x250   : > { %v3479_v15 = vpack.c.bf16 %v6965_v43, %v6959_v24 }
 0x252   : > { %v5233_v61 = vpop.f32.mrb[24].mxu0  ;;  %5275 = vmatprep.mubr.bf16.mxu1 %v3479_v15 }
 0x253   : > { %v6972_v53 = vadd.f32 %v5233_v61, %v6846_v51  ;;  %v3406_v5 = vpop.f32.mrb[25].mxu0  ;;  %5276 = vmatmul.mubr.bf16.gmra.mrb[52].mxu1 %v3480_v3 }
 0x254   : > { %v6975_v22 = vadd.f32 %v3406_v5, %v6848_v41  ;;  %v5234_v11 = vpop.f32.mrb[26].mxu0 }
 0x255   : > { %v6978_v17 = vadd.f32 %v5234_v11, %v6850_v29  ;;  %v3409_v45 = vpop.f32.mrb[27].mxu0 }
 0x256   : > { %v6981_v9 = vadd.f32 %v3409_v45, %v6852_v32 }
 0x257   : > { %v3482_v51 = vpack.c.bf16 %v6978_v17, %v6972_v53 }
 0x258   : > { %v3481_v63 = vpack.c.bf16 %v6981_v9, %v6975_v22 }
 0x25a   : > { %v5237_v7 = vpop.f32.mrb[28].mxu0  ;;  %5279 = vmatprep.mubr.bf16.mxu1 %v3481_v63 }
 0x25b   : > { %v6988_v28 = vadd.f32 %v5237_v7, %v6854_v36  ;;  %v3422_v41 = vpop.f32.mrb[29].mxu0  ;;  %5280 = vmatmul.mubr.bf16.gmra.mrb[56].mxu1 %v3482_v51 }
 0x25c   : > { %v6991_v29 = vadd.f32 %v3422_v41, %v6856_v49  ;;  %v5238_v58 = vpop.f32.mrb[30].mxu0  ;;  %v5721_v49 = vld [vmem:[%s7165_s4 + $0x38] sm:$0xff]  }
 0x25d   : > { %v6994_v32 = vadd.f32 %v5238_v58, %v6858_v10  ;;  %v3425_v6 = vpop.f32.mrb[31].mxu0  ;;  %5301 = vmatprep.subr.bf16.mxu1 %v5721_v49 }
 0x25e   : > { %v6997_v2 = vadd.f32 %v3425_v6, %v6860_v50  ;;  %5302 = vmatpush3.bf16.msra.mxu1 %v5721_v49  ;;  %v7009_v50 = vld [vmem:[%s7164_s3] ss:$0 sm:$0xff] }
 0x25f   : > { %v3484_v36 = vpack.c.bf16 %v6994_v32, %v6988_v28 }
 0x260   : > { %v3483_v12 = vpack.c.bf16 %v6997_v2, %v6991_v29 }
 0x262   : > { %5283 = vmatprep.mubr.bf16.mxu1 %v3483_v12 }
 0x263   : > { %5284 = vmatmul.mubr.bf16.gmra.mrb[60].mxu1 %v3484_v36 }
 0x2fe   : > { %v5257_v10 = vpop.f32.mrb[32].mxu1 }
 0x2ff   : > { %v3590_v27 = vpop.f32.mrb[33].mxu1  ;;  %v3599_v37 = vadd.f32 %v5257_v10, %v7009_v50 }
 0x300   : > { %v5258_v0 = vpop.f32.mrb[34].mxu1  ;;  %v3591_v46 = vadd.f32 %v7009_v50, %v3590_v27 }
 0x301   : > { %v3602_v4 = vadd.f32 %v5258_v0, %v7009_v50  ;;  %v3593_v34 = vpop.f32.mrb[35].mxu1 }
 0x302   : > { %v3594_v62 = vadd.f32 %v7009_v50, %v3593_v34 }
 0x303   : > { %v3718_v33 = vpack.c.bf16 %v3602_v4, %v3599_v37 }
 0x304   : > { %v3717_v26 = vpack.c.bf16 %v3594_v62, %v3591_v46 }
 0x306   : > { %v5261_v52 = vpop.f32.mrb[36].mxu1  ;;  %5303 = vmatprep.mubr.bf16.mxu1 %v3717_v26 }
 0x307   : > { %v3606_v54 = vpop.f32.mrb[37].mxu1  ;;  %5304 = vmatmul.mubr.bf16.vlgmr.msra.gmra.mrb[64].mxu1 %v3718_v33  ;;  %v3615_v35 = vadd.f32 %v5261_v52, %v7009_v50 }
 0x308   : > { %v5262_v1 = vpop.f32.mrb[38].mxu1  ;;  %v3607_v15 = vadd.f32 %v7009_v50, %v3606_v54 }
 0x309   : > { %v3618_v39 = vadd.f32 %v5262_v1, %v7009_v50  ;;  %v3609_v20 = vpop.f32.mrb[39].mxu1 }
 0x30a   : > { %v3610_v3 = vadd.f32 %v7009_v50, %v3609_v20 }
 0x30b   : > { %v3720_v61 = vpack.c.bf16 %v3618_v39, %v3615_v35 }
 0x30c   : > { %v3719_v5 = vpack.c.bf16 %v3610_v3, %v3607_v15 }
 0x30e   : > { %v5265_v11 = vpop.f32.mrb[40].mxu1  ;;  %5307 = vmatprep.mubr.bf16.mxu1 %v3719_v5 }
 0x30f   : > { %v3622_v45 = vpop.f32.mrb[41].mxu1  ;;  %5308 = vmatmul.mubr.bf16.gmra.mrb[68].mxu1 %v3720_v61  ;;  %v3631_v51 = vadd.f32 %v5265_v11, %v7009_v50 }
 0x310   : > { %v5266_v63 = vpop.f32.mrb[42].mxu1  ;;  %v3623_v58 = vadd.f32 %v7009_v50, %v3622_v45 }
 0x311   : > { %v3634_v7 = vadd.f32 %v5266_v63, %v7009_v50  ;;  %v3625_v41 = vpop.f32.mrb[43].mxu1 }
 0x312   : > { %v3626_v6 = vadd.f32 %v7009_v50, %v3625_v41 }
 0x313   : > { %v3722_v12 = vpack.c.bf16 %v3634_v7, %v3631_v51 }
 0x314   : > { %v3721_v36 = vpack.c.bf16 %v3626_v6, %v3623_v58 }
 0x316   : > { %v5269_v49 = vpop.f32.mrb[44].mxu1  ;;  %5311 = vmatprep.mubr.bf16.mxu1 %v3721_v36 }
 0x317   : > { %v3638_v10 = vpop.f32.mrb[45].mxu1  ;;  %5312 = vmatmul.mubr.bf16.gmra.mrb[72].mxu1 %v3722_v12  ;;  %v3647_v0 = vadd.f32 %v5269_v49, %v7009_v50 }
 0x318   : > { %v5270_v27 = vpop.f32.mrb[46].mxu1  ;;  %v3639_v34 = vadd.f32 %v7009_v50, %v3638_v10 }
 0x319   : > { %v3650_v37 = vadd.f32 %v5270_v27, %v7009_v50  ;;  %v3641_v4 = vpop.f32.mrb[47].mxu1 }
 0x31a   : > { %v3642_v46 = vadd.f32 %v7009_v50, %v3641_v4 }
 0x31b   : > { %v3724_v62 = vpack.c.bf16 %v3650_v37, %v3647_v0 }
 0x31c   : > { %v3723_v33 = vpack.c.bf16 %v3642_v46, %v3639_v34 }
 0x31e   : > { %v5273_v26 = vpop.f32.mrb[48].mxu1  ;;  %5315 = vmatprep.mubr.bf16.mxu1 %v3723_v33 }
 0x31f   : > { %v3654_v52 = vpop.f32.mrb[49].mxu1  ;;  %5316 = vmatmul.mubr.bf16.gmra.mrb[76].mxu1 %v3724_v62  ;;  %v3663_v1 = vadd.f32 %v5273_v26, %v7009_v50 }
 0x320   : > { %v5274_v54 = vpop.f32.mrb[50].mxu1  ;;  %v3655_v20 = vadd.f32 %v7009_v50, %v3654_v52 }
 0x321   : > { %v3666_v35 = vadd.f32 %v5274_v54, %v7009_v50  ;;  %v3657_v39 = vpop.f32.mrb[51].mxu1 }
 0x322   : > { %v3658_v15 = vadd.f32 %v7009_v50, %v3657_v39 }
 0x323   : > { %v3726_v3 = vpack.c.bf16 %v3666_v35, %v3663_v1 }
 0x324   : > { %v3725_v61 = vpack.c.bf16 %v3658_v15, %v3655_v20 }
 0x326   : > { %v5277_v5 = vpop.f32.mrb[52].mxu1  ;;  %5319 = vmatprep.mubr.bf16.mxu1 %v3725_v61  ;;  %v7046_v61 = vld [vmem:[%s7166_s5] ss:$0 sm:$0xff] }
 0x327   : > { %v3670_v11 = vpop.f32.mrb[53].mxu1  ;;  %5320 = vmatmul.mubr.bf16.gmra.mrb[80].mxu1 %v3726_v3  ;;  %v3679_v63 = vadd.f32 %v5277_v5, %v7009_v50 }
 0x328   : > { %v5278_v45 = vpop.f32.mrb[54].mxu1  ;;  %v3671_v41 = vadd.f32 %v7009_v50, %v3670_v11 }
 0x329   : > { %v3682_v51 = vadd.f32 %v5278_v45, %v7009_v50  ;;  %v3673_v7 = vpop.f32.mrb[55].mxu1 }
 0x32a   : > { %v3674_v58 = vadd.f32 %v7009_v50, %v3673_v7 }
 0x32b   : > { %v3728_v6 = vpack.c.bf16 %v3682_v51, %v3679_v63 }
 0x32c   : > { %v3727_v12 = vpack.c.bf16 %v3674_v58, %v3671_v41 }
 0x32e   : > { %v5281_v36 = vpop.f32.mrb[56].mxu1  ;;  %5323 = vmatprep.mubr.bf16.mxu1 %v3727_v12 }
 0x32f   : > { %v3686_v49 = vpop.f32.mrb[57].mxu1  ;;  %5324 = vmatmul.mubr.bf16.gmra.mrb[84].mxu1 %v3728_v6  ;;  %v3695_v27 = vadd.f32 %v5281_v36, %v7009_v50 }
 0x330   : > { %v5282_v10 = vpop.f32.mrb[58].mxu1  ;;  %v3687_v4 = vadd.f32 %v7009_v50, %v3686_v49 }
 0x331   : > { %v3698_v0 = vadd.f32 %v5282_v10, %v7009_v50  ;;  %v3689_v37 = vpop.f32.mrb[59].mxu1 }
 0x332   : > { %v3690_v34 = vadd.f32 %v7009_v50, %v3689_v37 }
 0x333   : > { %v3730_v46 = vpack.c.bf16 %v3698_v0, %v3695_v27 }
 0x334   : > { %v3729_v62 = vpack.c.bf16 %v3690_v34, %v3687_v4 }
 0x336   : > { %v5285_v33 = vpop.f32.mrb[60].mxu1  ;;  %5327 = vmatprep.mubr.bf16.mxu1 %v3729_v62 }
 0x337   : > { %v3702_v26 = vpop.f32.mrb[61].mxu1  ;;  %5328 = vmatmul.mubr.bf16.gmra.mrb[88].mxu1 %v3730_v46  ;;  %v3711_v54 = vadd.f32 %v5285_v33, %v7009_v50 }
 0x338   : > { %v5286_v52 = vpop.f32.mrb[62].mxu1  ;;  %v3703_v39 = vadd.f32 %v7009_v50, %v3702_v26 }
 0x339   : > { %v3714_v1 = vadd.f32 %v5286_v52, %v7009_v50  ;;  %v3705_v35 = vpop.f32.mrb[63].mxu1 }
 0x33a   : > { %v3706_v20 = vadd.f32 %v7009_v50, %v3705_v35 }
 0x33b   : > { %v3732_v15 = vpack.c.bf16 %v3714_v1, %v3711_v54 }
 0x33c   : > { %v3731_v3 = vpack.c.bf16 %v3706_v20, %v3703_v39 }
 0x33e   : > { %5331 = vmatprep.mubr.bf16.mxu1 %v3731_v3 }
 0x33f   : > { %5332 = vmatmul.mubr.bf16.gmra.mrb[92].mxu1 %v3732_v15 }
 0x3da   : > { %v5305_v5 = vpop.f32.mrb[64].mxu1 }
 0x3db   : > { %v3847_v11 = vadd.f32 %v5305_v5, %v7046_v61  ;;  %v3838_v45 = vpop.f32.mrb[65].mxu1 }
 0x3dc   : > { %v3839_v50 = vadd.f32 %v7046_v61, %v3838_v45  ;;  %v5306_v63 = vpop.f32.mrb[66].mxu1 }
 0x3dd   : > { %v3967_v51 = vadd.f32 %v6865_v44, %v3847_v11  ;;  %v3850_v7 = vadd.f32 %v5306_v63, %v7046_v61  ;;  %v3841_v41 = vpop.f32.mrb[67].mxu1 }
 0x3de   : > { %v3965_v58 = vadd.f32 %v6867_v31, %v3839_v50  ;;  %v3842_v6 = vadd.f32 %v7046_v61, %v3841_v41 }
 0x3df   : > { %3999 = vst [vmem:[%s7053_s17 + $0x10] sm:$0xff] %v3967_v51  ;;  %v3968_v12 = vadd.f32 %v6869_v47, %v3850_v7  ;;  %v4069_v31 = vmul.f32 %v3967_v51, %v3967_v51 }
 0x3e0   : > { %3997 = vst [vmem:[%s7053_s17] sm:$0xff] %v3965_v58  ;;  %v3966_v36 = vadd.f32 %v6871_v56, %v3842_v6  ;;  %v4067_v49 = vmul.f32 %v3965_v58, %v3965_v58 }
 0x3e1   : > { %4000 = vst [vmem:[%s7053_s17 + $0x18] sm:$0xff] %v3968_v12  ;;  %v4070_v62 = vmul.f32 %v3968_v12, %v3968_v12 }
 0x3e2   : > { %3998 = vst [vmem:[%s7053_s17 + $0x8] sm:$0xff] %v3966_v36  ;;  %v4029_v10 = vadd.f32 %v3966_v36, %v3965_v58  ;;  %v4068_v27 = vmul.f32 %v3966_v36, %v3966_v36  ;;  %v5309_v0 = vpop.f32.mrb[68].mxu1 }
 0x3e3   : > { %v3863_v44 = vadd.f32 %v5309_v0, %v7046_v61  ;;  %v3854_v37 = vpop.f32.mrb[69].mxu1 }
 0x3e4   : > { %v4030_v4 = vadd.f32 %v4029_v10, %v3967_v51  ;;  %v4099_v34 = vadd.f32 %v4068_v27, %v4067_v49  ;;  %v3855_v46 = vadd.f32 %v7046_v61, %v3854_v37  ;;  %v5310_v47 = vpop.f32.mrb[70].mxu1 }
 0x3e5   : > { %v3971_v56 = vadd.f32 %v6880_v14, %v3863_v44  ;;  %v3866_v33 = vadd.f32 %v5310_v47, %v7046_v61  ;;  %v3857_v26 = vpop.f32.mrb[71].mxu1 }
 0x3e6   : > { %v4100_v52 = vadd.f32 %v4099_v34, %v4069_v31  ;;  %v3969_v54 = vadd.f32 %v6882_v60, %v3855_v46  ;;  %v4031_v1 = vadd.f32 %v4030_v4, %v3968_v12  ;;  %v3858_v35 = vadd.f32 %v7046_v61, %v3857_v26 }
 0x3e7   : > { %4003 = vst [vmem:[%s7053_s17 + $0x30] sm:$0xff] %v3971_v56  ;;  %v3972_v39 = vadd.f32 %v6884_v38, %v3866_v33  ;;  %v4073_v51 = vmul.f32 %v3971_v56, %v3971_v56 }
 0x3e8   : > { %4001 = vst [vmem:[%s7053_s17 + $0x20] sm:$0xff] %v3969_v54  ;;  %v4032_v20 = vadd.f32 %v4031_v1, %v3969_v54  ;;  %v4071_v15 = vmul.f32 %v3969_v54, %v3969_v54  ;;  %v4101_v3 = vadd.f32 %v4100_v52, %v4070_v62  ;;  %v3970_v5 = vadd.f32 %v6889_v25, %v3858_v35 }
 0x3e9   : > { %4004 = vst [vmem:[%s7053_s17 + $0x38] sm:$0xff] %v3972_v39  ;;  %v4074_v6 = vmul.f32 %v3972_v39, %v3972_v39 }
 0x3ea   : > { %v4102_v14 = vadd.f32 %v4101_v3, %v4071_v15  ;;  %4002 = vst [vmem:[%s7053_s17 + $0x28] sm:$0xff] %v3970_v5  ;;  %v4033_v11 = vadd.f32 %v4032_v20, %v3970_v5  ;;  %v4072_v45 = vmul.f32 %v3970_v5, %v3970_v5  ;;  %v5313_v50 = vpop.f32.mrb[72].mxu1 }
 0x3eb   : > { %v3879_v60 = vadd.f32 %v5313_v50, %v7046_v61  ;;  %v3870_v63 = vpop.f32.mrb[73].mxu1 }
 0x3ec   : > { %v4034_v7 = vadd.f32 %v4033_v11, %v3971_v56  ;;  %v4103_v38 = vadd.f32 %v4102_v14, %v4072_v45  ;;  %v3871_v41 = vadd.f32 %v7046_v61, %v3870_v63  ;;  %v5314_v58 = vpop.f32.mrb[74].mxu1 }
 0x3ed   : > { %v3975_v25 = vadd.f32 %v6899_v8, %v3879_v60  ;;  %v3882_v12 = vadd.f32 %v5314_v58, %v7046_v61  ;;  %v3873_v36 = vpop.f32.mrb[75].mxu1 }
 0x3ee   : > { %v4104_v49 = vadd.f32 %v4103_v38, %v4073_v51  ;;  %v3973_v10 = vadd.f32 %v6902_v40, %v3871_v41  ;;  %v4035_v27 = vadd.f32 %v4034_v7, %v3972_v39  ;;  %v3874_v0 = vadd.f32 %v7046_v61, %v3873_v36 }
 0x3ef   : > { %4007 = vst [vmem:[%s7053_s17 + $0x50] sm:$0xff] %v3975_v25  ;;  %v3976_v44 = vadd.f32 %v6905_v59, %v3882_v12  ;;  %v4077_v33 = vmul.f32 %v3975_v25, %v3975_v25 }
 0x3f0   : > { %4005 = vst [vmem:[%s7053_s17 + $0x40] sm:$0xff] %v3973_v10  ;;  %v4036_v37 = vadd.f32 %v4035_v27, %v3973_v10  ;;  %v4075_v31 = vmul.f32 %v3973_v10, %v3973_v10  ;;  %v4105_v4 = vadd.f32 %v4104_v49, %v4074_v6  ;;  %v3974_v34 = vadd.f32 %v6911_v23, %v3874_v0 }
 0x3f1   : > { %4008 = vst [vmem:[%s7053_s17 + $0x58] sm:$0xff] %v3976_v44  ;;  %v4078_v1 = vmul.f32 %v3976_v44, %v3976_v44 }
 0x3f2   : > { %v4106_v8 = vadd.f32 %v4105_v4, %v4075_v31  ;;  %4006 = vst [vmem:[%s7053_s17 + $0x48] sm:$0xff] %v3974_v34  ;;  %v4037_v46 = vadd.f32 %v4036_v37, %v3974_v34  ;;  %v4076_v47 = vmul.f32 %v3974_v34, %v3974_v34  ;;  %v5317_v62 = vpop.f32.mrb[76].mxu1 }
 0x3f3   : > { %v3895_v40 = vadd.f32 %v5317_v62, %v7046_v61  ;;  %v3886_v56 = vpop.f32.mrb[77].mxu1 }
 0x3f4   : > { %v4038_v26 = vadd.f32 %v4037_v46, %v3975_v25  ;;  %v4107_v59 = vadd.f32 %v4106_v8, %v4076_v47  ;;  %v3887_v52 = vadd.f32 %v7046_v61, %v3886_v56  ;;  %v5318_v54 = vpop.f32.mrb[78].mxu1 }
 0x3f5   : > { %v3979_v23 = vadd.f32 %v6921_v19, %v3895_v40  ;;  %v3898_v35 = vadd.f32 %v5318_v54, %v7046_v61  ;;  %v3889_v39 = vpop.f32.mrb[79].mxu1 }
 0x3f6   : > { %v4108_v20 = vadd.f32 %v4107_v59, %v4077_v33  ;;  %v3977_v15 = vadd.f32 %v6924_v30, %v3887_v52  ;;  %v4039_v3 = vadd.f32 %v4038_v26, %v3976_v44  ;;  %v3890_v5 = vadd.f32 %v7046_v61, %v3889_v39 }
 0x3f7   : > { %4011 = vst [vmem:[%s7053_s17 + $0x70] sm:$0xff] %v3979_v23  ;;  %v3980_v14 = vadd.f32 %v6927_v21, %v3898_v35  ;;  %v4081_v41 = vmul.f32 %v3979_v23, %v3979_v23 }
 0x3f8   : > { %4009 = vst [vmem:[%s7053_s17 + $0x60] sm:$0xff] %v3977_v15  ;;  %v4040_v11 = vadd.f32 %v4039_v3, %v3977_v15  ;;  %v4079_v45 = vmul.f32 %v3977_v15, %v3977_v15  ;;  %v4109_v50 = vadd.f32 %v4108_v20, %v4078_v1  ;;  %v3978_v60 = vadd.f32 %v6933_v48, %v3890_v5 }
 0x3f9   : > { %4012 = vst [vmem:[%s7053_s17 + $0x78] sm:$0xff] %v3980_v14  ;;  %v4082_v12 = vmul.f32 %v3980_v14, %v3980_v14 }
 0x3fa   : > { %v4110_v19 = vadd.f32 %v4109_v50, %v4079_v45  ;;  %4010 = vst [vmem:[%s7053_s17 + $0x68] sm:$0xff] %v3978_v60  ;;  %v4041_v63 = vadd.f32 %v4040_v11, %v3978_v60  ;;  %v4080_v51 = vmul.f32 %v3978_v60, %v3978_v60  ;;  %v5321_v7 = vpop.f32.mrb[80].mxu1 }
 0x3fb   : > { %v3911_v30 = vadd.f32 %v5321_v7, %v7046_v61  ;;  %v3902_v38 = vpop.f32.mrb[81].mxu1 }
 0x3fc   : > { %v4042_v58 = vadd.f32 %v4041_v63, %v3979_v23  ;;  %v4111_v21 = vadd.f32 %v4110_v19, %v4080_v51  ;;  %v3903_v6 = vadd.f32 %v7046_v61, %v3902_v38  ;;  %v5322_v25 = vpop.f32.mrb[82].mxu1 }
 0x3fd   : > { %v3983_v48 = vadd.f32 %v6940_v18, %v3911_v30  ;;  %v3914_v36 = vadd.f32 %v5322_v25, %v7046_v61  ;;  %v3905_v49 = vpop.f32.mrb[83].mxu1 }
 0x3fe   : > { %v4112_v10 = vadd.f32 %v4111_v21, %v4081_v41  ;;  %v3981_v27 = vadd.f32 %v6943_v13, %v3903_v6  ;;  %v4043_v0 = vadd.f32 %v4042_v58, %v3980_v14  ;;  %v3906_v44 = vadd.f32 %v7046_v61, %v3905_v49 }
 0x3ff   : > { %4015 = vst [vmem:[%s7053_s17 + $0x90] sm:$0xff] %v3983_v48  ;;  %v3984_v37 = vadd.f32 %v6946_v42, %v3914_v36  ;;  %v4085_v56 = vmul.f32 %v3983_v48, %v3983_v48 }
 0x400   : > { %4013 = vst [vmem:[%s7053_s17 + $0x80] sm:$0xff] %v3981_v27  ;;  %v4044_v31 = vadd.f32 %v4043_v0, %v3981_v27  ;;  %v4083_v4 = vmul.f32 %v3981_v27, %v3981_v27  ;;  %v4113_v34 = vadd.f32 %v4112_v10, %v4082_v12  ;;  %v3982_v8 = vadd.f32 %v6949_v55, %v3906_v44 }
 0x401   : > { %4016 = vst [vmem:[%s7053_s17 + $0x98] sm:$0xff] %v3984_v37  ;;  %v4086_v52 = vmul.f32 %v3984_v37, %v3984_v37 }
 0x402   : > { %v4114_v18 = vadd.f32 %v4113_v34, %v4083_v4  ;;  %4014 = vst [vmem:[%s7053_s17 + $0x88] sm:$0xff] %v3982_v8  ;;  %v4045_v46 = vadd.f32 %v4044_v31, %v3982_v8  ;;  %v4084_v47 = vmul.f32 %v3982_v8, %v3982_v8  ;;  %v5325_v62 = vpop.f32.mrb[84].mxu1 }
 0x403   : > { %v3927_v13 = vadd.f32 %v5325_v62, %v7046_v61  ;;  %v3918_v40 = vpop.f32.mrb[85].mxu1 }
 0x404   : > { %v4046_v33 = vadd.f32 %v4045_v46, %v3983_v48  ;;  %v4115_v42 = vadd.f32 %v4114_v18, %v4084_v47  ;;  %v3919_v26 = vadd.f32 %v7046_v61, %v3918_v40  ;;  %v5326_v59 = vpop.f32.mrb[86].mxu1 }
 0x405   : > { %v3987_v55 = vadd.f32 %v6956_v16, %v3927_v13  ;;  %v3930_v54 = vadd.f32 %v5326_v59, %v7046_v61  ;;  %v3921_v1 = vpop.f32.mrb[87].mxu1 }
 0x406   : > { %v4116_v23 = vadd.f32 %v4115_v42, %v4085_v56  ;;  %v3985_v35 = vadd.f32 %v6959_v24, %v3919_v26  ;;  %v4047_v39 = vadd.f32 %v4046_v33, %v3984_v37  ;;  %v3922_v20 = vadd.f32 %v7046_v61, %v3921_v1 }
 0x407   : > { %4019 = vst [vmem:[%s7053_s17 + $0xb0] sm:$0xff] %v3987_v55  ;;  %v3988_v15 = vadd.f32 %v6962_v57, %v3930_v54  ;;  %v4089_v63 = vmul.f32 %v3987_v55, %v3987_v55 }
 0x408   : > { %4017 = vst [vmem:[%s7053_s17 + $0xa0] sm:$0xff] %v3985_v35  ;;  %v4048_v3 = vadd.f32 %v4047_v39, %v3985_v35  ;;  %v4087_v5 = vmul.f32 %v3985_v35, %v3985_v35  ;;  %v4117_v14 = vadd.f32 %v4116_v23, %v4086_v52  ;;  %v3986_v11 = vadd.f32 %v6965_v43, %v3922_v20 }
 0x409   : > { %4020 = vst [vmem:[%s7053_s17 + $0xb8] sm:$0xff] %v3988_v15  ;;  %v4090_v38 = vmul.f32 %v3988_v15, %v3988_v15 }
 0x40a   : > { %v4118_v16 = vadd.f32 %v4117_v14, %v4087_v5  ;;  %4018 = vst [vmem:[%s7053_s17 + $0xa8] sm:$0xff] %v3986_v11  ;;  %v4049_v45 = vadd.f32 %v4048_v3, %v3986_v11  ;;  %v4088_v50 = vmul.f32 %v3986_v11, %v3986_v11  ;;  %v5329_v60 = vpop.f32.mrb[88].mxu1 }
 0x40b   : > { %v3943_v24 = vadd.f32 %v5329_v60, %v7046_v61  ;;  %v3934_v19 = vpop.f32.mrb[89].mxu1 }
 0x40c   : > { %v4050_v51 = vadd.f32 %v4049_v45, %v3987_v55  ;;  %v4119_v57 = vadd.f32 %v4118_v16, %v4088_v50  ;;  %v3935_v7 = vadd.f32 %v7046_v61, %v3934_v19  ;;  %v5330_v30 = vpop.f32.mrb[90].mxu1 }
 0x40d   : > { %v3991_v43 = vadd.f32 %v6972_v53, %v3943_v24  ;;  %v3946_v41 = vadd.f32 %v5330_v30, %v7046_v61  ;;  %v3937_v58 = vpop.f32.mrb[91].mxu1 }
 0x40e   : > { %v4120_v21 = vadd.f32 %v4119_v57, %v4089_v63  ;;  %v3989_v6 = vadd.f32 %v6975_v22, %v3935_v7  ;;  %v4051_v25 = vadd.f32 %v4050_v51, %v3988_v15  ;;  %v3938_v12 = vadd.f32 %v7046_v61, %v3937_v58 }
 0x40f   : > { %4023 = vst [vmem:[%s7053_s17 + $0xd0] sm:$0xff] %v3991_v43  ;;  %v3992_v48 = vadd.f32 %v6978_v17, %v3946_v41  ;;  %v4093_v4 = vmul.f32 %v3991_v43, %v3991_v43 }
 0x410   : > { %4021 = vst [vmem:[%s7053_s17 + $0xc0] sm:$0xff] %v3989_v6  ;;  %v4052_v36 = vadd.f32 %v4051_v25, %v3989_v6  ;;  %v4091_v49 = vmul.f32 %v3989_v6, %v3989_v6  ;;  %v4121_v10 = vadd.f32 %v4120_v21, %v4090_v38  ;;  %v3990_v27 = vadd.f32 %v6981_v9, %v3938_v12 }
 0x411   : > { %4024 = vst [vmem:[%s7053_s17 + $0xd8] sm:$0xff] %v3992_v48  ;;  %v4094_v46 = vmul.f32 %v3992_v48, %v3992_v48 }
 0x412   : > { %v4122_v53 = vadd.f32 %v4121_v10, %v4091_v49  ;;  %4022 = vst [vmem:[%s7053_s17 + $0xc8] sm:$0xff] %v3990_v27  ;;  %v4053_v0 = vadd.f32 %v4052_v36, %v3990_v27  ;;  %v4092_v44 = vmul.f32 %v3990_v27, %v3990_v27  ;;  %v5333_v37 = vpop.f32.mrb[92].mxu1 }
 0x413   : > { %v3959_v22 = vadd.f32 %v5333_v37, %v7046_v61  ;;  %v3950_v31 = vpop.f32.mrb[93].mxu1 }
 0x414   : > { %v4054_v34 = vadd.f32 %v4053_v0, %v3991_v43  ;;  %v4123_v17 = vadd.f32 %v4122_v53, %v4092_v44  ;;  %v3951_v8 = vadd.f32 %v7046_v61, %v3950_v31  ;;  %v5334_v18 = vpop.f32.mrb[94].mxu1 }
 0x415   : > { %v3995_v9 = vadd.f32 %v6988_v28, %v3959_v22  ;;  %v3962_v47 = vadd.f32 %v5334_v18, %v7046_v61  ;;  %v3953_v62 = vpop.f32.mrb[95].mxu1 }
 0x416   : > { %v4124_v13 = vadd.f32 %v4123_v17, %v4093_v4  ;;  %v3993_v40 = vadd.f32 %v6991_v29, %v3951_v8  ;;  %v4055_v56 = vadd.f32 %v4054_v34, %v3992_v48  ;;  %v3954_v33 = vadd.f32 %v7046_v61, %v3953_v62 }
 0x417   : > { %4027 = vst [vmem:[%s7053_s17 + $0xf0] sm:$0xff] %v3995_v9  ;;  %v3996_v42 = vadd.f32 %v6994_v32, %v3962_v47  ;;  %v4097_v23 = vmul.f32 %v3995_v9, %v3995_v9 }
 0x418   : > { %4025 = vst [vmem:[%s7053_s17 + $0xe0] sm:$0xff] %v3993_v40  ;;  %v4056_v26 = vadd.f32 %v4055_v56, %v3993_v40  ;;  %v4095_v59 = vmul.f32 %v3993_v40, %v3993_v40  ;;  %v4125_v52 = vadd.f32 %v4124_v13, %v4094_v46  ;;  %v3994_v55 = vadd.f32 %v6997_v2, %v3954_v33 }
 0x419   : > { %4028 = vst [vmem:[%s7053_s17 + $0xf8] sm:$0xff] %v3996_v42  ;;  %v4098_v39 = vmul.f32 %v3996_v42, %v3996_v42 }
 0x41a   : > { %v4126_v28 = vadd.f32 %v4125_v52, %v4095_v59  ;;  %4026 = vst [vmem:[%s7053_s17 + $0xe8] sm:$0xff] %v3994_v55  ;;  %v4057_v54 = vadd.f32 %v4056_v26, %v3994_v55  ;;  %v4096_v1 = vmul.f32 %v3994_v55, %v3994_v55 }
 0x41c   : > { %v4058_v29 = vadd.f32 %v4057_v54, %v3995_v9  ;;  %v4127_v35 = vadd.f32 %v4126_v28, %v4096_v1 }
 0x41e   : > { %v4059_v61 = vadd.f32 %v4058_v29, %v3996_v42  ;;  %v4128_v20 = vadd.f32 %v4127_v35, %v4097_v23 }
 0x420   : > { %v4060_v32 = vrot.slane %v4059_v61, 4  ;;  %v4129_v15 = vadd.f32 %v4128_v20, %v4098_v39 }
 0x422   : > { %v4061_v3 = vadd.f32 %v4060_v32, %v4059_v61  ;;  %v4130_v5 = vrot.slane %v4129_v15, 4 }
 0x424   : > { %v4062_v14 = vrot.slane %v4061_v3, 2  ;;  %v4131_v11 = vadd.f32 %v4130_v5, %v4129_v15 }
 0x426   : > { %v4063_v2 = vadd.f32 %v4062_v14, %v4061_v3  ;;  %v4132_v16 = vrot.slane %v4131_v11, 2 }
 0x428   : > { %v4064_v45 = vrot.slane %v4063_v2, 1  ;;  %v4133_v50 = vadd.f32 %v4132_v16, %v4131_v11 }
 0x42a   : > { %v4065_v60 = vadd.f32 %v4064_v45, %v4063_v2  ;;  %v4134_v24 = vrot.slane %v4133_v50, 1 }
 0x42c   : > { %4066 = vst [vmem:[%s319_s19] sm:$0x1] %v4065_v60  ;;  %v4135_v19 = vadd.f32 %v4134_v24, %v4133_v50 }
 0x42e   : > { %4136 = vst [vmem:[%s322_s22] sm:$0x1] %v4135_v19 }
 0x42f PF: > { %s19_s27 = sadd.s32 1, %s5743_s27  }
 0x430   : > { %p16_p4 = scmp.ge.s32.totalorder %s19_s27, 4  }
 0x432   :  { %18 = sbr.rel (!%p16_p4) target bundleno = 1 (0x1), region = 106 }

</bundles_post_ra>
